<compile_context>
chip_gen: v6e
topology: v6e:2x2x1
jax: 0.10.0
libtpu: 0.0.40
codegen_flags: <defaults>
</compile_context>

<pallas_src>
import math
from functools import partial

import numpy as np

import jax
import jax.numpy as jnp
from jax import lax
from jax.experimental import pallas as pl
from jax.experimental.pallas import tpu as pltpu

EPS = 1e-5

# -------------------- model configuration (small, consistent) --------------------
BATCH = 2
IN_DIM = 8                       # latent dim
OUT_DIM = 32                     # power of 2
KERNEL_SIZE = 25
NUM_CHANNELS = [4, 16, 8, 8, 4]  # num_channels[0] = fc_out_channels
PADDING = 12
UPSAMPLE = 2                     # upsample path -> Conv1d with stride 1

FC_OUT_CHANNELS = NUM_CHANNELS[0]
FC_LENGTH = OUT_DIM // UPSAMPLE ** len(NUM_CHANNELS)      # == 1 for this config
FC_OUT_DIM = FC_OUT_CHANNELS * FC_LENGTH
assert FC_LENGTH == 1            # PyTorch BatchNorm1d equivalence of the fc block

# conv blocks: chained Transpose1DBlock(cin, cout, ...), last one maps to 1 channel
CHANNEL_PAIRS = tuple(zip(NUM_CHANNELS, NUM_CHANNELS[1:])) + ((NUM_CHANNELS[-1], 1),)

LANES = 128


def _round_up(x, m):
    return (x + m - 1) // m * m


# -------------------- static per-layer geometry (active tap window) ---------------
LAYER_GEOM = []
_len = FC_LENGTH
for _cin, _cout in CHANNEL_PAIRS:
    _lout = UPSAMPLE * _len
    _k0 = max(0, PADDING - _lout + 1)                 # first tap that touches real data
    _k1 = min(KERNEL_SIZE - 1, PADDING + _lout - 1)   # last tap that touches real data
    _na = _k1 - _k0 + 1
    LAYER_GEOM.append(dict(cin=_cin, cout=_cout, length=_len, lout=_lout,
                           k0=_k0, n_active=_na,
                           kc_active=_na * _cin,
                           kc_pad=_round_up(_na * _cin, LANES)))
    _len = _lout

_M_MAX = BATCH * OUT_DIM                              # 64 rows max
_KC_PAD_MAX = max(g["kc_pad"] for g in LAYER_GEOM)    # 256 lanes max

# -------------------- packed parameter buffer layout (static row offsets) ----------
OFF = {}
_row = 0


def _alloc(name, nrows):
    global _row
    OFF[name] = _row
    _row += _round_up(nrows, 8)       # keep every segment sublane-aligned


_alloc("fc_w", IN_DIM)                # (IN_DIM, FC_OUT_DIM)
_alloc("fc_vec", 3)                   # fc bias / gamma / beta rows
for _i, _g in enumerate(LAYER_GEOM):
    _alloc(f"u{_i}", BATCH * _g["lout"])   # constant upsample selection matrix
    _alloc(f"w{_i}", _g["kc_pad"])         # active-tap, 128-padded conv weight
    _alloc(f"v{_i}", 3)                    # conv bias / gamma / beta rows
PACKED_ROWS = _row


# -------------------- in-kernel helpers (value-level, fp32) -----------------------
def _bn_relu(h, gamma, beta):
    """Training-mode BatchNorm over rows (per column/channel), two-pass variance,
    then ReLU."""
    inv_m = 1.0 / h.shape[0]
    mean = jnp.sum(h, axis=0, keepdims=True) * inv_m
    d = h - mean
    var = jnp.sum(d * d, axis=0, keepdims=True) * inv_m
    hn = d * lax.rsqrt(var + EPS) * gamma + beta
    return jnp.maximum(hn, 0.0)


# -------------------- fused Pallas kernel: entire generator forward ---------------
def _wavegan_fused_kernel(x_ref, prm_ref, out_ref, patches_ref):
    def vec(off, row, width):
        return prm_ref[off + row:off + row + 1, 0:width]

    # fc block: Linear -> BatchNorm1d(train) -> ReLU      (FC_LENGTH == 1)
    fw = prm_ref[OFF["fc_w"]:OFF["fc_w"] + IN_DIM, 0:FC_OUT_DIM]
    h = jnp.dot(x_ref[...], fw, preferred_element_type=jnp.float32) \
        + vec(OFF["fc_vec"], 0, FC_OUT_DIM)
    h = _bn_relu(h, vec(OFF["fc_vec"], 1, FC_OUT_DIM), vec(OFF["fc_vec"], 2, FC_OUT_DIM))
    # rows of h are time-major (position, batch); with FC_LENGTH == 1 that is just batch.

    for li, g in enumerate(LAYER_GEOM):
        cin, cout = g["cin"], g["cout"]
        lout, length = g["lout"], g["length"]
        m = BATCH * lout
        kc_pad = g["kc_pad"]

        # nearest x2 upsample: one MXU matmul against a prep-time constant matrix
        u = prm_ref[OFF[f"u{li}"]:OFF[f"u{li}"] + m, 0:BATCH * length]
        up = jnp.dot(u, h, preferred_element_type=jnp.float32)       # (m, cin), time-major

        # zero only the lane-aligned slab region this layer's matmul will read
        patches_ref[0:m, 0:kc_pad] = jnp.zeros((m, kc_pad), jnp.float32)

        # im2col over the statically active taps only; time-major rows make every
        # tap's valid region one contiguous store (boundary rows stay zero).
        for t in range(g["n_active"]):
            k = g["k0"] + t
            lo = max(0, PADDING - k)
            hi = min(lout, lout + PADDING - k)
            src = (lo + k - PADDING) * BATCH
            patches_ref[lo * BATCH:hi * BATCH, t * cin:(t + 1) * cin] = \
                up[src:src + (hi - lo) * BATCH, :]

        # Conv1d as one MXU matmul over the active (128-padded) contraction;
        # padded weight rows are zero, so stale pad columns contribute nothing.
        w = prm_ref[OFF[f"w{li}"]:OFF[f"w{li}"] + kc_pad, 0:cout]
        y = jnp.dot(patches_ref[0:m, 0:kc_pad], w,
                    preferred_element_type=jnp.float32) + vec(OFF[f"v{li}"], 0, cout)
        h = _bn_relu(y, vec(OFF[f"v{li}"], 1, cout), vec(OFF[f"v{li}"], 2, cout))

    # final tanh; rows are time-major (position, batch) -> (B*OUT_DIM, 1)
    out_ref[...] = jnp.tanh(h)


def _cost_estimate():
    flops = 2 * BATCH * IN_DIM * FC_OUT_DIM
    transc = FC_OUT_DIM
    for g in LAYER_GEOM:
        m = BATCH * g["lout"]
        flops += 2 * m * BATCH * g["length"] * g["cin"]     # upsample matmul
        flops += 2 * m * g["kc_pad"] * g["cout"]            # conv matmul
        transc += g["cout"]                                  # rsqrt per BN
    transc += BATCH * OUT_DIM                                # tanh
    bytes_accessed = 4 * (PACKED_ROWS * LANES + BATCH * IN_DIM + BATCH * OUT_DIM)
    return pl.CostEstimate(flops=flops, transcendentals=transc,
                           bytes_accessed=bytes_accessed)


def _build_fused_call():
    vmem = pl.BlockSpec(memory_space=pltpu.MemorySpace.VMEM)
    return pl.pallas_call(
        _wavegan_fused_kernel,
        out_shape=jax.ShapeDtypeStruct((BATCH * OUT_DIM, 1), jnp.float32),
        in_specs=[vmem, vmem],                 # x + ONE packed parameter buffer
        out_specs=vmem,
        scratch_shapes=[pltpu.VMEM((_M_MAX, _KC_PAD_MAX), jnp.float32)],
        cost_estimate=_cost_estimate(),
    )


_FUSED_CALL = _build_fused_call()


# -------------------- one-time parameter packing ----------------------------------
def prepare_kernel_params(params):
    """Pack ALL parameters plus the constant upsample matrices into one lane-padded
    fp32 buffer (single HBM->VMEM DMA).  Conv weights are pre-sliced to the active
    tap window and zero-padded to a 128-multiple contraction."""
    buf = np.zeros((PACKED_ROWS, LANES), np.float32)

    buf[OFF["fc_w"]:OFF["fc_w"] + IN_DIM, 0:FC_OUT_DIM] = \
        np.asarray(params["fc_w"], np.float32).T
    buf[OFF["fc_vec"] + 0, 0:FC_OUT_DIM] = np.asarray(params["fc_b"], np.float32)
    buf[OFF["fc_vec"] + 1, 0:FC_OUT_DIM] = np.asarray(params["fc_g"], np.float32)
    buf[OFF["fc_vec"] + 2, 0:FC_OUT_DIM] = np.asarray(params["fc_beta"], np.float32)

    for li, (blk, g) in enumerate(zip(params["blocks"], LAYER_GEOM)):
        # nearest x2 upsample selection matrix, time-major rows (position, batch)
        u = np.zeros((BATCH * g["lout"], BATCH * g["length"]), np.float32)
        for p in range(g["lout"]):
            for b in range(BATCH):
                u[p * BATCH + b, (p // UPSAMPLE) * BATCH + b] = 1.0
        buf[OFF[f"u{li}"]:OFF[f"u{li}"] + BATCH * g["lout"], 0:BATCH * g["length"]] = u

        # conv weight (cout, cin, K) -> rows (tap, cin), restricted to active taps
        w = np.asarray(blk["w"], np.float32).transpose(2, 1, 0)          # (K, cin, cout)
        w = w[g["k0"]:g["k0"] + g["n_active"]].reshape(g["kc_active"], g["cout"])
        buf[OFF[f"w{li}"]:OFF[f"w{li}"] + g["kc_active"], 0:g["cout"]] = w
        # rows kc_active..kc_pad stay zero -> padded patch columns contribute nothing

        buf[OFF[f"v{li}"] + 0, 0:g["cout"]] = np.asarray(blk["b"], np.float32)
        buf[OFF[f"v{li}"] + 1, 0:g["cout"]] = np.asarray(blk["g"], np.float32)
        buf[OFF[f"v{li}"] + 2, 0:g["cout"]] = np.asarray(blk["beta"], np.float32)

    return jnp.asarray(buf)


# -------------------- jitted forward (single fused kernel + tiny reshape) ---------
@jax.jit
def wavegan_generator_forward(x, packed_params):
    out = _FUSED_CALL(x.astype(jnp.float32), packed_params)   # (OUT_DIM*B, 1), (t, b) rows
    # back to PyTorch NCL layout (B, 1, OUT_DIM); tiny layout-only op outside the kernel.
    return out.reshape(OUT_DIM, BATCH).T[:, None, :]


# -------------------- pure-JAX reference (NCL, mirrors PyTorch semantics) ---------
def reference_forward(x, params):
    h = x @ params["fc_w"].T + params["fc_b"]
    mean = h.mean(axis=0)
    var = ((h - mean) ** 2).mean(axis=0)
    h = (h - mean) / jnp.sqrt(var + EPS) * params["fc_g"] + params["fc_beta"]
    h = jnp.maximum(h, 0.0)
    h = h.reshape(x.shape[0], FC_OUT_CHANNELS, FC_LENGTH)          # NCL
    for blk in params["blocks"]:
        h = jnp.repeat(h, UPSAMPLE, axis=2)                        # nearest upsample
        h = lax.conv_general_dilated(h, blk["w"], (1,), [(PADDING, PADDING)],
                                     dimension_numbers=("NCH", "OIH", "NCH"))
        h = h + blk["b"][None, :, None]
        mean = h.mean(axis=(0, 2), keepdims=True)
        var = ((h - mean) ** 2).mean(axis=(0, 2), keepdims=True)
        h = (h - mean) / jnp.sqrt(var + EPS) * blk["g"][None, :, None] \
            + blk["beta"][None, :, None]
        h = jnp.maximum(h, 0.0)
    return jnp.tanh(h)


# -------------------- deterministic parameter construction ------------------------
def make_params(key):
    keys = jax.random.split(key, 4 + 4 * len(NUM_CHANNELS))
    params = {}
    params["fc_w"] = (jax.random.normal(keys[0], (FC_OUT_DIM, IN_DIM), jnp.float32)
                      * math.sqrt(2.0 / IN_DIM))
    params["fc_b"] = jax.random.normal(keys[1], (FC_OUT_DIM,), jnp.float32) * 0.01
    params["fc_g"] = jnp.ones((FC_OUT_DIM,), jnp.float32)
    params["fc_beta"] = jnp.zeros((FC_OUT_DIM,), jnp.float32)

    blocks = []
    for bi, (cin, cout) in enumerate(CHANNEL_PAIRS):
        kw, kb = jax.random.split(keys[4 + bi], 2)
        w = (jax.random.normal(kw, (cout, cin, KERNEL_SIZE), jnp.float32)
             * math.sqrt(2.0 / (cin * KERNEL_SIZE)))
        b = jax.random.normal(kb, (cout,), jnp.float32) * 0.01
        blocks.append({"w": w, "b": b,
                       "g": jnp.ones((cout,), jnp.float32),
                       "beta": jnp.zeros((cout,), jnp.float32)})
    params["blocks"] = blocks
    return params


if __name__ == "__main__":
    root = jax.random.PRNGKey(0)
    k_params, k_x = jax.random.split(root)
    params = make_params(k_params)
    packed = prepare_kernel_params(params)            # one-time packing (single buffer)
    x = jax.random.normal(k_x, (BATCH, IN_DIM), jnp.float32)

    out = jax.block_until_ready(wavegan_generator_forward(x, packed))
    assert out.shape == (BATCH, 1, OUT_DIM), out.shape

    ref = jax.block_until_ready(reference_forward(x, params))
    assert jnp.allclose(out, ref, atol=5e-2, rtol=5e-2), float(jnp.abs(out - ref).max())

    print("KERNEL_OK")
</pallas_src>

<mosaic_0001>
module attributes {stable_mosaic.version = 11 : i64} {
  func.func @_wavegan_fused_kernel(%arg0: memref<2x8xf32, #tpu.memory_space<vmem>>, %arg1: memref<952x128xf32, #tpu.memory_space<vmem>>, %arg2: memref<64x1xf32, #tpu.memory_space<vmem>>, %arg3: memref<64x256xf32, #tpu.memory_space<vmem>>) attributes {dimension_semantics = [], scalar_prefetch = 0 : i64, scratch_operands = 1 : i64, tpu.core_type = #tpu.core_type<tc>} {
    %c0 = arith.constant 0 : index
    %c0_0 = arith.constant 0 : index
    %0 = vector.load %arg1[%c0, %c0_0] : memref<952x128xf32, #tpu.memory_space<vmem>>, vector<8x4xf32>
    %c0_1 = arith.constant 0 : index
    %c0_2 = arith.constant 0 : index
    %1 = vector.load %arg0[%c0_1, %c0_2] : memref<2x8xf32, #tpu.memory_space<vmem>>, vector<2x8xf32>
    %cst = arith.constant dense<0.000000e+00> : vector<2x4xf32>
    %2 = tpu.matmul %1, %0, %cst {dimension_numbers = #tpu.dot_dimension_numbers<[1], [0], [0], [1], [0, 0, 1, 1], [], []>} : vector<2x8xf32>, vector<8x4xf32>, vector<2x4xf32> -> vector<2x4xf32>
    %c8 = arith.constant 8 : index
    %c0_3 = arith.constant 0 : index
    %3 = vector.load %arg1[%c8, %c0_3] : memref<952x128xf32, #tpu.memory_space<vmem>>, vector<1x4xf32>
    %4 = vector.broadcast %3 : vector<1x4xf32> to vector<2x4xf32>
    %5 = arith.addf %2, %4 : vector<2x4xf32>
    %c9 = arith.constant 9 : index
    %c0_4 = arith.constant 0 : index
    %6 = vector.load %arg1[%c9, %c0_4] : memref<952x128xf32, #tpu.memory_space<vmem>>, vector<1x4xf32>
    %c10 = arith.constant 10 : index
    %c0_5 = arith.constant 0 : index
    %7 = vector.load %arg1[%c10, %c0_5] : memref<952x128xf32, #tpu.memory_space<vmem>>, vector<1x4xf32>
    %cst_6 = arith.constant dense<0.000000e+00> : vector<4xf32>
    %8 = vector.multi_reduction <add>, %5, %cst_6 [0] : vector<2x4xf32> to vector<4xf32>
    %9 = vector.shape_cast %8 : vector<4xf32> to vector<1x4xf32>
    %cst_7 = arith.constant 5.000000e-01 : f32
    %10 = vector.broadcast %cst_7 : f32 to vector<1x4xf32>
    %11 = arith.mulf %9, %10 : vector<1x4xf32>
    %12 = vector.broadcast %11 : vector<1x4xf32> to vector<2x4xf32>
    %13 = arith.subf %5, %12 : vector<2x4xf32>
    %14 = arith.mulf %13, %13 : vector<2x4xf32>
    %cst_8 = arith.constant dense<0.000000e+00> : vector<4xf32>
    %15 = vector.multi_reduction <add>, %14, %cst_8 [0] : vector<2x4xf32> to vector<4xf32>
    %16 = vector.shape_cast %15 : vector<4xf32> to vector<1x4xf32>
    %cst_9 = arith.constant 5.000000e-01 : f32
    %17 = vector.broadcast %cst_9 : f32 to vector<1x4xf32>
    %18 = arith.mulf %16, %17 : vector<1x4xf32>
    %cst_10 = arith.constant 9.99999974E-6 : f32
    %19 = vector.broadcast %cst_10 : f32 to vector<1x4xf32>
    %20 = arith.addf %18, %19 : vector<1x4xf32>
    %21 = math.rsqrt %20 : vector<1x4xf32>
    %22 = vector.broadcast %21 : vector<1x4xf32> to vector<2x4xf32>
    %23 = arith.mulf %13, %22 : vector<2x4xf32>
    %24 = vector.broadcast %6 : vector<1x4xf32> to vector<2x4xf32>
    %25 = arith.mulf %23, %24 : vector<2x4xf32>
    %26 = vector.broadcast %7 : vector<1x4xf32> to vector<2x4xf32>
    %27 = arith.addf %25, %26 : vector<2x4xf32>
    %cst_11 = arith.constant 0.000000e+00 : f32
    %28 = vector.broadcast %cst_11 : f32 to vector<2x4xf32>
    %29 = arith.maximumf %27, %28 : vector<2x4xf32>
    %c16 = arith.constant 16 : index
    %c0_12 = arith.constant 0 : index
    %30 = vector.load %arg1[%c16, %c0_12] : memref<952x128xf32, #tpu.memory_space<vmem>>, vector<4x2xf32>
    %cst_13 = arith.constant dense<0.000000e+00> : vector<4x4xf32>
    %31 = tpu.matmul %30, %29, %cst_13 {dimension_numbers = #tpu.dot_dimension_numbers<[1], [0], [0], [1], [0, 0, 1, 1], [], []>} : vector<4x2xf32>, vector<2x4xf32>, vector<4x4xf32> -> vector<4x4xf32>
    %cst_14 = arith.constant 0.000000e+00 : f32
    %32 = vector.broadcast %cst_14 : f32 to vector<4x128xf32>
    %c0_15 = arith.constant 0 : index
    %c0_16 = arith.constant 0 : index
    %33 = vector.load %arg3[%c0_15, %c0_16] : memref<64x256xf32, #tpu.memory_space<vmem>>, vector<4x128xf32>
    tpu.vector_store %arg3[%c0_15, %c0_16], %32 {strides = array<i32>} : memref<64x256xf32, #tpu.memory_space<vmem>>, vector<4x128xf32>,
    %34 = vector.extract_strided_slice %31 {offsets = [0, 0], sizes = [2, 4], strides = [1, 1]} : vector<4x4xf32> to vector<2x4xf32>
    %c2 = arith.constant 2 : index
    %c0_17 = arith.constant 0 : index
    %35 = vector.load %arg3[%c2, %c0_17] : memref<64x256xf32, #tpu.memory_space<vmem>>, vector<2x4xf32>
    tpu.vector_store %arg3[%c2, %c0_17], %34 {strides = array<i32>} : memref<64x256xf32, #tpu.memory_space<vmem>>, vector<2x4xf32>,
    %c0_18 = arith.constant 0 : index
    %c4 = arith.constant 4 : index
    %36 = vector.load %arg3[%c0_18, %c4] : memref<64x256xf32, #tpu.memory_space<vmem>>, vector<4x4xf32>
    tpu.vector_store %arg3[%c0_18, %c4], %31 {strides = array<i32>} : memref<64x256xf32, #tpu.memory_space<vmem>>, vector<4x4xf32>,
    %37 = vector.extract_strided_slice %31 {offsets = [2, 0], sizes = [2, 4], strides = [1, 1]} : vector<4x4xf32> to vector<2x4xf32>
    %c0_19 = arith.constant 0 : index
    %c8_20 = arith.constant 8 : index
    %38 = vector.load %arg3[%c0_19, %c8_20] : memref<64x256xf32, #tpu.memory_space<vmem>>, vector<2x4xf32>
    tpu.vector_store %arg3[%c0_19, %c8_20], %37 {strides = array<i32>} : memref<64x256xf32, #tpu.memory_space<vmem>>, vector<2x4xf32>,
    %c24 = arith.constant 24 : index
    %c0_21 = arith.constant 0 : index
    %39 = vector.load %arg1[%c24, %c0_21] : memref<952x128xf32, #tpu.memory_space<vmem>>, vector<128x16xf32>
    %c0_22 = arith.constant 0 : index
    %c0_23 = arith.constant 0 : index
    %40 = vector.load %arg3[%c0_22, %c0_23] : memref<64x256xf32, #tpu.memory_space<vmem>>, vector<4x128xf32>
    %cst_24 = arith.constant dense<0.000000e+00> : vector<4x16xf32>
    %41 = tpu.matmul %40, %39, %cst_24 {dimension_numbers = #tpu.dot_dimension_numbers<[1], [0], [0], [1], [0, 0, 1, 1], [], []>} : vector<4x128xf32>, vector<128x16xf32>, vector<4x16xf32> -> vector<4x16xf32>
    %c152 = arith.constant 152 : index
    %c0_25 = arith.constant 0 : index
    %42 = vector.load %arg1[%c152, %c0_25] : memref<952x128xf32, #tpu.memory_space<vmem>>, vector<1x16xf32>
    %43 = vector.broadcast %42 : vector<1x16xf32> to vector<4x16xf32>
    %44 = arith.addf %41, %43 : vector<4x16xf32>
    %c153 = arith.constant 153 : index
    %c0_26 = arith.constant 0 : index
    %45 = vector.load %arg1[%c153, %c0_26] : memref<952x128xf32, #tpu.memory_space<vmem>>, vector<1x16xf32>
    %c154 = arith.constant 154 : index
    %c0_27 = arith.constant 0 : index
    %46 = vector.load %arg1[%c154, %c0_27] : memref<952x128xf32, #tpu.memory_space<vmem>>, vector<1x16xf32>
    %cst_28 = arith.constant dense<0.000000e+00> : vector<16xf32>
    %47 = vector.multi_reduction <add>, %44, %cst_28 [0] : vector<4x16xf32> to vector<16xf32>
    %48 = vector.shape_cast %47 : vector<16xf32> to vector<1x16xf32>
    %cst_29 = arith.constant 2.500000e-01 : f32
    %49 = vector.broadcast %cst_29 : f32 to vector<1x16xf32>
    %50 = arith.mulf %48, %49 : vector<1x16xf32>
    %51 = vector.broadcast %50 : vector<1x16xf32> to vector<4x16xf32>
    %52 = arith.subf %44, %51 : vector<4x16xf32>
    %53 = arith.mulf %52, %52 : vector<4x16xf32>
    %cst_30 = arith.constant dense<0.000000e+00> : vector<16xf32>
    %54 = vector.multi_reduction <add>, %53, %cst_30 [0] : vector<4x16xf32> to vector<16xf32>
    %55 = vector.shape_cast %54 : vector<16xf32> to vector<1x16xf32>
    %cst_31 = arith.constant 2.500000e-01 : f32
    %56 = vector.broadcast %cst_31 : f32 to vector<1x16xf32>
    %57 = arith.mulf %55, %56 : vector<1x16xf32>
    %cst_32 = arith.constant 9.99999974E-6 : f32
    %58 = vector.broadcast %cst_32 : f32 to vector<1x16xf32>
    %59 = arith.addf %57, %58 : vector<1x16xf32>
    %60 = math.rsqrt %59 : vector<1x16xf32>
    %61 = vector.broadcast %60 : vector<1x16xf32> to vector<4x16xf32>
    %62 = arith.mulf %52, %61 : vector<4x16xf32>
    %63 = vector.broadcast %45 : vector<1x16xf32> to vector<4x16xf32>
    %64 = arith.mulf %62, %63 : vector<4x16xf32>
    %65 = vector.broadcast %46 : vector<1x16xf32> to vector<4x16xf32>
    %66 = arith.addf %64, %65 : vector<4x16xf32>
    %cst_33 = arith.constant 0.000000e+00 : f32
    %67 = vector.broadcast %cst_33 : f32 to vector<4x16xf32>
    %68 = arith.maximumf %66, %67 : vector<4x16xf32>
    %c160 = arith.constant 160 : index
    %c0_34 = arith.constant 0 : index
    %69 = vector.load %arg1[%c160, %c0_34] : memref<952x128xf32, #tpu.memory_space<vmem>>, vector<8x4xf32>
    %cst_35 = arith.constant dense<0.000000e+00> : vector<8x16xf32>
    %70 = tpu.matmul %69, %68, %cst_35 {dimension_numbers = #tpu.dot_dimension_numbers<[1], [0], [0], [1], [0, 0, 1, 1], [], []>} : vector<8x4xf32>, vector<4x16xf32>, vector<8x16xf32> -> vector<8x16xf32>
    %cst_36 = arith.constant 0.000000e+00 : f32
    %71 = vector.broadcast %cst_36 : f32 to vector<8x128xf32>
    %c0_37 = arith.constant 0 : index
    %c0_38 = arith.constant 0 : index
    %72 = vector.load %arg3[%c0_37, %c0_38] : memref<64x256xf32, #tpu.memory_space<vmem>>, vector<8x128xf32>
    tpu.vector_store %arg3[%c0_37, %c0_38], %71 {strides = array<i32>} : memref<64x256xf32, #tpu.memory_space<vmem>>, vector<8x128xf32>,
    %73 = vector.extract_strided_slice %70 {offsets = [0, 0], sizes = [2, 16], strides = [1, 1]} : vector<8x16xf32> to vector<2x16xf32>
    %c6 = arith.constant 6 : index
    %c0_39 = arith.constant 0 : index
    %74 = vector.load %arg3[%c6, %c0_39] : memref<64x256xf32, #tpu.memory_space<vmem>>, vector<2x16xf32>
    tpu.vector_store %arg3[%c6, %c0_39], %73 {strides = array<i32>} : memref<64x256xf32, #tpu.memory_space<vmem>>, vector<2x16xf32>,
    %75 = vector.extract_strided_slice %70 {offsets = [0, 0], sizes = [4, 16], strides = [1, 1]} : vector<8x16xf32> to vector<4x16xf32>
    %c4_40 = arith.constant 4 : index
    %c16_41 = arith.constant 16 : index
    %76 = vector.load %arg3[%c4_40, %c16_41] : memref<64x256xf32, #tpu.memory_space<vmem>>, vector<4x16xf32>
    tpu.vector_store %arg3[%c4_40, %c16_41], %75 {strides = array<i32>} : memref<64x256xf32, #tpu.memory_space<vmem>>, vector<4x16xf32>,
    %77 = vector.extract_strided_slice %70 {offsets = [0, 0], sizes = [6, 16], strides = [1, 1]} : vector<8x16xf32> to vector<6x16xf32>
    %c2_42 = arith.constant 2 : index
    %c32 = arith.constant 32 : index
    %78 = vector.load %arg3[%c2_42, %c32] : memref<64x256xf32, #tpu.memory_space<vmem>>, vector<6x16xf32>
    tpu.vector_store %arg3[%c2_42, %c32], %77 {strides = array<i32>} : memref<64x256xf32, #tpu.memory_space<vmem>>, vector<6x16xf32>,
    %c0_43 = arith.constant 0 : index
    %c48 = arith.constant 48 : index
    %79 = vector.load %arg3[%c0_43, %c48] : memref<64x256xf32, #tpu.memory_space<vmem>>, vector<8x16xf32>
    tpu.vector_store %arg3[%c0_43, %c48], %70 {strides = array<i32>} : memref<64x256xf32, #tpu.memory_space<vmem>>, vector<8x16xf32>,
    %80 = vector.extract_strided_slice %70 {offsets = [2, 0], sizes = [6, 16], strides = [1, 1]} : vector<8x16xf32> to vector<6x16xf32>
    %c0_44 = arith.constant 0 : index
    %c64 = arith.constant 64 : index
    %81 = vector.load %arg3[%c0_44, %c64] : memref<64x256xf32, #tpu.memory_space<vmem>>, vector<6x16xf32>
    tpu.vector_store %arg3[%c0_44, %c64], %80 {strides = array<i32>} : memref<64x256xf32, #tpu.memory_space<vmem>>, vector<6x16xf32>,
    %82 = vector.extract_strided_slice %70 {offsets = [4, 0], sizes = [4, 16], strides = [1, 1]} : vector<8x16xf32> to vector<4x16xf32>
    %c0_45 = arith.constant 0 : index
    %c80 = arith.constant 80 : index
    %83 = vector.load %arg3[%c0_45, %c80] : memref<64x256xf32, #tpu.memory_space<vmem>>, vector<4x16xf32>
    tpu.vector_store %arg3[%c0_45, %c80], %82 {strides = array<i32>} : memref<64x256xf32, #tpu.memory_space<vmem>>, vector<4x16xf32>,
    %84 = vector.extract_strided_slice %70 {offsets = [6, 0], sizes = [2, 16], strides = [1, 1]} : vector<8x16xf32> to vector<2x16xf32>
    %c0_46 = arith.constant 0 : index
    %c96 = arith.constant 96 : index
    %85 = vector.load %arg3[%c0_46, %c96] : memref<64x256xf32, #tpu.memory_space<vmem>>, vector<2x16xf32>
    tpu.vector_store %arg3[%c0_46, %c96], %84 {strides = array<i32>} : memref<64x256xf32, #tpu.memory_space<vmem>>, vector<2x16xf32>,
    %c168 = arith.constant 168 : index
    %c0_47 = arith.constant 0 : index
    %86 = vector.load %arg1[%c168, %c0_47] : memref<952x128xf32, #tpu.memory_space<vmem>>, vector<128x8xf32>
    %c0_48 = arith.constant 0 : index
    %c0_49 = arith.constant 0 : index
    %87 = vector.load %arg3[%c0_48, %c0_49] : memref<64x256xf32, #tpu.memory_space<vmem>>, vector<8x128xf32>
    %cst_50 = arith.constant dense<0.000000e+00> : vector<8x8xf32>
    %88 = tpu.matmul %87, %86, %cst_50 {dimension_numbers = #tpu.dot_dimension_numbers<[1], [0], [0], [1], [0, 0, 1, 1], [], []>} : vector<8x128xf32>, vector<128x8xf32>, vector<8x8xf32> -> vector<8x8xf32>
    %c296 = arith.constant 296 : index
    %c0_51 = arith.constant 0 : index
    %89 = vector.load %arg1[%c296, %c0_51] : memref<952x128xf32, #tpu.memory_space<vmem>>, vector<1x8xf32>
    %90 = vector.broadcast %89 : vector<1x8xf32> to vector<8x8xf32>
    %91 = arith.addf %88, %90 : vector<8x8xf32>
    %c297 = arith.constant 297 : index
    %c0_52 = arith.constant 0 : index
    %92 = vector.load %arg1[%c297, %c0_52] : memref<952x128xf32, #tpu.memory_space<vmem>>, vector<1x8xf32>
    %c298 = arith.constant 298 : index
    %c0_53 = arith.constant 0 : index
    %93 = vector.load %arg1[%c298, %c0_53] : memref<952x128xf32, #tpu.memory_space<vmem>>, vector<1x8xf32>
    %cst_54 = arith.constant dense<0.000000e+00> : vector<8xf32>
    %94 = vector.multi_reduction <add>, %91, %cst_54 [0] : vector<8x8xf32> to vector<8xf32>
    %95 = vector.shape_cast %94 : vector<8xf32> to vector<1x8xf32>
    %cst_55 = arith.constant 1.250000e-01 : f32
    %96 = vector.broadcast %cst_55 : f32 to vector<1x8xf32>
    %97 = arith.mulf %95, %96 : vector<1x8xf32>
    %98 = vector.broadcast %97 : vector<1x8xf32> to vector<8x8xf32>
    %99 = arith.subf %91, %98 : vector<8x8xf32>
    %100 = arith.mulf %99, %99 : vector<8x8xf32>
    %cst_56 = arith.constant dense<0.000000e+00> : vector<8xf32>
    %101 = vector.multi_reduction <add>, %100, %cst_56 [0] : vector<8x8xf32> to vector<8xf32>
    %102 = vector.shape_cast %101 : vector<8xf32> to vector<1x8xf32>
    %cst_57 = arith.constant 1.250000e-01 : f32
    %103 = vector.broadcast %cst_57 : f32 to vector<1x8xf32>
    %104 = arith.mulf %102, %103 : vector<1x8xf32>
    %cst_58 = arith.constant 9.99999974E-6 : f32
    %105 = vector.broadcast %cst_58 : f32 to vector<1x8xf32>
    %106 = arith.addf %104, %105 : vector<1x8xf32>
    %107 = math.rsqrt %106 : vector<1x8xf32>
    %108 = vector.broadcast %107 : vector<1x8xf32> to vector<8x8xf32>
    %109 = arith.mulf %99, %108 : vector<8x8xf32>
    %110 = vector.broadcast %92 : vector<1x8xf32> to vector<8x8xf32>
    %111 = arith.mulf %109, %110 : vector<8x8xf32>
    %112 = vector.broadcast %93 : vector<1x8xf32> to vector<8x8xf32>
    %113 = arith.addf %111, %112 : vector<8x8xf32>
    %cst_59 = arith.constant 0.000000e+00 : f32
    %114 = vector.broadcast %cst_59 : f32 to vector<8x8xf32>
    %115 = arith.maximumf %113, %114 : vector<8x8xf32>
    %c304 = arith.constant 304 : index
    %c0_60 = arith.constant 0 : index
    %116 = vector.load %arg1[%c304, %c0_60] : memref<952x128xf32, #tpu.memory_space<vmem>>, vector<16x8xf32>
    %cst_61 = arith.constant dense<0.000000e+00> : vector<16x8xf32>
    %117 = tpu.matmul %116, %115, %cst_61 {dimension_numbers = #tpu.dot_dimension_numbers<[1], [0], [0], [1], [0, 0, 1, 1], [], []>} : vector<16x8xf32>, vector<8x8xf32>, vector<16x8xf32> -> vector<16x8xf32>
    %cst_62 = arith.constant 0.000000e+00 : f32
    %118 = vector.broadcast %cst_62 : f32 to vector<16x128xf32>
    %c0_63 = arith.constant 0 : index
    %c0_64 = arith.constant 0 : index
    %119 = vector.load %arg3[%c0_63, %c0_64] : memref<64x256xf32, #tpu.memory_space<vmem>>, vector<16x128xf32>
    tpu.vector_store %arg3[%c0_63, %c0_64], %118 {strides = array<i32>} : memref<64x256xf32, #tpu.memory_space<vmem>>, vector<16x128xf32>,
    %120 = vector.extract_strided_slice %117 {offsets = [0, 0], sizes = [2, 8], strides = [1, 1]} : vector<16x8xf32> to vector<2x8xf32>
    %c14 = arith.constant 14 : index
    %c0_65 = arith.constant 0 : index
    %121 = vector.load %arg3[%c14, %c0_65] : memref<64x256xf32, #tpu.memory_space<vmem>>, vector<2x8xf32>
    tpu.vector_store %arg3[%c14, %c0_65], %120 {strides = array<i32>} : memref<64x256xf32, #tpu.memory_space<vmem>>, vector<2x8xf32>,
    %122 = vector.extract_strided_slice %117 {offsets = [0, 0], sizes = [4, 8], strides = [1, 1]} : vector<16x8xf32> to vector<4x8xf32>
    %c12 = arith.constant 12 : index
    %c8_66 = arith.constant 8 : index
    %123 = vector.load %arg3[%c12, %c8_66] : memref<64x256xf32, #tpu.memory_space<vmem>>, vector<4x8xf32>
    tpu.vector_store %arg3[%c12, %c8_66], %122 {strides = array<i32>} : memref<64x256xf32, #tpu.memory_space<vmem>>, vector<4x8xf32>,
    %124 = vector.extract_strided_slice %117 {offsets = [0, 0], sizes = [6, 8], strides = [1, 1]} : vector<16x8xf32> to vector<6x8xf32>
    %c10_67 = arith.constant 10 : index
    %c16_68 = arith.constant 16 : index
    %125 = vector.load %arg3[%c10_67, %c16_68] : memref<64x256xf32, #tpu.memory_space<vmem>>, vector<6x8xf32>
    tpu.vector_store %arg3[%c10_67, %c16_68], %124 {strides = array<i32>} : memref<64x256xf32, #tpu.memory_space<vmem>>, vector<6x8xf32>,
    %126 = vector.extract_strided_slice %117 {offsets = [0, 0], sizes = [8, 8], strides = [1, 1]} : vector<16x8xf32> to vector<8x8xf32>
    %c8_69 = arith.constant 8 : index
    %c24_70 = arith.constant 24 : index
    %127 = vector.load %arg3[%c8_69, %c24_70] : memref<64x256xf32, #tpu.memory_space<vmem>>, vector<8x8xf32>
    tpu.vector_store %arg3[%c8_69, %c24_70], %126 {strides = array<i32>} : memref<64x256xf32, #tpu.memory_space<vmem>>, vector<8x8xf32>,
    %128 = vector.extract_strided_slice %117 {offsets = [0, 0], sizes = [10, 8], strides = [1, 1]} : vector<16x8xf32> to vector<10x8xf32>
    %c6_71 = arith.constant 6 : index
    %c32_72 = arith.constant 32 : index
    %129 = vector.load %arg3[%c6_71, %c32_72] : memref<64x256xf32, #tpu.memory_space<vmem>>, vector<10x8xf32>
    tpu.vector_store %arg3[%c6_71, %c32_72], %128 {strides = array<i32>} : memref<64x256xf32, #tpu.memory_space<vmem>>, vector<10x8xf32>,
    %130 = vector.extract_strided_slice %117 {offsets = [0, 0], sizes = [12, 8], strides = [1, 1]} : vector<16x8xf32> to vector<12x8xf32>
    %c4_73 = arith.constant 4 : index
    %c40 = arith.constant 40 : index
    %131 = vector.load %arg3[%c4_73, %c40] : memref<64x256xf32, #tpu.memory_space<vmem>>, vector<12x8xf32>
    tpu.vector_store %arg3[%c4_73, %c40], %130 {strides = array<i32>} : memref<64x256xf32, #tpu.memory_space<vmem>>, vector<12x8xf32>,
    %132 = vector.extract_strided_slice %117 {offsets = [0, 0], sizes = [14, 8], strides = [1, 1]} : vector<16x8xf32> to vector<14x8xf32>
    %c2_74 = arith.constant 2 : index
    %c48_75 = arith.constant 48 : index
    %133 = vector.load %arg3[%c2_74, %c48_75] : memref<64x256xf32, #tpu.memory_space<vmem>>, vector<14x8xf32>
    tpu.vector_store %arg3[%c2_74, %c48_75], %132 {strides = array<i32>} : memref<64x256xf32, #tpu.memory_space<vmem>>, vector<14x8xf32>,
    %c0_76 = arith.constant 0 : index
    %c56 = arith.constant 56 : index
    %134 = vector.load %arg3[%c0_76, %c56] : memref<64x256xf32, #tpu.memory_space<vmem>>, vector<16x8xf32>
    tpu.vector_store %arg3[%c0_76, %c56], %117 {strides = array<i32>} : memref<64x256xf32, #tpu.memory_space<vmem>>, vector<16x8xf32>,
    %135 = vector.extract_strided_slice %117 {offsets = [2, 0], sizes = [14, 8], strides = [1, 1]} : vector<16x8xf32> to vector<14x8xf32>
    %c0_77 = arith.constant 0 : index
    %c64_78 = arith.constant 64 : index
    %136 = vector.load %arg3[%c0_77, %c64_78] : memref<64x256xf32, #tpu.memory_space<vmem>>, vector<14x8xf32>
    tpu.vector_store %arg3[%c0_77, %c64_78], %135 {strides = array<i32>} : memref<64x256xf32, #tpu.memory_space<vmem>>, vector<14x8xf32>,
    %137 = vector.extract_strided_slice %117 {offsets = [4, 0], sizes = [12, 8], strides = [1, 1]} : vector<16x8xf32> to vector<12x8xf32>
    %c0_79 = arith.constant 0 : index
    %c72 = arith.constant 72 : index
    %138 = vector.load %arg3[%c0_79, %c72] : memref<64x256xf32, #tpu.memory_space<vmem>>, vector<12x8xf32>
    tpu.vector_store %arg3[%c0_79, %c72], %137 {strides = array<i32>} : memref<64x256xf32, #tpu.memory_space<vmem>>, vector<12x8xf32>,
    %139 = vector.extract_strided_slice %117 {offsets = [6, 0], sizes = [10, 8], strides = [1, 1]} : vector<16x8xf32> to vector<10x8xf32>
    %c0_80 = arith.constant 0 : index
    %c80_81 = arith.constant 80 : index
    %140 = vector.load %arg3[%c0_80, %c80_81] : memref<64x256xf32, #tpu.memory_space<vmem>>, vector<10x8xf32>
    tpu.vector_store %arg3[%c0_80, %c80_81], %139 {strides = array<i32>} : memref<64x256xf32, #tpu.memory_space<vmem>>, vector<10x8xf32>,
    %141 = vector.extract_strided_slice %117 {offsets = [8, 0], sizes = [8, 8], strides = [1, 1]} : vector<16x8xf32> to vector<8x8xf32>
    %c0_82 = arith.constant 0 : index
    %c88 = arith.constant 88 : index
    %142 = vector.load %arg3[%c0_82, %c88] : memref<64x256xf32, #tpu.memory_space<vmem>>, vector<8x8xf32>
    tpu.vector_store %arg3[%c0_82, %c88], %141 {strides = array<i32>} : memref<64x256xf32, #tpu.memory_space<vmem>>, vector<8x8xf32>,
    %143 = vector.extract_strided_slice %117 {offsets = [10, 0], sizes = [6, 8], strides = [1, 1]} : vector<16x8xf32> to vector<6x8xf32>
    %c0_83 = arith.constant 0 : index
    %c96_84 = arith.constant 96 : index
    %144 = vector.load %arg3[%c0_83, %c96_84] : memref<64x256xf32, #tpu.memory_space<vmem>>, vector<6x8xf32>
    tpu.vector_store %arg3[%c0_83, %c96_84], %143 {strides = array<i32>} : memref<64x256xf32, #tpu.memory_space<vmem>>, vector<6x8xf32>,
    %145 = vector.extract_strided_slice %117 {offsets = [12, 0], sizes = [4, 8], strides = [1, 1]} : vector<16x8xf32> to vector<4x8xf32>
    %c0_85 = arith.constant 0 : index
    %c104 = arith.constant 104 : index
    %146 = vector.load %arg3[%c0_85, %c104] : memref<64x256xf32, #tpu.memory_space<vmem>>, vector<4x8xf32>
    tpu.vector_store %arg3[%c0_85, %c104], %145 {strides = array<i32>} : memref<64x256xf32, #tpu.memory_space<vmem>>, vector<4x8xf32>,
    %147 = vector.extract_strided_slice %117 {offsets = [14, 0], sizes = [2, 8], strides = [1, 1]} : vector<16x8xf32> to vector<2x8xf32>
    %c0_86 = arith.constant 0 : index
    %c112 = arith.constant 112 : index
    %148 = vector.load %arg3[%c0_86, %c112] : memref<64x256xf32, #tpu.memory_space<vmem>>, vector<2x8xf32>
    tpu.vector_store %arg3[%c0_86, %c112], %147 {strides = array<i32>} : memref<64x256xf32, #tpu.memory_space<vmem>>, vector<2x8xf32>,
    %c320 = arith.constant 320 : index
    %c0_87 = arith.constant 0 : index
    %149 = vector.load %arg1[%c320, %c0_87] : memref<952x128xf32, #tpu.memory_space<vmem>>, vector<128x8xf32>
    %c0_88 = arith.constant 0 : index
    %c0_89 = arith.constant 0 : index
    %150 = vector.load %arg3[%c0_88, %c0_89] : memref<64x256xf32, #tpu.memory_space<vmem>>, vector<16x128xf32>
    %cst_90 = arith.constant dense<0.000000e+00> : vector<16x8xf32>
    %151 = tpu.matmul %150, %149, %cst_90 {dimension_numbers = #tpu.dot_dimension_numbers<[1], [0], [0], [1], [0, 0, 1, 1], [], []>} : vector<16x128xf32>, vector<128x8xf32>, vector<16x8xf32> -> vector<16x8xf32>
    %c448 = arith.constant 448 : index
    %c0_91 = arith.constant 0 : index
    %152 = vector.load %arg1[%c448, %c0_91] : memref<952x128xf32, #tpu.memory_space<vmem>>, vector<1x8xf32>
    %153 = vector.broadcast %152 : vector<1x8xf32> to vector<16x8xf32>
    %154 = arith.addf %151, %153 : vector<16x8xf32>
    %c449 = arith.constant 449 : index
    %c0_92 = arith.constant 0 : index
    %155 = vector.load %arg1[%c449, %c0_92] : memref<952x128xf32, #tpu.memory_space<vmem>>, vector<1x8xf32>
    %c450 = arith.constant 450 : index
    %c0_93 = arith.constant 0 : index
    %156 = vector.load %arg1[%c450, %c0_93] : memref<952x128xf32, #tpu.memory_space<vmem>>, vector<1x8xf32>
    %cst_94 = arith.constant dense<0.000000e+00> : vector<8xf32>
    %157 = vector.multi_reduction <add>, %154, %cst_94 [0] : vector<16x8xf32> to vector<8xf32>
    %158 = vector.shape_cast %157 : vector<8xf32> to vector<1x8xf32>
    %cst_95 = arith.constant 6.250000e-02 : f32
    %159 = vector.broadcast %cst_95 : f32 to vector<1x8xf32>
    %160 = arith.mulf %158, %159 : vector<1x8xf32>
    %161 = vector.broadcast %160 : vector<1x8xf32> to vector<16x8xf32>
    %162 = arith.subf %154, %161 : vector<16x8xf32>
    %163 = arith.mulf %162, %162 : vector<16x8xf32>
    %cst_96 = arith.constant dense<0.000000e+00> : vector<8xf32>
    %164 = vector.multi_reduction <add>, %163, %cst_96 [0] : vector<16x8xf32> to vector<8xf32>
    %165 = vector.shape_cast %164 : vector<8xf32> to vector<1x8xf32>
    %cst_97 = arith.constant 6.250000e-02 : f32
    %166 = vector.broadcast %cst_97 : f32 to vector<1x8xf32>
    %167 = arith.mulf %165, %166 : vector<1x8xf32>
    %cst_98 = arith.constant 9.99999974E-6 : f32
    %168 = vector.broadcast %cst_98 : f32 to vector<1x8xf32>
    %169 = arith.addf %167, %168 : vector<1x8xf32>
    %170 = math.rsqrt %169 : vector<1x8xf32>
    %171 = vector.broadcast %170 : vector<1x8xf32> to vector<16x8xf32>
    %172 = arith.mulf %162, %171 : vector<16x8xf32>
    %173 = vector.broadcast %155 : vector<1x8xf32> to vector<16x8xf32>
    %174 = arith.mulf %172, %173 : vector<16x8xf32>
    %175 = vector.broadcast %156 : vector<1x8xf32> to vector<16x8xf32>
    %176 = arith.addf %174, %175 : vector<16x8xf32>
    %cst_99 = arith.constant 0.000000e+00 : f32
    %177 = vector.broadcast %cst_99 : f32 to vector<16x8xf32>
    %178 = arith.maximumf %176, %177 : vector<16x8xf32>
    %c456 = arith.constant 456 : index
    %c0_100 = arith.constant 0 : index
    %179 = vector.load %arg1[%c456, %c0_100] : memref<952x128xf32, #tpu.memory_space<vmem>>, vector<32x16xf32>
    %cst_101 = arith.constant dense<0.000000e+00> : vector<32x8xf32>
    %180 = tpu.matmul %179, %178, %cst_101 {dimension_numbers = #tpu.dot_dimension_numbers<[1], [0], [0], [1], [0, 0, 1, 1], [], []>} : vector<32x16xf32>, vector<16x8xf32>, vector<32x8xf32> -> vector<32x8xf32>
    %cst_102 = arith.constant 0.000000e+00 : f32
    %181 = vector.broadcast %cst_102 : f32 to vector<32x256xf32>
    %c0_103 = arith.constant 0 : index
    %c0_104 = arith.constant 0 : index
    %182 = vector.load %arg3[%c0_103, %c0_104] : memref<64x256xf32, #tpu.memory_space<vmem>>, vector<32x256xf32>
    tpu.vector_store %arg3[%c0_103, %c0_104], %181 {strides = array<i32>} : memref<64x256xf32, #tpu.memory_space<vmem>>, vector<32x256xf32>,
    %183 = vector.extract_strided_slice %180 {offsets = [0, 0], sizes = [8, 8], strides = [1, 1]} : vector<32x8xf32> to vector<8x8xf32>
    %c24_105 = arith.constant 24 : index
    %c0_106 = arith.constant 0 : index
    %184 = vector.load %arg3[%c24_105, %c0_106] : memref<64x256xf32, #tpu.memory_space<vmem>>, vector<8x8xf32>
    tpu.vector_store %arg3[%c24_105, %c0_106], %183 {strides = array<i32>} : memref<64x256xf32, #tpu.memory_space<vmem>>, vector<8x8xf32>,
    %185 = vector.extract_strided_slice %180 {offsets = [0, 0], sizes = [10, 8], strides = [1, 1]} : vector<32x8xf32> to vector<10x8xf32>
    %c22 = arith.constant 22 : index
    %c8_107 = arith.constant 8 : index
    %186 = vector.load %arg3[%c22, %c8_107] : memref<64x256xf32, #tpu.memory_space<vmem>>, vector<10x8xf32>
    tpu.vector_store %arg3[%c22, %c8_107], %185 {strides = array<i32>} : memref<64x256xf32, #tpu.memory_space<vmem>>, vector<10x8xf32>,
    %187 = vector.extract_strided_slice %180 {offsets = [0, 0], sizes = [12, 8], strides = [1, 1]} : vector<32x8xf32> to vector<12x8xf32>
    %c20 = arith.constant 20 : index
    %c16_108 = arith.constant 16 : index
    %188 = vector.load %arg3[%c20, %c16_108] : memref<64x256xf32, #tpu.memory_space<vmem>>, vector<12x8xf32>
    tpu.vector_store %arg3[%c20, %c16_108], %187 {strides = array<i32>} : memref<64x256xf32, #tpu.memory_space<vmem>>, vector<12x8xf32>,
    %189 = vector.extract_strided_slice %180 {offsets = [0, 0], sizes = [14, 8], strides = [1, 1]} : vector<32x8xf32> to vector<14x8xf32>
    %c18 = arith.constant 18 : index
    %c24_109 = arith.constant 24 : index
    %190 = vector.load %arg3[%c18, %c24_109] : memref<64x256xf32, #tpu.memory_space<vmem>>, vector<14x8xf32>
    tpu.vector_store %arg3[%c18, %c24_109], %189 {strides = array<i32>} : memref<64x256xf32, #tpu.memory_space<vmem>>, vector<14x8xf32>,
    %191 = vector.extract_strided_slice %180 {offsets = [0, 0], sizes = [16, 8], strides = [1, 1]} : vector<32x8xf32> to vector<16x8xf32>
    %c16_110 = arith.constant 16 : index
    %c32_111 = arith.constant 32 : index
    %192 = vector.load %arg3[%c16_110, %c32_111] : memref<64x256xf32, #tpu.memory_space<vmem>>, vector<16x8xf32>
    tpu.vector_store %arg3[%c16_110, %c32_111], %191 {strides = array<i32>} : memref<64x256xf32, #tpu.memory_space<vmem>>, vector<16x8xf32>,
    %193 = vector.extract_strided_slice %180 {offsets = [0, 0], sizes = [18, 8], strides = [1, 1]} : vector<32x8xf32> to vector<18x8xf32>
    %c14_112 = arith.constant 14 : index
    %c40_113 = arith.constant 40 : index
    %194 = vector.load %arg3[%c14_112, %c40_113] : memref<64x256xf32, #tpu.memory_space<vmem>>, vector<18x8xf32>
    tpu.vector_store %arg3[%c14_112, %c40_113], %193 {strides = array<i32>} : memref<64x256xf32, #tpu.memory_space<vmem>>, vector<18x8xf32>,
    %195 = vector.extract_strided_slice %180 {offsets = [0, 0], sizes = [20, 8], strides = [1, 1]} : vector<32x8xf32> to vector<20x8xf32>
    %c12_114 = arith.constant 12 : index
    %c48_115 = arith.constant 48 : index
    %196 = vector.load %arg3[%c12_114, %c48_115] : memref<64x256xf32, #tpu.memory_space<vmem>>, vector<20x8xf32>
    tpu.vector_store %arg3[%c12_114, %c48_115], %195 {strides = array<i32>} : memref<64x256xf32, #tpu.memory_space<vmem>>, vector<20x8xf32>,
    %197 = vector.extract_strided_slice %180 {offsets = [0, 0], sizes = [22, 8], strides = [1, 1]} : vector<32x8xf32> to vector<22x8xf32>
    %c10_116 = arith.constant 10 : index
    %c56_117 = arith.constant 56 : index
    %198 = vector.load %arg3[%c10_116, %c56_117] : memref<64x256xf32, #tpu.memory_space<vmem>>, vector<22x8xf32>
    tpu.vector_store %arg3[%c10_116, %c56_117], %197 {strides = array<i32>} : memref<64x256xf32, #tpu.memory_space<vmem>>, vector<22x8xf32>,
    %199 = vector.extract_strided_slice %180 {offsets = [0, 0], sizes = [24, 8], strides = [1, 1]} : vector<32x8xf32> to vector<24x8xf32>
    %c8_118 = arith.constant 8 : index
    %c64_119 = arith.constant 64 : index
    %200 = vector.load %arg3[%c8_118, %c64_119] : memref<64x256xf32, #tpu.memory_space<vmem>>, vector<24x8xf32>
    tpu.vector_store %arg3[%c8_118, %c64_119], %199 {strides = array<i32>} : memref<64x256xf32, #tpu.memory_space<vmem>>, vector<24x8xf32>,
    %201 = vector.extract_strided_slice %180 {offsets = [0, 0], sizes = [26, 8], strides = [1, 1]} : vector<32x8xf32> to vector<26x8xf32>
    %c6_120 = arith.constant 6 : index
    %c72_121 = arith.constant 72 : index
    %202 = vector.load %arg3[%c6_120, %c72_121] : memref<64x256xf32, #tpu.memory_space<vmem>>, vector<26x8xf32>
    tpu.vector_store %arg3[%c6_120, %c72_121], %201 {strides = array<i32>} : memref<64x256xf32, #tpu.memory_space<vmem>>, vector<26x8xf32>,
    %203 = vector.extract_strided_slice %180 {offsets = [0, 0], sizes = [28, 8], strides = [1, 1]} : vector<32x8xf32> to vector<28x8xf32>
    %c4_122 = arith.constant 4 : index
    %c80_123 = arith.constant 80 : index
    %204 = vector.load %arg3[%c4_122, %c80_123] : memref<64x256xf32, #tpu.memory_space<vmem>>, vector<28x8xf32>
    tpu.vector_store %arg3[%c4_122, %c80_123], %203 {strides = array<i32>} : memref<64x256xf32, #tpu.memory_space<vmem>>, vector<28x8xf32>,
    %205 = vector.extract_strided_slice %180 {offsets = [0, 0], sizes = [30, 8], strides = [1, 1]} : vector<32x8xf32> to vector<30x8xf32>
    %c2_124 = arith.constant 2 : index
    %c88_125 = arith.constant 88 : index
    %206 = vector.load %arg3[%c2_124, %c88_125] : memref<64x256xf32, #tpu.memory_space<vmem>>, vector<30x8xf32>
    tpu.vector_store %arg3[%c2_124, %c88_125], %205 {strides = array<i32>} : memref<64x256xf32, #tpu.memory_space<vmem>>, vector<30x8xf32>,
    %c0_126 = arith.constant 0 : index
    %c96_127 = arith.constant 96 : index
    %207 = vector.load %arg3[%c0_126, %c96_127] : memref<64x256xf32, #tpu.memory_space<vmem>>, vector<32x8xf32>
    tpu.vector_store %arg3[%c0_126, %c96_127], %180 {strides = array<i32>} : memref<64x256xf32, #tpu.memory_space<vmem>>, vector<32x8xf32>,
    %208 = vector.extract_strided_slice %180 {offsets = [2, 0], sizes = [30, 8], strides = [1, 1]} : vector<32x8xf32> to vector<30x8xf32>
    %c0_128 = arith.constant 0 : index
    %c104_129 = arith.constant 104 : index
    %209 = vector.load %arg3[%c0_128, %c104_129] : memref<64x256xf32, #tpu.memory_space<vmem>>, vector<30x8xf32>
    tpu.vector_store %arg3[%c0_128, %c104_129], %208 {strides = array<i32>} : memref<64x256xf32, #tpu.memory_space<vmem>>, vector<30x8xf32>,
    %210 = vector.extract_strided_slice %180 {offsets = [4, 0], sizes = [28, 8], strides = [1, 1]} : vector<32x8xf32> to vector<28x8xf32>
    %c0_130 = arith.constant 0 : index
    %c112_131 = arith.constant 112 : index
    %211 = vector.load %arg3[%c0_130, %c112_131] : memref<64x256xf32, #tpu.memory_space<vmem>>, vector<28x8xf32>
    tpu.vector_store %arg3[%c0_130, %c112_131], %210 {strides = array<i32>} : memref<64x256xf32, #tpu.memory_space<vmem>>, vector<28x8xf32>,
    %212 = vector.extract_strided_slice %180 {offsets = [6, 0], sizes = [26, 8], strides = [1, 1]} : vector<32x8xf32> to vector<26x8xf32>
    %c0_132 = arith.constant 0 : index
    %c120 = arith.constant 120 : index
    %213 = vector.load %arg3[%c0_132, %c120] : memref<64x256xf32, #tpu.memory_space<vmem>>, vector<26x8xf32>
    tpu.vector_store %arg3[%c0_132, %c120], %212 {strides = array<i32>} : memref<64x256xf32, #tpu.memory_space<vmem>>, vector<26x8xf32>,
    %214 = vector.extract_strided_slice %180 {offsets = [8, 0], sizes = [24, 8], strides = [1, 1]} : vector<32x8xf32> to vector<24x8xf32>
    %c0_133 = arith.constant 0 : index
    %c128 = arith.constant 128 : index
    %215 = vector.load %arg3[%c0_133, %c128] : memref<64x256xf32, #tpu.memory_space<vmem>>, vector<24x8xf32>
    tpu.vector_store %arg3[%c0_133, %c128], %214 {strides = array<i32>} : memref<64x256xf32, #tpu.memory_space<vmem>>, vector<24x8xf32>,
    %216 = vector.extract_strided_slice %180 {offsets = [10, 0], sizes = [22, 8], strides = [1, 1]} : vector<32x8xf32> to vector<22x8xf32>
    %c0_134 = arith.constant 0 : index
    %c136 = arith.constant 136 : index
    %217 = vector.load %arg3[%c0_134, %c136] : memref<64x256xf32, #tpu.memory_space<vmem>>, vector<22x8xf32>
    tpu.vector_store %arg3[%c0_134, %c136], %216 {strides = array<i32>} : memref<64x256xf32, #tpu.memory_space<vmem>>, vector<22x8xf32>,
    %218 = vector.extract_strided_slice %180 {offsets = [12, 0], sizes = [20, 8], strides = [1, 1]} : vector<32x8xf32> to vector<20x8xf32>
    %c0_135 = arith.constant 0 : index
    %c144 = arith.constant 144 : index
    %219 = vector.load %arg3[%c0_135, %c144] : memref<64x256xf32, #tpu.memory_space<vmem>>, vector<20x8xf32>
    tpu.vector_store %arg3[%c0_135, %c144], %218 {strides = array<i32>} : memref<64x256xf32, #tpu.memory_space<vmem>>, vector<20x8xf32>,
    %220 = vector.extract_strided_slice %180 {offsets = [14, 0], sizes = [18, 8], strides = [1, 1]} : vector<32x8xf32> to vector<18x8xf32>
    %c0_136 = arith.constant 0 : index
    %c152_137 = arith.constant 152 : index
    %221 = vector.load %arg3[%c0_136, %c152_137] : memref<64x256xf32, #tpu.memory_space<vmem>>, vector<18x8xf32>
    tpu.vector_store %arg3[%c0_136, %c152_137], %220 {strides = array<i32>} : memref<64x256xf32, #tpu.memory_space<vmem>>, vector<18x8xf32>,
    %222 = vector.extract_strided_slice %180 {offsets = [16, 0], sizes = [16, 8], strides = [1, 1]} : vector<32x8xf32> to vector<16x8xf32>
    %c0_138 = arith.constant 0 : index
    %c160_139 = arith.constant 160 : index
    %223 = vector.load %arg3[%c0_138, %c160_139] : memref<64x256xf32, #tpu.memory_space<vmem>>, vector<16x8xf32>
    tpu.vector_store %arg3[%c0_138, %c160_139], %222 {strides = array<i32>} : memref<64x256xf32, #tpu.memory_space<vmem>>, vector<16x8xf32>,
    %224 = vector.extract_strided_slice %180 {offsets = [18, 0], sizes = [14, 8], strides = [1, 1]} : vector<32x8xf32> to vector<14x8xf32>
    %c0_140 = arith.constant 0 : index
    %c168_141 = arith.constant 168 : index
    %225 = vector.load %arg3[%c0_140, %c168_141] : memref<64x256xf32, #tpu.memory_space<vmem>>, vector<14x8xf32>
    tpu.vector_store %arg3[%c0_140, %c168_141], %224 {strides = array<i32>} : memref<64x256xf32, #tpu.memory_space<vmem>>, vector<14x8xf32>,
    %226 = vector.extract_strided_slice %180 {offsets = [20, 0], sizes = [12, 8], strides = [1, 1]} : vector<32x8xf32> to vector<12x8xf32>
    %c0_142 = arith.constant 0 : index
    %c176 = arith.constant 176 : index
    %227 = vector.load %arg3[%c0_142, %c176] : memref<64x256xf32, #tpu.memory_space<vmem>>, vector<12x8xf32>
    tpu.vector_store %arg3[%c0_142, %c176], %226 {strides = array<i32>} : memref<64x256xf32, #tpu.memory_space<vmem>>, vector<12x8xf32>,
    %228 = vector.extract_strided_slice %180 {offsets = [22, 0], sizes = [10, 8], strides = [1, 1]} : vector<32x8xf32> to vector<10x8xf32>
    %c0_143 = arith.constant 0 : index
    %c184 = arith.constant 184 : index
    %229 = vector.load %arg3[%c0_143, %c184] : memref<64x256xf32, #tpu.memory_space<vmem>>, vector<10x8xf32>
    tpu.vector_store %arg3[%c0_143, %c184], %228 {strides = array<i32>} : memref<64x256xf32, #tpu.memory_space<vmem>>, vector<10x8xf32>,
    %230 = vector.extract_strided_slice %180 {offsets = [24, 0], sizes = [8, 8], strides = [1, 1]} : vector<32x8xf32> to vector<8x8xf32>
    %c0_144 = arith.constant 0 : index
    %c192 = arith.constant 192 : index
    %231 = vector.load %arg3[%c0_144, %c192] : memref<64x256xf32, #tpu.memory_space<vmem>>, vector<8x8xf32>
    tpu.vector_store %arg3[%c0_144, %c192], %230 {strides = array<i32>} : memref<64x256xf32, #tpu.memory_space<vmem>>, vector<8x8xf32>,
    %c488 = arith.constant 488 : index
    %c0_145 = arith.constant 0 : index
    %232 = vector.load %arg1[%c488, %c0_145] : memref<952x128xf32, #tpu.memory_space<vmem>>, vector<256x4xf32>
    %c0_146 = arith.constant 0 : index
    %c0_147 = arith.constant 0 : index
    %233 = vector.load %arg3[%c0_146, %c0_147] : memref<64x256xf32, #tpu.memory_space<vmem>>, vector<32x256xf32>
    %cst_148 = arith.constant dense<0.000000e+00> : vector<32x4xf32>
    %234 = tpu.matmul %233, %232, %cst_148 {dimension_numbers = #tpu.dot_dimension_numbers<[1], [0], [0], [1], [0, 0, 1, 1], [], []>} : vector<32x256xf32>, vector<256x4xf32>, vector<32x4xf32> -> vector<32x4xf32>
    %c744 = arith.constant 744 : index
    %c0_149 = arith.constant 0 : index
    %235 = vector.load %arg1[%c744, %c0_149] : memref<952x128xf32, #tpu.memory_space<vmem>>, vector<1x4xf32>
    %236 = vector.broadcast %235 : vector<1x4xf32> to vector<32x4xf32>
    %237 = arith.addf %234, %236 : vector<32x4xf32>
    %c745 = arith.constant 745 : index
    %c0_150 = arith.constant 0 : index
    %238 = vector.load %arg1[%c745, %c0_150] : memref<952x128xf32, #tpu.memory_space<vmem>>, vector<1x4xf32>
    %c746 = arith.constant 746 : index
    %c0_151 = arith.constant 0 : index
    %239 = vector.load %arg1[%c746, %c0_151] : memref<952x128xf32, #tpu.memory_space<vmem>>, vector<1x4xf32>
    %cst_152 = arith.constant dense<0.000000e+00> : vector<4xf32>
    %240 = vector.multi_reduction <add>, %237, %cst_152 [0] : vector<32x4xf32> to vector<4xf32>
    %241 = vector.shape_cast %240 : vector<4xf32> to vector<1x4xf32>
    %cst_153 = arith.constant 3.125000e-02 : f32
    %242 = vector.broadcast %cst_153 : f32 to vector<1x4xf32>
    %243 = arith.mulf %241, %242 : vector<1x4xf32>
    %244 = vector.broadcast %243 : vector<1x4xf32> to vector<32x4xf32>
    %245 = arith.subf %237, %244 : vector<32x4xf32>
    %246 = arith.mulf %245, %245 : vector<32x4xf32>
    %cst_154 = arith.constant dense<0.000000e+00> : vector<4xf32>
    %247 = vector.multi_reduction <add>, %246, %cst_154 [0] : vector<32x4xf32> to vector<4xf32>
    %248 = vector.shape_cast %247 : vector<4xf32> to vector<1x4xf32>
    %cst_155 = arith.constant 3.125000e-02 : f32
    %249 = vector.broadcast %cst_155 : f32 to vector<1x4xf32>
    %250 = arith.mulf %248, %249 : vector<1x4xf32>
    %cst_156 = arith.constant 9.99999974E-6 : f32
    %251 = vector.broadcast %cst_156 : f32 to vector<1x4xf32>
    %252 = arith.addf %250, %251 : vector<1x4xf32>
    %253 = math.rsqrt %252 : vector<1x4xf32>
    %254 = vector.broadcast %253 : vector<1x4xf32> to vector<32x4xf32>
    %255 = arith.mulf %245, %254 : vector<32x4xf32>
    %256 = vector.broadcast %238 : vector<1x4xf32> to vector<32x4xf32>
    %257 = arith.mulf %255, %256 : vector<32x4xf32>
    %258 = vector.broadcast %239 : vector<1x4xf32> to vector<32x4xf32>
    %259 = arith.addf %257, %258 : vector<32x4xf32>
    %cst_157 = arith.constant 0.000000e+00 : f32
    %260 = vector.broadcast %cst_157 : f32 to vector<32x4xf32>
    %261 = arith.maximumf %259, %260 : vector<32x4xf32>
    %c752 = arith.constant 752 : index
    %c0_158 = arith.constant 0 : index
    %262 = vector.load %arg1[%c752, %c0_158] : memref<952x128xf32, #tpu.memory_space<vmem>>, vector<64x32xf32>
    %cst_159 = arith.constant dense<0.000000e+00> : vector<64x4xf32>
    %263 = tpu.matmul %262, %261, %cst_159 {dimension_numbers = #tpu.dot_dimension_numbers<[1], [0], [0], [1], [0, 0, 1, 1], [], []>} : vector<64x32xf32>, vector<32x4xf32>, vector<64x4xf32> -> vector<64x4xf32>
    %cst_160 = arith.constant 0.000000e+00 : f32
    %264 = vector.broadcast %cst_160 : f32 to vector<64x128xf32>
    %c0_161 = arith.constant 0 : index
    %c0_162 = arith.constant 0 : index
    %265 = vector.load %arg3[%c0_161, %c0_162] : memref<64x256xf32, #tpu.memory_space<vmem>>, vector<64x128xf32>
    tpu.vector_store %arg3[%c0_161, %c0_162], %264 {strides = array<i32>} : memref<64x256xf32, #tpu.memory_space<vmem>>, vector<64x128xf32>,
    %266 = vector.extract_strided_slice %263 {offsets = [0, 0], sizes = [40, 4], strides = [1, 1]} : vector<64x4xf32> to vector<40x4xf32>
    %c24_163 = arith.constant 24 : index
    %c0_164 = arith.constant 0 : index
    %267 = vector.load %arg3[%c24_163, %c0_164] : memref<64x256xf32, #tpu.memory_space<vmem>>, vector<40x4xf32>
    tpu.vector_store %arg3[%c24_163, %c0_164], %266 {strides = array<i32>} : memref<64x256xf32, #tpu.memory_space<vmem>>, vector<40x4xf32>,
    %268 = vector.extract_strided_slice %263 {offsets = [0, 0], sizes = [42, 4], strides = [1, 1]} : vector<64x4xf32> to vector<42x4xf32>
    %c22_165 = arith.constant 22 : index
    %c4_166 = arith.constant 4 : index
    %269 = vector.load %arg3[%c22_165, %c4_166] : memref<64x256xf32, #tpu.memory_space<vmem>>, vector<42x4xf32>
    tpu.vector_store %arg3[%c22_165, %c4_166], %268 {strides = array<i32>} : memref<64x256xf32, #tpu.memory_space<vmem>>, vector<42x4xf32>,
    %270 = vector.extract_strided_slice %263 {offsets = [0, 0], sizes = [44, 4], strides = [1, 1]} : vector<64x4xf32> to vector<44x4xf32>
    %c20_167 = arith.constant 20 : index
    %c8_168 = arith.constant 8 : index
    %271 = vector.load %arg3[%c20_167, %c8_168] : memref<64x256xf32, #tpu.memory_space<vmem>>, vector<44x4xf32>
    tpu.vector_store %arg3[%c20_167, %c8_168], %270 {strides = array<i32>} : memref<64x256xf32, #tpu.memory_space<vmem>>, vector<44x4xf32>,
    %272 = vector.extract_strided_slice %263 {offsets = [0, 0], sizes = [46, 4], strides = [1, 1]} : vector<64x4xf32> to vector<46x4xf32>
    %c18_169 = arith.constant 18 : index
    %c12_170 = arith.constant 12 : index
    %273 = vector.load %arg3[%c18_169, %c12_170] : memref<64x256xf32, #tpu.memory_space<vmem>>, vector<46x4xf32>
    tpu.vector_store %arg3[%c18_169, %c12_170], %272 {strides = array<i32>} : memref<64x256xf32, #tpu.memory_space<vmem>>, vector<46x4xf32>,
    %274 = vector.extract_strided_slice %263 {offsets = [0, 0], sizes = [48, 4], strides = [1, 1]} : vector<64x4xf32> to vector<48x4xf32>
    %c16_171 = arith.constant 16 : index
    %c16_172 = arith.constant 16 : index
    %275 = vector.load %arg3[%c16_171, %c16_172] : memref<64x256xf32, #tpu.memory_space<vmem>>, vector<48x4xf32>
    tpu.vector_store %arg3[%c16_171, %c16_172], %274 {strides = array<i32>} : memref<64x256xf32, #tpu.memory_space<vmem>>, vector<48x4xf32>,
    %276 = vector.extract_strided_slice %263 {offsets = [0, 0], sizes = [50, 4], strides = [1, 1]} : vector<64x4xf32> to vector<50x4xf32>
    %c14_173 = arith.constant 14 : index
    %c20_174 = arith.constant 20 : index
    %277 = vector.load %arg3[%c14_173, %c20_174] : memref<64x256xf32, #tpu.memory_space<vmem>>, vector<50x4xf32>
    tpu.vector_store %arg3[%c14_173, %c20_174], %276 {strides = array<i32>} : memref<64x256xf32, #tpu.memory_space<vmem>>, vector<50x4xf32>,
    %278 = vector.extract_strided_slice %263 {offsets = [0, 0], sizes = [52, 4], strides = [1, 1]} : vector<64x4xf32> to vector<52x4xf32>
    %c12_175 = arith.constant 12 : index
    %c24_176 = arith.constant 24 : index
    %279 = vector.load %arg3[%c12_175, %c24_176] : memref<64x256xf32, #tpu.memory_space<vmem>>, vector<52x4xf32>
    tpu.vector_store %arg3[%c12_175, %c24_176], %278 {strides = array<i32>} : memref<64x256xf32, #tpu.memory_space<vmem>>, vector<52x4xf32>,
    %280 = vector.extract_strided_slice %263 {offsets = [0, 0], sizes = [54, 4], strides = [1, 1]} : vector<64x4xf32> to vector<54x4xf32>
    %c10_177 = arith.constant 10 : index
    %c28 = arith.constant 28 : index
    %281 = vector.load %arg3[%c10_177, %c28] : memref<64x256xf32, #tpu.memory_space<vmem>>, vector<54x4xf32>
    tpu.vector_store %arg3[%c10_177, %c28], %280 {strides = array<i32>} : memref<64x256xf32, #tpu.memory_space<vmem>>, vector<54x4xf32>,
    %282 = vector.extract_strided_slice %263 {offsets = [0, 0], sizes = [56, 4], strides = [1, 1]} : vector<64x4xf32> to vector<56x4xf32>
    %c8_178 = arith.constant 8 : index
    %c32_179 = arith.constant 32 : index
    %283 = vector.load %arg3[%c8_178, %c32_179] : memref<64x256xf32, #tpu.memory_space<vmem>>, vector<56x4xf32>
    tpu.vector_store %arg3[%c8_178, %c32_179], %282 {strides = array<i32>} : memref<64x256xf32, #tpu.memory_space<vmem>>, vector<56x4xf32>,
    %284 = vector.extract_strided_slice %263 {offsets = [0, 0], sizes = [58, 4], strides = [1, 1]} : vector<64x4xf32> to vector<58x4xf32>
    %c6_180 = arith.constant 6 : index
    %c36 = arith.constant 36 : index
    %285 = vector.load %arg3[%c6_180, %c36] : memref<64x256xf32, #tpu.memory_space<vmem>>, vector<58x4xf32>
    tpu.vector_store %arg3[%c6_180, %c36], %284 {strides = array<i32>} : memref<64x256xf32, #tpu.memory_space<vmem>>, vector<58x4xf32>,
    %286 = vector.extract_strided_slice %263 {offsets = [0, 0], sizes = [60, 4], strides = [1, 1]} : vector<64x4xf32> to vector<60x4xf32>
    %c4_181 = arith.constant 4 : index
    %c40_182 = arith.constant 40 : index
    %287 = vector.load %arg3[%c4_181, %c40_182] : memref<64x256xf32, #tpu.memory_space<vmem>>, vector<60x4xf32>
    tpu.vector_store %arg3[%c4_181, %c40_182], %286 {strides = array<i32>} : memref<64x256xf32, #tpu.memory_space<vmem>>, vector<60x4xf32>,
    %288 = vector.extract_strided_slice %263 {offsets = [0, 0], sizes = [62, 4], strides = [1, 1]} : vector<64x4xf32> to vector<62x4xf32>
    %c2_183 = arith.constant 2 : index
    %c44 = arith.constant 44 : index
    %289 = vector.load %arg3[%c2_183, %c44] : memref<64x256xf32, #tpu.memory_space<vmem>>, vector<62x4xf32>
    tpu.vector_store %arg3[%c2_183, %c44], %288 {strides = array<i32>} : memref<64x256xf32, #tpu.memory_space<vmem>>, vector<62x4xf32>,
    %c0_184 = arith.constant 0 : index
    %c48_185 = arith.constant 48 : index
    %290 = vector.load %arg3[%c0_184, %c48_185] : memref<64x256xf32, #tpu.memory_space<vmem>>, vector<64x4xf32>
    tpu.vector_store %arg3[%c0_184, %c48_185], %263 {strides = array<i32>} : memref<64x256xf32, #tpu.memory_space<vmem>>, vector<64x4xf32>,
    %291 = vector.extract_strided_slice %263 {offsets = [2, 0], sizes = [62, 4], strides = [1, 1]} : vector<64x4xf32> to vector<62x4xf32>
    %c0_186 = arith.constant 0 : index
    %c52 = arith.constant 52 : index
    %292 = vector.load %arg3[%c0_186, %c52] : memref<64x256xf32, #tpu.memory_space<vmem>>, vector<62x4xf32>
    tpu.vector_store %arg3[%c0_186, %c52], %291 {strides = array<i32>} : memref<64x256xf32, #tpu.memory_space<vmem>>, vector<62x4xf32>,
    %293 = vector.extract_strided_slice %263 {offsets = [4, 0], sizes = [60, 4], strides = [1, 1]} : vector<64x4xf32> to vector<60x4xf32>
    %c0_187 = arith.constant 0 : index
    %c56_188 = arith.constant 56 : index
    %294 = vector.load %arg3[%c0_187, %c56_188] : memref<64x256xf32, #tpu.memory_space<vmem>>, vector<60x4xf32>
    tpu.vector_store %arg3[%c0_187, %c56_188], %293 {strides = array<i32>} : memref<64x256xf32, #tpu.memory_space<vmem>>, vector<60x4xf32>,
    %295 = vector.extract_strided_slice %263 {offsets = [6, 0], sizes = [58, 4], strides = [1, 1]} : vector<64x4xf32> to vector<58x4xf32>
    %c0_189 = arith.constant 0 : index
    %c60 = arith.constant 60 : index
    %296 = vector.load %arg3[%c0_189, %c60] : memref<64x256xf32, #tpu.memory_space<vmem>>, vector<58x4xf32>
    tpu.vector_store %arg3[%c0_189, %c60], %295 {strides = array<i32>} : memref<64x256xf32, #tpu.memory_space<vmem>>, vector<58x4xf32>,
    %297 = vector.extract_strided_slice %263 {offsets = [8, 0], sizes = [56, 4], strides = [1, 1]} : vector<64x4xf32> to vector<56x4xf32>
    %c0_190 = arith.constant 0 : index
    %c64_191 = arith.constant 64 : index
    %298 = vector.load %arg3[%c0_190, %c64_191] : memref<64x256xf32, #tpu.memory_space<vmem>>, vector<56x4xf32>
    tpu.vector_store %arg3[%c0_190, %c64_191], %297 {strides = array<i32>} : memref<64x256xf32, #tpu.memory_space<vmem>>, vector<56x4xf32>,
    %299 = vector.extract_strided_slice %263 {offsets = [10, 0], sizes = [54, 4], strides = [1, 1]} : vector<64x4xf32> to vector<54x4xf32>
    %c0_192 = arith.constant 0 : index
    %c68 = arith.constant 68 : index
    %300 = vector.load %arg3[%c0_192, %c68] : memref<64x256xf32, #tpu.memory_space<vmem>>, vector<54x4xf32>
    tpu.vector_store %arg3[%c0_192, %c68], %299 {strides = array<i32>} : memref<64x256xf32, #tpu.memory_space<vmem>>, vector<54x4xf32>,
    %301 = vector.extract_strided_slice %263 {offsets = [12, 0], sizes = [52, 4], strides = [1, 1]} : vector<64x4xf32> to vector<52x4xf32>
    %c0_193 = arith.constant 0 : index
    %c72_194 = arith.constant 72 : index
    %302 = vector.load %arg3[%c0_193, %c72_194] : memref<64x256xf32, #tpu.memory_space<vmem>>, vector<52x4xf32>
    tpu.vector_store %arg3[%c0_193, %c72_194], %301 {strides = array<i32>} : memref<64x256xf32, #tpu.memory_space<vmem>>, vector<52x4xf32>,
    %303 = vector.extract_strided_slice %263 {offsets = [14, 0], sizes = [50, 4], strides = [1, 1]} : vector<64x4xf32> to vector<50x4xf32>
    %c0_195 = arith.constant 0 : index
    %c76 = arith.constant 76 : index
    %304 = vector.load %arg3[%c0_195, %c76] : memref<64x256xf32, #tpu.memory_space<vmem>>, vector<50x4xf32>
    tpu.vector_store %arg3[%c0_195, %c76], %303 {strides = array<i32>} : memref<64x256xf32, #tpu.memory_space<vmem>>, vector<50x4xf32>,
    %305 = vector.extract_strided_slice %263 {offsets = [16, 0], sizes = [48, 4], strides = [1, 1]} : vector<64x4xf32> to vector<48x4xf32>
    %c0_196 = arith.constant 0 : index
    %c80_197 = arith.constant 80 : index
    %306 = vector.load %arg3[%c0_196, %c80_197] : memref<64x256xf32, #tpu.memory_space<vmem>>, vector<48x4xf32>
    tpu.vector_store %arg3[%c0_196, %c80_197], %305 {strides = array<i32>} : memref<64x256xf32, #tpu.memory_space<vmem>>, vector<48x4xf32>,
    %307 = vector.extract_strided_slice %263 {offsets = [18, 0], sizes = [46, 4], strides = [1, 1]} : vector<64x4xf32> to vector<46x4xf32>
    %c0_198 = arith.constant 0 : index
    %c84 = arith.constant 84 : index
    %308 = vector.load %arg3[%c0_198, %c84] : memref<64x256xf32, #tpu.memory_space<vmem>>, vector<46x4xf32>
    tpu.vector_store %arg3[%c0_198, %c84], %307 {strides = array<i32>} : memref<64x256xf32, #tpu.memory_space<vmem>>, vector<46x4xf32>,
    %309 = vector.extract_strided_slice %263 {offsets = [20, 0], sizes = [44, 4], strides = [1, 1]} : vector<64x4xf32> to vector<44x4xf32>
    %c0_199 = arith.constant 0 : index
    %c88_200 = arith.constant 88 : index
    %310 = vector.load %arg3[%c0_199, %c88_200] : memref<64x256xf32, #tpu.memory_space<vmem>>, vector<44x4xf32>
    tpu.vector_store %arg3[%c0_199, %c88_200], %309 {strides = array<i32>} : memref<64x256xf32, #tpu.memory_space<vmem>>, vector<44x4xf32>,
    %311 = vector.extract_strided_slice %263 {offsets = [22, 0], sizes = [42, 4], strides = [1, 1]} : vector<64x4xf32> to vector<42x4xf32>
    %c0_201 = arith.constant 0 : index
    %c92 = arith.constant 92 : index
    %312 = vector.load %arg3[%c0_201, %c92] : memref<64x256xf32, #tpu.memory_space<vmem>>, vector<42x4xf32>
    tpu.vector_store %arg3[%c0_201, %c92], %311 {strides = array<i32>} : memref<64x256xf32, #tpu.memory_space<vmem>>, vector<42x4xf32>,
    %313 = vector.extract_strided_slice %263 {offsets = [24, 0], sizes = [40, 4], strides = [1, 1]} : vector<64x4xf32> to vector<40x4xf32>
    %c0_202 = arith.constant 0 : index
    %c96_203 = arith.constant 96 : index
    %314 = vector.load %arg3[%c0_202, %c96_203] : memref<64x256xf32, #tpu.memory_space<vmem>>, vector<40x4xf32>
    tpu.vector_store %arg3[%c0_202, %c96_203], %313 {strides = array<i32>} : memref<64x256xf32, #tpu.memory_space<vmem>>, vector<40x4xf32>,
    %c816 = arith.constant 816 : index
    %c0_204 = arith.constant 0 : index
    %315 = vector.load %arg1[%c816, %c0_204] : memref<952x128xf32, #tpu.memory_space<vmem>>, vector<128x1xf32>
    %c0_205 = arith.constant 0 : index
    %c0_206 = arith.constant 0 : index
    %316 = vector.load %arg3[%c0_205, %c0_206] : memref<64x256xf32, #tpu.memory_space<vmem>>, vector<64x128xf32>
    %cst_207 = arith.constant dense<0.000000e+00> : vector<64x1xf32>
    %317 = tpu.matmul %316, %315, %cst_207 {dimension_numbers = #tpu.dot_dimension_numbers<[1], [0], [0], [1], [0, 0, 1, 1], [], []>} : vector<64x128xf32>, vector<128x1xf32>, vector<64x1xf32> -> vector<64x1xf32>
    %c944 = arith.constant 944 : index
    %c0_208 = arith.constant 0 : index
    %318 = vector.load %arg1[%c944, %c0_208] : memref<952x128xf32, #tpu.memory_space<vmem>>, vector<1x1xf32>
    %319 = vector.broadcast %318 : vector<1x1xf32> to vector<64x1xf32>
    %320 = arith.addf %317, %319 : vector<64x1xf32>
    %c945 = arith.constant 945 : index
    %c0_209 = arith.constant 0 : index
    %321 = vector.load %arg1[%c945, %c0_209] : memref<952x128xf32, #tpu.memory_space<vmem>>, vector<1x1xf32>
    %c946 = arith.constant 946 : index
    %c0_210 = arith.constant 0 : index
    %322 = vector.load %arg1[%c946, %c0_210] : memref<952x128xf32, #tpu.memory_space<vmem>>, vector<1x1xf32>
    %cst_211 = arith.constant dense<0.000000e+00> : vector<1xf32>
    %323 = vector.multi_reduction <add>, %320, %cst_211 [0] : vector<64x1xf32> to vector<1xf32>
    %324 = vector.shape_cast %323 : vector<1xf32> to vector<1x1xf32>
    %cst_212 = arith.constant 1.562500e-02 : f32
    %325 = vector.broadcast %cst_212 : f32 to vector<1x1xf32>
    %326 = arith.mulf %324, %325 : vector<1x1xf32>
    %327 = vector.broadcast %326 : vector<1x1xf32> to vector<64x1xf32>
    %328 = arith.subf %320, %327 : vector<64x1xf32>
    %329 = arith.mulf %328, %328 : vector<64x1xf32>
    %cst_213 = arith.constant dense<0.000000e+00> : vector<1xf32>
    %330 = vector.multi_reduction <add>, %329, %cst_213 [0] : vector<64x1xf32> to vector<1xf32>
    %331 = vector.shape_cast %330 : vector<1xf32> to vector<1x1xf32>
    %cst_214 = arith.constant 1.562500e-02 : f32
    %332 = vector.broadcast %cst_214 : f32 to vector<1x1xf32>
    %333 = arith.mulf %331, %332 : vector<1x1xf32>
    %cst_215 = arith.constant 9.99999974E-6 : f32
    %334 = vector.broadcast %cst_215 : f32 to vector<1x1xf32>
    %335 = arith.addf %333, %334 : vector<1x1xf32>
    %336 = math.rsqrt %335 : vector<1x1xf32>
    %337 = vector.broadcast %336 : vector<1x1xf32> to vector<64x1xf32>
    %338 = arith.mulf %328, %337 : vector<64x1xf32>
    %339 = vector.broadcast %321 : vector<1x1xf32> to vector<64x1xf32>
    %340 = arith.mulf %338, %339 : vector<64x1xf32>
    %341 = vector.broadcast %322 : vector<1x1xf32> to vector<64x1xf32>
    %342 = arith.addf %340, %341 : vector<64x1xf32>
    %cst_216 = arith.constant 0.000000e+00 : f32
    %343 = vector.broadcast %cst_216 : f32 to vector<64x1xf32>
    %344 = arith.maximumf %342, %343 : vector<64x1xf32>
    %345 = math.tanh %344 : vector<64x1xf32>
    %c0_217 = arith.constant 0 : index
    %c0_218 = arith.constant 0 : index
    %346 = vector.load %arg2[%c0_217, %c0_218] : memref<64x1xf32, #tpu.memory_space<vmem>>, vector<64x1xf32>
    tpu.vector_store %arg2[%c0_217, %c0_218], %345 {strides = array<i32>} : memref<64x1xf32, #tpu.memory_space<vmem>>, vector<64x1xf32>,
    return
  }
}

</mosaic_0001>

<bundles_post_ra>
// kernel: wavegan_generator_forward.1
= control target key start
LH: loop header
LB: loop body
LE: loop exit
PB: predicated region body
PF: predicated region fallthrough
CT: control target
= control target key end

     0   :  { %7 = vsyncpa [#allocation4], 0  ;;  %s4319_s0 = inlined_call_operand.hbm [shape: f32[2,8], index: 0, kind: input, shape index: {}]   ;;  %s4320_s1 = inlined_call_operand.hbm [shape: f32[952,128], index: 1, kind: input, shape index: {}]   ;;  %s4321_s2 = inlined_call_operand.vmem [shape: f32[64,1], index: 2, kind: output, shape index: {}]  }
   0x1   :  { %8 = vsyncpa [#allocation6], 0  ;;  %s3241_s9 = smov [#allocation3]   ;;  %s3242_s11 = smov [#allocation5]  }
   0x2   :  { %s15_s10 = sshll.u32 %s3241_s9, 4  ;;  %s24_s12 = sshll.u32 %s3242_s11, 4  ;;  %s16_s10 = int_to_ptr.vmem [resolvable:$true] %s15_s10  ;;  %s25_s12 = int_to_ptr.vmem [resolvable:$true] %s24_s12 }
   0x3   :  { %s3205_s13 = scalar_lea.vmem %s16_s10, 32  ;;  %p3210_p1 = scmp.lt.s32.totalorder %s16_s10, %s16_s10 }
   0x4   :  { %p3206_p0 = scmp.ne.s32.totalorder %s16_s10, %s3205_s13  ;;  %p3211_p2 = scmp.lt.s32.totalorder %s3205_s13, %s3205_s13 }
   0x6   :  { %p3212_p3 = por %p3211_p2, %p3210_p1 }
   0x8   :  { %p3213_p4 = pnand %p3212_p3, %p3206_p0 }
   0xa   :  { %3216 = shalt.err (!%p3213_p4)
}
   0xb   :  { %18 = dma.hbm_to_vmem [thread:$0]  %s4319_s0, 32, %s16_s10, [#allocation4]  }
   0xc   :  { %s3225_s16 = scalar_lea.vmem %s25_s12, 15232  ;;  %p3230_p6 = scmp.lt.s32.totalorder %s25_s12, %s25_s12 }
   0xd   :  { %p3226_p5 = scmp.ne.s32.totalorder %s25_s12, %s3225_s16  ;;  %p3231_p7 = scmp.lt.s32.totalorder %s3225_s16, %s3225_s16 }
   0xf   :  { %p3232_p8 = por %p3231_p7, %p3230_p6 }
  0x11   :  { %p3233_p9 = pnand %p3232_p8, %p3226_p5 }
  0x13   :  { %3236 = shalt.err (!%p3233_p9)
}
  0x14   :  { %s3243_s17 = smov 128   ;;  %s3244_s18 = smov 8  }
  0x15   :  { %30 = dma.hbm_to_vmem [thread:$0]  %s4320_s1, 15232, %s25_s12, [#allocation6], %s3243_s17, %s3243_s17, %s3244_s18  }
  0x16   :  { %3237 = dma.done.wait [#allocation4], 32  }
  0x17   :  { %3238 = vsyncadd [#allocation4], 4294967264 }
  0x18   :  { %3239 = dma.done.wait [#allocation6], 15232  }
  0x19   :  { %3240 = vsyncadd [#allocation6], 4294952064  ;;  %v3245_v0 = vmov 0.0   ;;  %vm3246_vm0 = vmmov 0   ;;  %vm44_vm1 = vcmask 64512   ;;  %v37_v1 = vld [vmem:[#allocation5] sm:$0xff] }
  0x1a   :  { %2937 = vmatprep.subr.mxu0 %v3245_v0  ;;  %232 = vst [vmem:[#allocation2] sm:$0xf] %v3245_v0  ;;  %703 = vst [vmem:[#allocation2 + $0x10] sm:$0xff] %v3245_v0  ;;  %2939 = vmatprep.mubr.msk.f32.mxu0 %vm3246_vm0, %v3245_v0  ;;  %v38_v2 = vld [vmem:[#allocation3] sm:$0x3]  ;;  %vm120_vm2 = vcmask 25600  }
  0x1b   :  { %1068 = vst [vmem:[#allocation2 + $0x8] sm:$0xff] %v3245_v0  ;;  %1070 = vst [vmem:[#allocation2 + $0x18] sm:$0xff] %v3245_v0  ;;  %2987 = vmatprep.subr.mxu1 %v3245_v0  ;;  %3019 = vmatprep.mubr.msk.f32.mxu1 %vm3246_vm0, %v3245_v0  ;;  %v2753_v3 = vld [vmem:[#allocation5 + $0x8] ss:$0 sm:$0xff]  ;;  %v2755_v27 = vld [vmem:[#allocation5 + $0x9] ss:$0 sm:$0xff] }
  0x1c   :  { %1071 = vst [vmem:[#allocation2 + $0x20] sm:$0xff] %v3245_v0  ;;  %1072 = vst [vmem:[#allocation2 + $0x28] sm:$0xff] %v3245_v0  ;;  %2938 = vmatpush3.msra.mxu0 %v37_v1  ;;  %v2756_v29 = vld [vmem:[#allocation5 + $0xa] ss:$0 sm:$0xff]  ;;  %vm4326_vm3 = vcmask 1041408   ;;  %vm154_vm4 = vcmask 15360  }
  0x1d   :  { %1073 = vst [vmem:[#allocation2 + $0x30] sm:$0xff] %v3245_v0  ;;  %1074 = vst [vmem:[#allocation2 + $0x38] sm:$0xff] %v3245_v0  ;;  %2940 = vmatmul.mubr.msk.f32.vlgmr.msra.gmra.mxu0 %vm44_vm1, %v38_v2  ;;  %2942 = vmatprep.subr.mxu0 %v3245_v0  ;;  %v153_v33 = vld [vmem:[#allocation5 + $0x10] sm:$0xf]  ;;  %v263_v35 = vld [vmem:[#allocation5 + $0x88] sm:$0xff]  ;;  %vm236_vm5 = vcmask 27650  }
  0x1e   :  { %1728 = vst [vmem:[#allocation2 + $0x40] sm:$0xff] %v3245_v0  ;;  %1729 = vst [vmem:[#allocation2 + $0x50] sm:$0xff] %v3245_v0  ;;  %2944 = vmatprep.mubr.msk.f32.mxu0 %vm3246_vm0, %v3245_v0  ;;  %v264_v34 = vld [vmem:[#allocation5 + $0x90] sm:$0xff]  ;;  %v262_v36 = vld [vmem:[#allocation5 + $0x80] sm:$0xff]  ;;  %s3247_s0 = smov 4   ;;  %vm241_vm6 = vcmask 60448  }
  0x1f   :  { %1730 = vst [vmem:[#allocation2 + $0x60] sm:$0xff] %v3245_v0  ;;  %1731 = vst [vmem:[#allocation2 + $0x70] sm:$0xff] %v3245_v0  ;;  %v261_v37 = vld [vmem:[#allocation5 + $0x78] sm:$0xff]  ;;  %v260_v38 = vld [vmem:[#allocation5 + $0x70] sm:$0xff]  ;;  %vm247_vm7 = vcmask 91200   ;;  %vm343_vm8 = vcmask 125952  }
  0x20   :  { %v259_v39 = vld [vmem:[#allocation5 + $0x68] sm:$0xff]  ;;  %v258_v40 = vld [vmem:[#allocation5 + $0x60] sm:$0xff]  ;;  %v257_v41 = vld [vmem:[#allocation5 + $0x58] sm:$0xff]  ;;  %vm4327_vm9 = vcmask 1043456   ;;  %vm4322_vm10 = vcmask 31744   ;;  %vm459_vm11 = vcmask 130054  }
  0x21   :  { %v256_v42 = vld [vmem:[#allocation5 + $0x50] sm:$0xff]  ;;  %v255_v43 = vld [vmem:[#allocation5 + $0x48] sm:$0xff]  ;;  %v254_v44 = vld [vmem:[#allocation5 + $0x40] sm:$0xff]  ;;  %s3248_s1 = smov 48   ;;  %s3249_s21 = smov 16   ;;  %vm465_vm12 = vcmask 261252  }
  0x22   :  { %v253_v45 = vld [vmem:[#allocation5 + $0x38] sm:$0xff]  ;;  %v252_v46 = vld [vmem:[#allocation5 + $0x30] sm:$0xff]  ;;  %v251_v47 = vld [vmem:[#allocation5 + $0x28] sm:$0xff]  ;;  %s3250_s22 = smov 80   ;;  %s3251_s23 = smov 32   ;;  %vm471_vm13 = vcmask 392450  }
  0x23   :  { %v250_v48 = vld [vmem:[#allocation5 + $0x20] sm:$0xff]  ;;  %v249_v49 = vld [vmem:[#allocation5 + $0x18] sm:$0xff]  ;;  %s3252_s24 = smov 64   ;;  %s3253_s25 = smov 96   ;;  %vm476_vm14 = vcmask 523648   ;;  %vm481_vm15 = vcmask 652800  }
  0x24   :  { %v2759_v57 = vld [vmem:[#allocation5 + $0x98] ss:$0 sm:$0xff]  ;;  %s3254_s26 = smov 56   ;;  %s3255_s27 = smov 88  }
  0x25   :  { %s3256_s28 = smov 24   ;;  %s3257_s29 = smov 72  }
  0x26   :  { %s3258_s30 = smov 104   ;;  %s3259_s3 = smov 40  }
  0x27   :  { %s3260_s4 = smov 112   ;;  %s3261_s5 = smov 120  }
  0x28   :  { %s3262_s6 = smov 20   ;;  %s3263_s7 = smov 36  }
  0x29   :  { %s3264_s8 = smov 12   ;;  %s3265_s9 = smov 28  }
  0x2a   :  { %s3266_s10 = smov 44   ;;  %s3267_s11 = smov 52  }
  0x2b   :  { %s3268_s12 = smov 60   ;;  %s3269_s13 = smov 68  }
  0x2c   :  { %s3270_s14 = smov 76   ;;  %s3271_s15 = smov 84  }
  0x2d   :  { %s3272_s16 = smov 92  }
  0xdd   :  { %v114_v4 = vpop.f32.mrf.mxu0 }
  0xde   :  { %v115_v5 = vadd.f32 %v2753_v3, %v114_v4 }
  0xdf   :  { %v2941_v6 = vpop.f32.mrf.mxu0 }
  0xe0   :  { %v121_v7 = vsel %vm120_vm2, %v115_v5, 0.0 }
  0xe1   :  { %v122_v8 = vrot.slane %v121_v7, 4 }
  0xe3   :  { %v123_v9 = vadd.f32 %v122_v8, %v121_v7 }
  0xe5   :  { %v124_v10 = vrot.slane %v123_v9, 2 }
  0xe7   :  { %v125_v11 = vadd.f32 %v124_v10, %v123_v9 }
  0xe9   :  { %v126_v12 = vrot.slane %v125_v11, 1 }
  0xeb   :  { %v127_v13 = vadd.f32 %v126_v12, %v125_v11 }
  0xed   :  { %v128_v14 = vmul.f32 0.5, %v127_v13 }
  0xef   :  { %v129_v15 = vsub.f32 %v115_v5, %v128_v14 }
  0xf1   :  { %v130_v16 = vmul.f32 %v129_v15, %v129_v15 }
  0xf3   :  { %v131_v17 = vsel %vm120_vm2, %v130_v16, 0.0  ;;  %vm491_vm2 = vcmask 911104  }
  0xf4   :  { %v132_v18 = vrot.slane %v131_v17, 4 }
  0xf6   :  { %v133_v19 = vadd.f32 %v132_v18, %v131_v17  ;;  %v2760_v18 = vld [vmem:[#allocation5 + $0x99] ss:$0 sm:$0xff] }
  0xf8   :  { %v134_v20 = vrot.slane %v133_v19, 2 }
  0xfa   :  { %v135_v21 = vadd.f32 %v134_v20, %v133_v19  ;;  %v2761_v20 = vld [vmem:[#allocation5 + $0x9a] ss:$0 sm:$0xff] }
  0xfc   :  { %v136_v22 = vrot.slane %v135_v21, 1 }
  0xfe   :  { %v137_v23 = vadd.f32 %v136_v22, %v135_v21 }
 0x100   :  { %v138_v24 = vmul.f32 0.5, %v137_v23 }
 0x102   :  { %v139_v25 = vadd.f32 1e-05, %v138_v24  ;;  %v376_v24 = vld [vmem:[#allocation5 + $0xa0] sm:$0xff] }
 0x104   :  { %3168 = vrsqrt.f32 %v139_v25  ;;  %v508_v25 = vld [vmem:[#allocation5 + $0x120] sm:$0xff] }
 0x105   :  { %2988 = vmatpush3.msra.mxu1 %v508_v25  ;;  %v838_v25 = vld [vmem:[#allocation5 + $0x1b8] sm:$0xff] }
 0x106   :  { %2989 = vmatprep.subr.mxu1 %v3245_v0 }
 0x111   :  { %v3169_v26 = vpop.eup %3168 }
 0x112   :  { %v141_v28 = vmul.f32 %v3169_v26, %v129_v15  ;;  %v507_v26 = vld [vmem:[#allocation5 + $0x118] sm:$0xff] }
 0x113   :  { %2990 = vmatpush3.msra.mxu1 %v507_v26  ;;  %v837_v26 = vld [vmem:[#allocation5 + $0x1b0] sm:$0xff] }
 0x114   :  { %v146_v30 = vmul.f32 %v2755_v27, %v141_v28  ;;  %v506_v27 = vld [vmem:[#allocation5 + $0x110] sm:$0xff]  ;;  %2991 = vmatprep.subr.mxu1 %v3245_v0  ;;  %v505_v28 = vld [vmem:[#allocation5 + $0x108] sm:$0xff] }
 0x115   :  { %2992 = vmatpush3.msra.mxu1 %v506_v27 }
 0x116   :  { %v151_v31 = vadd.f32 %v2756_v29, %v146_v30  ;;  %2993 = vmatprep.subr.mxu1 %v3245_v0  ;;  %v504_v29 = vld [vmem:[#allocation5 + $0x100] sm:$0xff]  ;;  %v503_v30 = vld [vmem:[#allocation5 + $0xf8] sm:$0xff] }
 0x117   :  { %2994 = vmatpush3.msra.mxu1 %v505_v28  ;;  %v836_v28 = vld [vmem:[#allocation5 + $0x1a8] sm:$0xff] }
 0x118   :  { %v152_v32 = vmax.f32 %v151_v31, 0.0  ;;  %2995 = vmatprep.subr.mxu1 %v3245_v0  ;;  %v502_v31 = vld [vmem:[#allocation5 + $0xf0] sm:$0xff] }
 0x119   :  { %2996 = vmatpush3.msra.mxu1 %v504_v29  ;;  %v835_v29 = vld [vmem:[#allocation5 + $0x1a0] sm:$0xff] }
 0x11a   :  { %2943 = vmatpush3.msk.msra.mxu0 %vm4326_vm3, %v152_v32  ;;  %2997 = vmatprep.subr.mxu1 %v3245_v0  ;;  %v501_v32 = vld [vmem:[#allocation5 + $0xe8] sm:$0xff] }
 0x11b   :  { %2945 = vmatmul.mubr.msk.f32.vlgmr.msra.gmra.mxu0 %vm154_vm4, %v153_v33  ;;  %2947 = vmatprep.subr.mxu0 %v3245_v0  ;;  %v500_v33 = vld [vmem:[#allocation5 + $0xe0] sm:$0xff]  ;;  %vm707_vm4 = vcmask 64518  }
 0x11c   :  { %2979 = vmatprep.mubr.msk.f32.mxu0 %vm3246_vm0, %v3245_v0  ;;  %2948 = vmatpush3.msra.mxu0 %v264_v34  ;;  %v499_v34 = vld [vmem:[#allocation5 + $0xd8] sm:$0xff] }
 0x11d   :  { %2949 = vmatprep.subr.mxu0 %v3245_v0  ;;  %2998 = vmatpush3.msra.mxu1 %v503_v30 }
 0x11e   :  { %2950 = vmatpush3.msra.mxu0 %v263_v35  ;;  %2999 = vmatprep.subr.mxu1 %v3245_v0  ;;  %v498_v35 = vld [vmem:[#allocation5 + $0xd0] sm:$0xff] }
 0x11f   :  { %2951 = vmatprep.subr.mxu0 %v3245_v0  ;;  %3000 = vmatpush3.msra.mxu1 %v502_v31  ;;  %v834_v31 = vld [vmem:[#allocation5 + $0x198] sm:$0xff] }
 0x120   :  { %2952 = vmatpush3.msra.mxu0 %v262_v36  ;;  %3001 = vmatprep.subr.mxu1 %v3245_v0  ;;  %v497_v36 = vld [vmem:[#allocation5 + $0xc8] sm:$0xff] }
 0x121   :  { %2953 = vmatprep.subr.mxu0 %v3245_v0  ;;  %3002 = vmatpush3.msra.mxu1 %v501_v32 }
 0x122   :  { %2954 = vmatpush3.msra.mxu0 %v261_v37  ;;  %3003 = vmatprep.subr.mxu1 %v3245_v0 }
 0x123   :  { %2955 = vmatprep.subr.mxu0 %v3245_v0  ;;  %3004 = vmatpush3.msra.mxu1 %v500_v33  ;;  %v833_v33 = vld [vmem:[#allocation5 + $0x190] sm:$0xff] }
 0x124   :  { %2956 = vmatpush3.msra.mxu0 %v260_v38  ;;  %3005 = vmatprep.subr.mxu1 %v3245_v0 }
 0x125   :  { %2957 = vmatprep.subr.mxu0 %v3245_v0  ;;  %3006 = vmatpush3.msra.mxu1 %v499_v34  ;;  %v832_v34 = vld [vmem:[#allocation5 + $0x188] sm:$0xff] }
 0x126   :  { %2958 = vmatpush3.msra.mxu0 %v259_v39  ;;  %3007 = vmatprep.subr.mxu1 %v3245_v0 }
 0x127   :  { %2959 = vmatprep.subr.mxu0 %v3245_v0  ;;  %3008 = vmatpush3.msra.mxu1 %v498_v35 }
 0x128   :  { %2960 = vmatpush3.msra.mxu0 %v258_v40  ;;  %3009 = vmatprep.subr.mxu1 %v3245_v0 }
 0x129   :  { %2961 = vmatprep.subr.mxu0 %v3245_v0  ;;  %3010 = vmatpush3.msra.mxu1 %v497_v36  ;;  %v831_v36 = vld [vmem:[#allocation5 + $0x180] sm:$0xff] }
 0x12a   :  { %2962 = vmatpush3.msra.mxu0 %v257_v41  ;;  %3011 = vmatprep.subr.mxu1 %v3245_v0  ;;  %v496_v41 = vld [vmem:[#allocation5 + $0xc0] sm:$0xff] }
 0x12b   :  { %2963 = vmatprep.subr.mxu0 %v3245_v0  ;;  %3012 = vmatpush3.msra.mxu1 %v496_v41  ;;  %v828_v41 = vld [vmem:[#allocation5 + $0x168] sm:$0xff] }
 0x12c   :  { %2964 = vmatpush3.msra.mxu0 %v256_v42  ;;  %v495_v42 = vld [vmem:[#allocation5 + $0xb8] sm:$0xff]  ;;  %3013 = vmatprep.subr.mxu1 %v3245_v0 }
 0x12d   :  { %2965 = vmatprep.subr.mxu0 %v3245_v0  ;;  %3014 = vmatpush3.msra.mxu1 %v495_v42 }
 0x12e   :  { %2966 = vmatpush3.msra.mxu0 %v255_v43  ;;  %v494_v43 = vld [vmem:[#allocation5 + $0xb0] sm:$0xff]  ;;  %3015 = vmatprep.subr.mxu1 %v3245_v0 }
 0x12f   :  { %2967 = vmatprep.subr.mxu0 %v3245_v0  ;;  %3016 = vmatpush3.msra.mxu1 %v494_v43  ;;  %v827_v43 = vld [vmem:[#allocation5 + $0x160] sm:$0xff] }
 0x130   :  { %2968 = vmatpush3.msra.mxu0 %v254_v44  ;;  %3017 = vmatprep.subr.mxu1 %v3245_v0 }
 0x131   :  { %2969 = vmatprep.subr.mxu0 %v3245_v0 }
 0x132   :  { %2970 = vmatpush3.msra.mxu0 %v253_v45  ;;  %v493_v45 = vld [vmem:[#allocation5 + $0xa8] sm:$0xff] }
 0x133   :  { %2971 = vmatprep.subr.mxu0 %v3245_v0  ;;  %3018 = vmatpush3.msra.mxu1 %v493_v45  ;;  %v826_v45 = vld [vmem:[#allocation5 + $0x158] sm:$0xff] }
 0x134   :  { %2972 = vmatpush3.msra.mxu0 %v252_v46 }
 0x135   :  { %2973 = vmatprep.subr.mxu0 %v3245_v0 }
 0x136   :  { %2974 = vmatpush3.msra.mxu0 %v251_v47 }
 0x137   :  { %2975 = vmatprep.subr.mxu0 %v3245_v0 }
 0x138   :  { %2976 = vmatpush3.msra.mxu0 %v250_v48 }
 0x139   :  { %2977 = vmatprep.subr.mxu0 %v3245_v0 }
 0x13a   :  { %2978 = vmatpush3.msra.mxu0 %v249_v49 }
 0x13b   :  { %2982 = vmatprep.subr.mxu0 %v3245_v0 }
 0x1db   :  { %v228_v50 = vpop.f32.mrf.mxu0 }
 0x1dc   :  { %v234_v51 = vrot.slane %v228_v50, 6  ;;  %238 = vrot.lane.b32.xlu0 %v228_v50, %s3247_s0  ;;  %v243_v53 = vrot.slane %v228_v50, 2 }
 0x1dd   :  { %v2946_v52 = vpop.f32.mrf.mxu0 }
 0x1de   :  { %237 = vst.msk [vmem:[#allocation2] sm:$0xc] %vm236_vm5, %v234_v51  ;;  %vm4328_vm5 = vcmask 1045504  }
 0x1e0   :  { %244 = vrot.lane.b32.xlu0 %v243_v53, %s3244_s18  ;;  %v619_v53 = vld [vmem:[#allocation5 + $0x130] sm:$0xff] }
 0x24e   :  { %v239_v54 = vpop.permute.xlu0 %238 }
 0x24f   :  { %242 = vst.msk [vmem:[#allocation2] sm:$0xf] %vm241_vm6, %v239_v54  ;;  %v2764_v54 = vld [vmem:[#allocation5 + $0x128] ss:$0 sm:$0xff]  ;;  %vm736_vm6 = vcmask 326918  }
 0x252   :  { %v245_v55 = vpop.permute.xlu0 %244 }
 0x253   :  { %248 = vst.msk [vmem:[#allocation2] sm:$0x3] %vm247_vm7, %v245_v55  ;;  %vm748_vm7 = vcmask 392516  }
 0x25a   :  { %v265_v56 = vld [vmem:[#allocation2] sm:$0xf] }
 0x25b   :  { %2980 = vmatmul.mubr.f32.vlgmr.msra.gmra.mxu0 %v265_v56  ;;  %455 = vst [vmem:[#allocation2] sm:$0xff] %v3245_v0 }
 0x25c   :  { %2984 = vmatprep.mubr.msk.f32.mxu0 %vm3246_vm0, %v3245_v0  ;;  %vm486_vm0 = vcmask 781952  }
 0x31b   :  { %v337_v58 = vpop.f32.mrf.mxu0 }
 0x31c   :  { %v338_v59 = vadd.f32 %v2759_v57, %v337_v58 }
 0x31d   :  { %v2981_v60 = vpop.f32.mrf.mxu0 }
 0x31e   :  { %v344_v61 = vsel %vm343_vm8, %v338_v59, 0.0 }
 0x31f   :  { %v345_v62 = vrot.slane %v344_v61, 4 }
 0x321   :  { %v346_v63 = vadd.f32 %v345_v62, %v344_v61 }
 0x323   :  { %v347_v1 = vrot.slane %v346_v63, 2 }
 0x325   :  { %v348_v2 = vadd.f32 %v347_v1, %v346_v63 }
 0x327   :  { %v349_v3 = vrot.slane %v348_v2, 1 }
 0x329   :  { %v350_v4 = vadd.f32 %v349_v3, %v348_v2 }
 0x32b   :  { %v351_v5 = vmul.f32 0.25, %v350_v4 }
 0x32d   :  { %v352_v6 = vsub.f32 %v338_v59, %v351_v5 }
 0x32f   :  { %v353_v7 = vmul.f32 %v352_v6, %v352_v6 }
 0x331   :  { %v354_v8 = vsel %vm343_vm8, %v353_v7, 0.0  ;;  %vm760_vm8 = vcmask 458114  }
 0x332   :  { %v355_v9 = vrot.slane %v354_v8, 4 }
 0x334   :  { %v356_v10 = vadd.f32 %v355_v9, %v354_v8 }
 0x336   :  { %v357_v11 = vrot.slane %v356_v10, 2 }
 0x338   :  { %v358_v12 = vadd.f32 %v357_v11, %v356_v10 }
 0x33a   :  { %v359_v13 = vrot.slane %v358_v12, 1 }
 0x33c   :  { %v360_v14 = vadd.f32 %v359_v13, %v358_v12 }
 0x33e   :  { %v361_v15 = vmul.f32 0.25, %v360_v14 }
 0x340   :  { %v362_v16 = vadd.f32 1e-05, %v361_v15  ;;  %v2765_v15 = vld [vmem:[#allocation5 + $0x129] ss:$0 sm:$0xff] }
 0x342   :  { %3170 = vrsqrt.f32 %v362_v16 }
 0x34f   :  { %v3171_v17 = vpop.eup %3170 }
 0x350   :  { %v364_v19 = vmul.f32 %v3171_v17, %v352_v6  ;;  %v2766_v17 = vld [vmem:[#allocation5 + $0x12a] ss:$0 sm:$0xff] }
 0x352   :  { %v369_v21 = vmul.f32 %v2760_v18, %v364_v19 }
 0x354   :  { %v374_v22 = vadd.f32 %v2761_v20, %v369_v21  ;;  %v620_v21 = vld [vmem:[#allocation5 + $0x138] sm:$0xff] }
 0x356   :  { %v375_v23 = vmax.f32 %v374_v22, 0.0 }
 0x358   :  { %2983 = vmatpush3.msk.msra.mxu0 %vm4327_vm9, %v375_v23 }
 0x359   :  { %2985 = vmatmul.mubr.msk.f32.vlgmr.msra.gmra.mxu0 %vm4322_vm10, %v376_v24  ;;  %vm821_vm10 = vcmask 976768  }
 0x35a   :  { %3024 = vmatprep.mubr.msk.f32.mxu0 %vm44_vm1, %v619_v53 }
 0x419   :  { %v451_v37 = vpop.f32.mrf.mxu0 }
 0x41a   :  { %473 = vrot.lane.b32.xlu0 %v451_v37, %s3248_s1  ;;  %v461_v38 = vrot.slane %v451_v37, 4  ;;  %v457_v39 = vrot.slane %v451_v37, 2  ;;  %v467_v44 = vrot.slane %v451_v37, 6  ;;  %v830_v37 = vld [vmem:[#allocation5 + $0x178] sm:$0xff] }
 0x41b   :  { %v2986_v40 = vpop.f32.mrf.mxu0 }
 0x41c   :  { %462 = vrot.lane.b32.xlu1 %v461_v38, %s3249_s21  ;;  %460 = vst.msk [vmem:[#allocation2] sm:$0xc0] %vm459_vm11, %v457_v39  ;;  %vm713_vm11 = vcmask 130116  }
 0x41e   :  { %483 = vrot.lane.b32.xlu0 %v461_v38, %s3250_s22 }
 0x420   :  { %468 = vrot.lane.b32.xlu1 %v467_v44, %s3251_s23 }
 0x424   :  { %478 = vrot.lane.b32.xlu1 %v457_v39, %s3252_s24  ;;  %v829_v39 = vld [vmem:[#allocation5 + $0x170] sm:$0xff] }
 0x428   :  { %488 = vrot.lane.b32.xlu1 %v467_v44, %s3253_s25 }
 0x48c   :  { %v474_v47 = vpop.permute.xlu0 %473 }
 0x48e   :  { %v463_v46 = vpop.permute.xlu1 %462 }
 0x48f   :  { %466 = vst.msk [vmem:[#allocation2] sm:$0xf0] %vm465_vm12, %v463_v46  ;;  %v825_v46 = vld [vmem:[#allocation5 + $0x150] sm:$0xff]  ;;  %vm770_vm12 = vcmask 523712  }
 0x490   :  { %v484_v50 = vpop.permute.xlu0 %483 }
 0x492   :  { %v469_v48 = vpop.permute.xlu1 %468 }
 0x493   :  { %472 = vst.msk [vmem:[#allocation2] sm:$0xfc] %vm471_vm13, %v469_v48  ;;  %v823_v48 = vld [vmem:[#allocation5 + $0x140] sm:$0xff]  ;;  %vm719_vm13 = vcmask 195714  }
 0x494   :  { %477 = vst.msk [vmem:[#allocation2] sm:$0xff] %vm476_vm14, %v474_v47  ;;  %v824_v47 = vld [vmem:[#allocation5 + $0x148] sm:$0xff]  ;;  %vm779_vm14 = vcmask 589312  }
 0x496   :  { %v479_v49 = vpop.permute.xlu1 %478 }
 0x497   :  { %482 = vst.msk [vmem:[#allocation2] sm:$0x3f] %vm481_vm15, %v479_v49  ;;  %vm4323_vm15 = vcmask 261312  }
 0x498   :  { %487 = vst.msk [vmem:[#allocation2] sm:$0xf] %vm486_vm0, %v484_v50  ;;  %vm4324_vm0 = vcmask 326912  }
 0x49a   :  { %v489_v51 = vpop.permute.xlu1 %488 }
 0x49b   :  { %492 = vst.msk [vmem:[#allocation2] sm:$0x3] %vm491_vm2, %v489_v51  ;;  %vm4325_vm2 = vcmask 654912  }
 0x4a2   :  { %v509_v52 = vld [vmem:[#allocation2] sm:$0xff] }
 0x4a3   :  { %3020 = vmatmul.mubr.f32.vlgmr.msra.gmra.mxu1 %v509_v52  ;;  %702 = vst [vmem:[#allocation2] sm:$0xff] %v3245_v0 }
 0x563   :  { %v581_v55 = vpop.f32.mrf.mxu1 }
 0x564   :  { %v582_v56 = vadd.f32 %v2764_v54, %v581_v55 }
 0x565   :  { %v3021_v57 = vpop.f32.mrf.mxu1 }
 0x566   :  { %v587_v58 = vsel %vm44_vm1, %v582_v56, 0.0 }
 0x567   :  { %v588_v59 = vrot.slane %v587_v58, 4 }
 0x569   :  { %v589_v60 = vadd.f32 %v588_v59, %v587_v58 }
 0x56b   :  { %v590_v61 = vrot.slane %v589_v60, 2 }
 0x56d   :  { %v591_v62 = vadd.f32 %v590_v61, %v589_v60 }
 0x56f   :  { %v592_v63 = vrot.slane %v591_v62, 1 }
 0x571   :  { %v593_v1 = vadd.f32 %v592_v63, %v591_v62 }
 0x573   :  { %v594_v2 = vmul.f32 0.125, %v593_v1 }
 0x575   :  { %v595_v3 = vsub.f32 %v582_v56, %v594_v2 }
 0x577   :  { %v596_v4 = vmul.f32 %v595_v3, %v595_v3 }
 0x579   :  { %v597_v5 = vsel %vm44_vm1, %v596_v4, 0.0 }
 0x57a   :  { %v598_v6 = vrot.slane %v597_v5, 4 }
 0x57c   :  { %v599_v7 = vadd.f32 %v598_v6, %v597_v5 }
 0x57e   :  { %v600_v8 = vrot.slane %v599_v7, 2 }
 0x580   :  { %v601_v9 = vadd.f32 %v600_v8, %v599_v7 }
 0x582   :  { %v602_v10 = vrot.slane %v601_v9, 1 }
 0x584   :  { %v603_v11 = vadd.f32 %v602_v10, %v601_v9  ;;  %v965_v9 = vld [vmem:[#allocation5 + $0x1c8] sm:$0xff]  ;;  %v2769_v10 = vld [vmem:[#allocation5 + $0x1c0] ss:$0 sm:$0xff] }
 0x586   :  { %v604_v12 = vmul.f32 0.125, %v603_v11 }
 0x588   :  { %v605_v13 = vadd.f32 1e-05, %v604_v12 }
 0x58a   :  { %3172 = vrsqrt.f32 %v605_v13 }
 0x597   :  { %v3173_v14 = vpop.eup %3172 }
 0x598   :  { %v607_v16 = vmul.f32 %v3173_v14, %v595_v3 }
 0x59a   :  { %v612_v18 = vmul.f32 %v2765_v15, %v607_v16 }
 0x59c   :  { %v617_v19 = vadd.f32 %v2766_v17, %v612_v18 }
 0x59e   :  { %v618_v20 = vmax.f32 %v617_v19, 0.0 }
 0x5a0   :  { %3022 = vmatprep.subr.mxu0 %v618_v20 }
 0x5a1   :  { %3023 = vmatpush3.msra.mxu0 %v618_v20 }
 0x5a2   :  { %3025 = vmatmul.mubr.msk.f32.vlgmr.msra.gmra.mxu0 %vm44_vm1, %v620_v21  ;;  %3027 = vmatprep.subr.mxu0 %v838_v25 }
 0x5a3   :  { %3028 = vmatpush3.msra.mxu0 %v838_v25 }
 0x5a4   :  { %3029 = vmatprep.subr.mxu0 %v837_v26 }
 0x5a5   :  { %3030 = vmatpush3.msra.mxu0 %v837_v26 }
 0x5a6   :  { %3031 = vmatprep.subr.mxu0 %v836_v28 }
 0x5a7   :  { %3032 = vmatpush3.msra.mxu0 %v836_v28 }
 0x5a8   :  { %3033 = vmatprep.subr.mxu0 %v835_v29 }
 0x5a9   :  { %3034 = vmatpush3.msra.mxu0 %v835_v29 }
 0x5aa   :  { %3035 = vmatprep.subr.mxu0 %v834_v31 }
 0x5ab   :  { %3036 = vmatpush3.msra.mxu0 %v834_v31 }
 0x5ac   :  { %3037 = vmatprep.subr.mxu0 %v833_v33 }
 0x5ad   :  { %3038 = vmatpush3.msra.mxu0 %v833_v33 }
 0x5ae   :  { %3039 = vmatprep.subr.mxu0 %v832_v34 }
 0x5af   :  { %3040 = vmatpush3.msra.mxu0 %v832_v34 }
 0x5b0   :  { %3041 = vmatprep.subr.mxu0 %v831_v36 }
 0x5b1   :  { %3042 = vmatpush3.msra.mxu0 %v831_v36 }
 0x5b2   :  { %3043 = vmatprep.subr.mxu0 %v830_v37 }
 0x5b3   :  { %3044 = vmatpush3.msra.mxu0 %v830_v37 }
 0x5b4   :  { %3045 = vmatprep.subr.mxu0 %v829_v39 }
 0x5b5   :  { %3046 = vmatpush3.msra.mxu0 %v829_v39 }
 0x5b6   :  { %3047 = vmatprep.subr.mxu0 %v828_v41 }
 0x5b7   :  { %3048 = vmatpush3.msra.mxu0 %v828_v41 }
 0x5b8   :  { %3049 = vmatprep.subr.mxu0 %v827_v43 }
 0x5b9   :  { %3050 = vmatpush3.msra.mxu0 %v827_v43  ;;  %v2771_v43 = vld [vmem:[#allocation5 + $0x1c2] ss:$0 sm:$0xff] }
 0x5ba   :  { %3051 = vmatprep.subr.mxu0 %v826_v45 }
 0x5bb   :  { %3052 = vmatpush3.msra.mxu0 %v826_v45 }
 0x5bc   :  { %3053 = vmatprep.subr.mxu0 %v825_v46 }
 0x5bd   :  { %3054 = vmatpush3.msra.mxu0 %v825_v46 }
 0x5be   :  { %3055 = vmatprep.subr.mxu0 %v824_v47 }
 0x5bf   :  { %3056 = vmatpush3.msra.mxu0 %v824_v47 }
 0x5c0   :  { %3057 = vmatprep.subr.mxu0 %v823_v48 }
 0x5c1   :  { %3058 = vmatpush3.msra.mxu0 %v823_v48 }
 0x662   :  { %v3370_v22 = vpop.f32.mrf.mxu0 }
 0x663   :  { %766 = vrot.lane.b32.xlu0 %v3370_v22, %s3254_s26  ;;  %803 = vrot.lane.b32.xlu1 %v3370_v22, %s3255_s27  ;;  %v728_v27 = vrot.slane %v3370_v22, 2  ;;  %v740_v30 = vrot.slane %v3370_v22, 4  ;;  %v752_v42 = vrot.slane %v3370_v22, 6 }
 0x664   :  { %v693_v23 = vpop.f32.mrf.mxu0 }
 0x665   :  { %v705_v24 = vrot.slane %v693_v23, 2  ;;  %v709_v32 = vrot.slane %v693_v23, 4  ;;  %v715_v35 = vrot.slane %v693_v23, 6 }
 0x667   :  { %721 = vrot.lane.b32.xlu0 %v693_v23, %s3256_s28  ;;  %764 = vrot.lane.b32.xlu1 %v693_v23, %s3254_s26  ;;  %708 = vst.msk [vmem:[#allocation2 + $0x10] sm:$0xc0] %vm707_vm4, %v705_v24  ;;  %v729_v38 = vsel %vm4328_vm5, %v705_v24, %v728_v27  ;;  %v741_v40 = vsel %vm4327_vm9, %v709_v32, %v740_v30  ;;  %vm750_vm4 = vcmask 392512  }
 0x668   :  { %v753_v44 = vsel %vm4326_vm3, %v715_v35, %v752_v42 }
 0x66b   :  { %775 = vrot.lane.b32.xlu0 %v728_v27, %s3252_s24  ;;  %808 = vrot.lane.b32.xlu1 %v728_v27, %s3253_s25 }
 0x66f   :  { %785 = vrot.lane.b32.xlu0 %v740_v30, %s3257_s29  ;;  %813 = vrot.lane.b32.xlu1 %v740_v30, %s3258_s30 }
 0x673   :  { %742 = vrot.lane.b32.xlu1 %v709_v32, %s3259_s3  ;;  %730 = vrot.lane.b32.xlu0 %v705_v24, %s3251_s23 }
 0x677   :  { %754 = vrot.lane.b32.xlu1 %v715_v35, %s3248_s1  ;;  %710 = vrot.lane.b32.xlu0 %v709_v32, %s3244_s18 }
 0x67b   :  { %716 = vrot.lane.b32.xlu0 %v715_v35, %s3249_s21  ;;  %773 = vrot.lane.b32.xlu1 %v729_v38, %s3252_s24 }
 0x67f   :  { %732 = vrot.lane.b32.xlu0 %v729_v38, %s3251_s23  ;;  %783 = vrot.lane.b32.xlu1 %v741_v40, %s3257_s29 }
 0x683   :  { %744 = vrot.lane.b32.xlu0 %v741_v40, %s3259_s3  ;;  %793 = vrot.lane.b32.xlu1 %v753_v44, %s3250_s22  ;;  %v2770_v40 = vld [vmem:[#allocation5 + $0x1c1] ss:$0 sm:$0xff] }
 0x687   :  { %756 = vrot.lane.b32.xlu0 %v753_v44, %s3248_s1  ;;  %818 = vrot.lane.b32.xlu1 %v752_v42, %s3260_s4 }
 0x68b   :  { %795 = vrot.lane.b32.xlu0 %v752_v42, %s3250_s22 }
 0x6d5   :  { %v767_v49 = vpop.permute.xlu0 %766  ;;  %v804_v50 = vpop.permute.xlu1 %803 }
 0x6d9   :  { %v722_v51 = vpop.permute.xlu0 %721  ;;  %v765_v52 = vpop.permute.xlu1 %764 }
 0x6dd   :  { %v776_v53 = vpop.permute.xlu0 %775  ;;  %v809_v54 = vpop.permute.xlu1 %808 }
 0x6e1   :  { %v786_v55 = vpop.permute.xlu0 %785  ;;  %v814_v56 = vpop.permute.xlu1 %813 }
 0x6e5   :  { %v743_v57 = vpop.permute.xlu1 %742  ;;  %v731_v58 = vpop.permute.xlu0 %730 }
 0x6e6   :  { %737 = vst.msk [vmem:[#allocation2] sm:$0xc0] %vm736_vm6, %v731_v58  ;;  %vm799_vm6 = vcmask 720512  }
 0x6e7   :  { %749 = vst.msk [vmem:[#allocation2] sm:$0xf0] %vm748_vm7, %v743_v57  ;;  %vm806_vm7 = vcmask 786112  }
 0x6e9   :  { %v755_v59 = vpop.permute.xlu1 %754  ;;  %v711_v60 = vpop.permute.xlu0 %710 }
 0x6ea   :  { %761 = vst.msk [vmem:[#allocation2] sm:$0xfc] %vm760_vm8, %v755_v59  ;;  %vm811_vm8 = vcmask 849664  }
 0x6eb   :  { %714 = vst.msk [vmem:[#allocation2 + $0x10] sm:$0xf0] %vm713_vm11, %v711_v60  ;;  %vm816_vm11 = vcmask 913216  }
 0x6ec   :  { %771 = vst.msk [vmem:[#allocation2] sm:$0xff] %vm770_vm12, %v765_v52  ;;  %v968_v52 = vld [vmem:[#allocation5 + $0x1e0] sm:$0xff] }
 0x6ed   :  { %v717_v61 = vpop.permute.xlu0 %716  ;;  %v774_v62 = vpop.permute.xlu1 %773 }
 0x6ee   :  { %720 = vst.msk [vmem:[#allocation2 + $0x10] sm:$0xfc] %vm719_vm13, %v717_v61  ;;  %vm762_vm13 = vcmask 458112  }
 0x6ef   :  { %780 = vst.msk [vmem:[#allocation2] sm:$0xff] %vm779_vm14, %v774_v62 }
 0x6f0   :  { %725 = vst.msk [vmem:[#allocation2 + $0x10] sm:$0xff] %vm4323_vm15, %v722_v51  ;;  %vm781_vm15 = vcmask 587264   ;;  %v967_v51 = vld [vmem:[#allocation5 + $0x1d8] sm:$0xff] }
 0x6f1   :  { %v733_v63 = vpop.permute.xlu0 %732  ;;  %v784_v1 = vpop.permute.xlu1 %783 }
 0x6f2   :  { %739 = vst.msk [vmem:[#allocation2 + $0x10] sm:$0xff] %vm4324_vm0, %v733_v63  ;;  %vm791_vm0 = vcmask 650816  }
 0x6f3   :  { %790 = vst.msk [vmem:[#allocation2] sm:$0xff] %vm4325_vm2, %v784_v1  ;;  %vm801_vm2 = vcmask 714368  }
 0x6f5   :  { %v745_v2 = vpop.permute.xlu0 %744  ;;  %v794_v3 = vpop.permute.xlu1 %793 }
 0x6f6   :  { %751 = vst.msk [vmem:[#allocation2 + $0x10] sm:$0xff] %vm750_vm4, %v745_v2 }
 0x6f7   :  { %800 = vst.msk [vmem:[#allocation2] sm:$0xff] %vm799_vm6, %v794_v3 }
 0x6f8   :  { %807 = vst.msk [vmem:[#allocation2] sm:$0xff] %vm806_vm7, %v804_v50  ;;  %v966_v50 = vld [vmem:[#allocation5 + $0x1d0] sm:$0xff] }
 0x6f9   :  { %812 = vst.msk [vmem:[#allocation2] sm:$0x3f] %vm811_vm8, %v809_v54  ;;  %v757_v4 = vpop.permute.xlu0 %756  ;;  %v819_v5 = vpop.permute.xlu1 %818  ;;  %vm969_vm8 = vcmask 130048  }
 0x6fa   :  { %817 = vst.msk [vmem:[#allocation2] sm:$0xf] %vm816_vm11, %v814_v56  ;;  %vm1100_vm11 = vcmask 195716  }
 0x6fb   :  { %763 = vst.msk [vmem:[#allocation2 + $0x10] sm:$0xff] %vm762_vm13, %v757_v4 }
 0x6fc   :  { %822 = vst.msk [vmem:[#allocation2] sm:$0x3] %vm821_vm10, %v819_v5  ;;  %v1423_v5 = vld [vmem:[#allocation5 + $0x2e0] sm:$0xff]  ;;  %vm1151_vm10 = vcmask 458116  }
 0x6fd   :  { %772 = vst.msk [vmem:[#allocation2 + $0x10] sm:$0xff] %vm770_vm12, %v767_v49  ;;  %v796_v6 = vpop.permute.xlu0 %795  ;;  %2857 = vmatprep.subr.mxu1 %v1423_v5 }
 0x6fe   :  { %782 = vst.msk [vmem:[#allocation2 + $0x10] sm:$0x3f] %vm781_vm15, %v776_v53  ;;  %vm1166_vm15 = vcmask 523714  }
 0x6ff   :  { %792 = vst.msk [vmem:[#allocation2 + $0x10] sm:$0xf] %vm791_vm0, %v786_v55  ;;  %vm1087_vm0 = vcmask 130118  }
 0x700   :  { %802 = vst.msk [vmem:[#allocation2 + $0x10] sm:$0x3] %vm801_vm2, %v796_v6  ;;  %v1407_v6 = vld [vmem:[#allocation5 + $0x260] sm:$0xff]  ;;  %vm1197_vm2 = vcmask 654918  }
 0x701   :  { %2858 = vmatpush3.msra.mxu1 %v1407_v6 }
 0x703   :  { %v839_v7 = vld [vmem:[#allocation2] sm:$0xff] }
 0x704   :  { %3059 = vmatprep.mubr.f32.mxu0 %v839_v7  ;;  %1067 = vst [vmem:[#allocation2] sm:$0xff] %v3245_v0  ;;  %v1422_v7 = vld [vmem:[#allocation5 + $0x2d8] sm:$0xff] }
 0x705   :  { %2859 = vmatprep.subr.mxu1 %v1422_v7 }
 0x707   :  { %v840_v8 = vld [vmem:[#allocation2 + $0x10] sm:$0xff] }
 0x708   :  { %3060 = vmatmul.mubr.f32.vlgmr.msra.gmra.mxu0 %v840_v8  ;;  %1069 = vst [vmem:[#allocation2 + $0x10] sm:$0xff] %v3245_v0  ;;  %v1406_v8 = vld [vmem:[#allocation5 + $0x258] sm:$0xff] }
 0x709   :  { %3066 = vmatprep.mubr.msk.f32.mxu0 %vm969_vm8, %v965_v9  ;;  %2860 = vmatpush3.msra.mxu1 %v1406_v8 }
 0x7c8   :  { %v3061_v11 = vpop.f32.mrf.mxu0 }
 0x7c9   :  { %v918_v12 = vadd.f32 %v3061_v11, %v2769_v10  ;;  %v1405_v11 = vld [vmem:[#allocation5 + $0x250] sm:$0xff] }
 0x7ca   :  { %v912_v13 = vpop.f32.mrf.mxu0 }
 0x7cb   :  { %v913_v14 = vadd.f32 %v2769_v10, %v912_v13  ;;  %v924_v15 = vsel %vm44_vm1, %v918_v12, 0.0  ;;  %v1421_v10 = vld [vmem:[#allocation5 + $0x2d0] sm:$0xff]  ;;  %v1404_v13 = vld [vmem:[#allocation5 + $0x248] sm:$0xff] }
 0x7cc   :  { %2861 = vmatprep.subr.mxu1 %v1421_v10 }
 0x7cd   :  { %v923_v16 = vsel %vm44_vm1, %v913_v14, 0.0  ;;  %2862 = vmatpush3.msra.mxu1 %v1405_v11 }
 0x7ce   :  { %v925_v17 = vadd.f32 %v924_v15, %v923_v16  ;;  %v1403_v15 = vld [vmem:[#allocation5 + $0x240] sm:$0xff]  ;;  %v1418_v16 = vld [vmem:[#allocation5 + $0x2b8] sm:$0xff] }
 0x7d0   :  { %v926_v18 = vrot.slane %v925_v17, 4 }
 0x7d2   :  { %v927_v19 = vadd.f32 %v926_v18, %v925_v17  ;;  %v1402_v17 = vld [vmem:[#allocation5 + $0x238] sm:$0xff]  ;;  %v1417_v18 = vld [vmem:[#allocation5 + $0x2b0] sm:$0xff] }
 0x7d4   :  { %v928_v20 = vrot.slane %v927_v19, 2 }
 0x7d6   :  { %v929_v21 = vadd.f32 %v928_v20, %v927_v19  ;;  %v1401_v19 = vld [vmem:[#allocation5 + $0x230] sm:$0xff]  ;;  %v1416_v20 = vld [vmem:[#allocation5 + $0x2a8] sm:$0xff] }
 0x7d8   :  { %v930_v22 = vrot.slane %v929_v21, 1 }
 0x7da   :  { %v931_v0 = vadd.f32 %v930_v22, %v929_v21  ;;  %v1400_v21 = vld [vmem:[#allocation5 + $0x228] sm:$0xff]  ;;  %v1415_v22 = vld [vmem:[#allocation5 + $0x2a0] sm:$0xff] }
 0x7dc   :  { %v932_v23 = vmul.f32 0.0625, %v931_v0 }
 0x7de   :  { %v933_v24 = vsub.f32 %v913_v14, %v932_v23  ;;  %v934_v25 = vsub.f32 %v918_v12, %v932_v23  ;;  %v1420_v12 = vld [vmem:[#allocation5 + $0x2c8] sm:$0xff]  ;;  %v1419_v14 = vld [vmem:[#allocation5 + $0x2c0] sm:$0xff] }
 0x7df   :  { %2863 = vmatprep.subr.mxu1 %v1420_v12 }
 0x7e0   :  { %v935_v26 = vmul.f32 %v933_v24, %v933_v24  ;;  %v936_v27 = vmul.f32 %v934_v25, %v934_v25  ;;  %2864 = vmatpush3.msra.mxu1 %v1404_v13 }
 0x7e1   :  { %2865 = vmatprep.subr.mxu1 %v1419_v14 }
 0x7e2   :  { %v937_v28 = vsel %vm44_vm1, %v935_v26, 0.0  ;;  %v938_v29 = vsel %vm44_vm1, %v936_v27, 0.0  ;;  %2866 = vmatpush3.msra.mxu1 %v1403_v15  ;;  %v1398_v26 = vld [vmem:[#allocation5 + $0x218] sm:$0xff] }
 0x7e3   :  { %v939_v30 = vadd.f32 %v938_v29, %v937_v28  ;;  %2867 = vmatprep.subr.mxu1 %v1418_v16 }
 0x7e4   :  { %2868 = vmatpush3.msra.mxu1 %v1402_v17 }
 0x7e5   :  { %v940_v31 = vrot.slane %v939_v30, 4  ;;  %2869 = vmatprep.subr.mxu1 %v1417_v18 }
 0x7e6   :  { %2870 = vmatpush3.msra.mxu1 %v1401_v19 }
 0x7e7   :  { %v941_v32 = vadd.f32 %v940_v31, %v939_v30  ;;  %2871 = vmatprep.subr.mxu1 %v1416_v20  ;;  %v1413_v30 = vld [vmem:[#allocation5 + $0x290] sm:$0xff] }
 0x7e8   :  { %2872 = vmatpush3.msra.mxu1 %v1400_v21  ;;  %v1397_v31 = vld [vmem:[#allocation5 + $0x210] sm:$0xff] }
 0x7e9   :  { %v942_v33 = vrot.slane %v941_v32, 2  ;;  %2873 = vmatprep.subr.mxu1 %v1415_v22 }
 0x7eb   :  { %v943_v34 = vadd.f32 %v942_v33, %v941_v32  ;;  %v1412_v32 = vld [vmem:[#allocation5 + $0x288] sm:$0xff] }
 0x7ed   :  { %v944_v35 = vrot.slane %v943_v34, 1 }
 0x7ef   :  { %v945_v36 = vadd.f32 %v944_v35, %v943_v34  ;;  %v1396_v35 = vld [vmem:[#allocation5 + $0x208] sm:$0xff] }
 0x7f1   :  { %v946_v37 = vmul.f32 0.0625, %v945_v36  ;;  %v1411_v36 = vld [vmem:[#allocation5 + $0x280] sm:$0xff] }
 0x7f3   :  { %v947_v38 = vadd.f32 1e-05, %v946_v37  ;;  %v1395_v37 = vld [vmem:[#allocation5 + $0x200] sm:$0xff] }
 0x7f5   :  { %3174 = vrsqrt.f32 %v947_v38 }
 0x802   :  { %v3175_v39 = vpop.eup %3174 }
 0x803   :  { %v949_v41 = vmul.f32 %v3175_v39, %v933_v24  ;;  %v950_v42 = vmul.f32 %v3175_v39, %v934_v25  ;;  %v1399_v24 = vld [vmem:[#allocation5 + $0x220] sm:$0xff]  ;;  %v1414_v25 = vld [vmem:[#allocation5 + $0x298] sm:$0xff] }
 0x804   :  { %2874 = vmatpush3.msra.mxu1 %v1399_v24 }
 0x805   :  { %v956_v44 = vmul.f32 %v2770_v40, %v950_v42  ;;  %v955_v45 = vmul.f32 %v2770_v40, %v949_v41  ;;  %2875 = vmatprep.subr.mxu1 %v1414_v25  ;;  %v1410_v40 = vld [vmem:[#allocation5 + $0x278] sm:$0xff]  ;;  %v1409_v42 = vld [vmem:[#allocation5 + $0x270] sm:$0xff] }
 0x806   :  { %2876 = vmatpush3.msra.mxu1 %v1398_v26  ;;  %v1394_v41 = vld [vmem:[#allocation5 + $0x1f8] sm:$0xff] }
 0x807   :  { %v962_v46 = vadd.f32 %v2771_v43, %v956_v44  ;;  %v961_v47 = vadd.f32 %v2771_v43, %v955_v45  ;;  %2877 = vmatprep.subr.mxu1 %v1413_v30  ;;  %v1393_v43 = vld [vmem:[#allocation5 + $0x1f0] sm:$0xff]  ;;  %v1408_v44 = vld [vmem:[#allocation5 + $0x268] sm:$0xff] }
 0x808   :  { %2878 = vmatpush3.msra.mxu1 %v1397_v31  ;;  %v1392_v45 = vld [vmem:[#allocation5 + $0x1e8] sm:$0xff] }
 0x809   :  { %v964_v48 = vmax.f32 %v962_v46, 0.0  ;;  %v963_v49 = vmax.f32 %v961_v47, 0.0  ;;  %2879 = vmatprep.subr.mxu1 %v1412_v32 }
 0x80a   :  { %2880 = vmatpush3.msra.mxu1 %v1396_v35 }
 0x80b   :  { %3062 = vmatprep.subr.mxu0 %v964_v48  ;;  %2881 = vmatprep.subr.mxu1 %v1411_v36 }
 0x80c   :  { %3063 = vmatpush3.msra.mxu0 %v964_v48  ;;  %2882 = vmatpush3.msra.mxu1 %v1395_v37 }
 0x80d   :  { %3064 = vmatprep.subr.mxu0 %v963_v49  ;;  %2883 = vmatprep.subr.mxu1 %v1410_v40 }
 0x80e   :  { %3065 = vmatpush3.msra.mxu0 %v963_v49  ;;  %2884 = vmatpush3.msra.mxu1 %v1394_v41 }
 0x80f   :  { %3067 = vmatmul.mubr.msk.f32.vlgmr.msra.gmra.mxu0 %vm969_vm8, %v966_v50  ;;  %2885 = vmatprep.subr.mxu1 %v1409_v42 }
 0x810   :  { %3069 = vmatprep.mubr.msk.f32.mxu0 %vm969_vm8, %v967_v51  ;;  %2886 = vmatpush3.msra.mxu1 %v1393_v43 }
 0x811   :  { %2887 = vmatprep.subr.mxu1 %v1408_v44 }
 0x812   :  { %2888 = vmatpush3.msra.mxu1 %v1392_v45 }
 0x813   :  { %3070 = vmatmul.mubr.msk.f32.gmra.mxu0 %vm969_vm8, %v968_v52  ;;  %vm1089_vm8 = vcmask 130112  }
 0x8cf   :  { %v3421_v53 = vpop.f32.mrf.mxu0 }
 0x8d0   :  { %1311 = vst.msk [vmem:[#allocation2 + $0x8] sm:$0xff] %vm44_vm1, %v3421_v53  ;;  %1172 = vrot.lane.b32.xlu0 %v3421_v53, %s3252_s24  ;;  %1118 = vrot.lane.b32.xlu1 %v3421_v53, %s3251_s23  ;;  %v1079_v60 = vrot.slane %v3421_v53, 2  ;;  %v1092_v62 = vrot.slane %v3421_v53, 4  ;;  %v1105_v1 = vrot.slane %v3421_v53, 6 }
 0x8d1   :  { %v1048_v54 = vpop.f32.mrf.mxu0 }
 0x8d2   :  { %1075 = vst.msk [vmem:[#allocation2 + $0x30] sm:$0xff] %vm44_vm1, %v1048_v54  ;;  %v1078_v57 = vrot.slane %v1048_v54, 2  ;;  %v1091_v58 = vrot.slane %v1048_v54, 4  ;;  %v1104_v59 = vrot.slane %v1048_v54, 6 }
 0x8d3   :  { %v3071_v55 = vpop.f32.mrf.mxu0 }
 0x8d4   :  { %1313 = vst.msk [vmem:[#allocation2 + $0x28] sm:$0xff] %vm44_vm1, %v3071_v55  ;;  %1242 = vrot.lane.b32.xlu1 %v3421_v53, %s3253_s25  ;;  %1170 = vrot.lane.b32.xlu0 %v1048_v54, %s3252_s24  ;;  %v1080_v61 = vsel %vm4328_vm5, %v1078_v57, %v1079_v60  ;;  %v1093_v63 = vsel %vm4327_vm9, %v1091_v58, %v1092_v62  ;;  %v3473_v3 = vrot.slane %v3071_v55, 2  ;;  %v3478_v4 = vrot.slane %v3071_v55, 4 }
 0x8d5   :  { %v3434_v56 = vpop.f32.mrf.mxu0  ;;  %v1106_v2 = vsel %vm4326_vm3, %v1104_v59, %v1105_v1  ;;  %v3483_v9 = vrot.slane %v3071_v55, 6 }
 0x8d6   :  { %1312 = vst.msk [vmem:[#allocation2 + $0x18] sm:$0xff] %vm44_vm1, %v3434_v56  ;;  %v1140_v0 = vrot.slane %v3434_v56, 4  ;;  %v1125_v23 = vrot.slane %v3434_v56, 2  ;;  %v1155_v29 = vrot.slane %v3434_v56, 6  ;;  %vm1136_vm1 = vcmask 392518  }
 0x8d8   :  { %1116 = vrot.lane.b32.xlu1 %v1048_v54, %s3251_s23  ;;  %1127 = vrot.lane.b32.xlu0 %v1078_v57, %s3259_s3  ;;  %v1141_v27 = vsel %vm4327_vm9, %v1092_v62, %v1140_v0  ;;  %v1126_v28 = vsel %vm4328_vm5, %v1079_v60, %v1125_v23  ;;  %v1156_v33 = vsel %vm4326_vm3, %v1105_v1, %v1155_v29 }
 0x8d9   :  { %v1203_v34 = vsel %vm4327_vm9, %v1140_v0, %v3478_v4  ;;  %v1184_v38 = vsel %vm4328_vm5, %v1125_v23, %v3473_v3  ;;  %v1222_v39 = vsel %vm4326_vm3, %v1155_v29, %v3483_v9  ;;  %vm1235_vm3 = vcmask 786114   ;;  %v3579_v23 = vld [vmem:[#allocation2 + $0x38] sm:$0xff] }
 0x8da   :  { %vm1252_vm9 = vcmask 851712   ;;  %vm4346_vm5 = vcmask 326912  }
 0x8dc   :  { %1240 = vrot.lane.b32.xlu1 %v1048_v54, %s3253_s25  ;;  %1142 = vrot.lane.b32.xlu0 %v1091_v58, %s3248_s1 }
 0x8e0   :  { %1157 = vrot.lane.b32.xlu0 %v1104_v59, %s3254_s26  ;;  %1081 = vrot.lane.b32.xlu1 %v1078_v57, %s3244_s18 }
 0x8e4   :  { %1185 = vrot.lane.b32.xlu1 %v1078_v57, %s3257_s29  ;;  %1355 = vrot.lane.b32.xlu0 %v3071_v55, %s3251_s23 }
 0x8e8   :  { %1094 = vrot.lane.b32.xlu1 %v1091_v58, %s3249_s21  ;;  %1083 = vrot.lane.b32.xlu0 %v1080_v61, %s3244_s18 }
 0x8ec   :  { %1204 = vrot.lane.b32.xlu1 %v1091_v58, %s3250_s22  ;;  %1187 = vrot.lane.b32.xlu0 %v1080_v61, %s3257_s29 }
 0x8f0   :  { %1107 = vrot.lane.b32.xlu1 %v1104_v59, %s3256_s28  ;;  %1096 = vrot.lane.b32.xlu0 %v1093_v63, %s3249_s21 }
 0x8f4   :  { %1223 = vrot.lane.b32.xlu1 %v1104_v59, %s3255_s27  ;;  %1206 = vrot.lane.b32.xlu0 %v1093_v63, %s3250_s22 }
 0x8f8   :  { %1109 = vrot.lane.b32.xlu0 %v1106_v2, %s3256_s28  ;;  %1388 = vrot.lane.b32.xlu1 %v3071_v55, %s3252_s24 }
 0x8fc   :  { %1225 = vrot.lane.b32.xlu0 %v1106_v2, %s3255_s27  ;;  %1246 = vrot.lane.b32.xlu1 %v3071_v55, %s3253_s25 }
 0x900   :  { %1129 = vrot.lane.b32.xlu1 %v1080_v61, %s3259_s3  ;;  %1353 = vrot.lane.b32.xlu0 %v3434_v56, %s3251_s23 }
 0x904   :  { %1257 = vrot.lane.b32.xlu1 %v1080_v61, %s3258_s30  ;;  %1363 = vrot.lane.b32.xlu0 %v3473_v3, %s3259_s3 }
 0x908   :  { %1144 = vrot.lane.b32.xlu1 %v1093_v63, %s3248_s1  ;;  %1372 = vrot.lane.b32.xlu0 %v3478_v4, %s3248_s1 }
 0x90c   :  { %1275 = vrot.lane.b32.xlu1 %v1093_v63, %s3260_s4  ;;  %1381 = vrot.lane.b32.xlu0 %v3483_v9, %s3254_s26 }
 0x910   :  { %1159 = vrot.lane.b32.xlu1 %v1106_v2, %s3254_s26  ;;  %1174 = vrot.lane.b32.xlu0 %v3434_v56, %s3252_s24 }
 0x914   :  { %1293 = vrot.lane.b32.xlu1 %v1106_v2, %s3261_s5  ;;  %1318 = vrot.lane.b32.xlu0 %v3473_v3, %s3244_s18 }
 0x918   :  { %1244 = vrot.lane.b32.xlu1 %v3434_v56, %s3253_s25  ;;  %1344 = vrot.lane.b32.xlu0 %v3483_v9, %s3256_s28 }
 0x91c   :  { %1331 = vrot.lane.b32.xlu1 %v3478_v4, %s3249_s21  ;;  %1263 = vrot.lane.b32.xlu0 %v3473_v3, %s3258_s30 }
 0x920   :  { %1327 = vrot.lane.b32.xlu0 %v1141_v27, %s3249_s21  ;;  %1314 = vrot.lane.b32.xlu1 %v1126_v28, %s3244_s18 }
 0x924   :  { %1340 = vrot.lane.b32.xlu0 %v1156_v33, %s3256_s28  ;;  %1370 = vrot.lane.b32.xlu1 %v1203_v34, %s3248_s1 }
 0x928   :  { %1361 = vrot.lane.b32.xlu0 %v1184_v38, %s3259_s3  ;;  %1379 = vrot.lane.b32.xlu1 %v1222_v39, %s3254_s26 }
 0x92c   :  { %1316 = vrot.lane.b32.xlu0 %v1184_v38, %s3244_s18  ;;  %1131 = vrot.lane.b32.xlu1 %v1126_v28, %s3259_s3 }
 0x930   :  { %1329 = vrot.lane.b32.xlu0 %v1203_v34, %s3249_s21  ;;  %1259 = vrot.lane.b32.xlu1 %v1126_v28, %s3258_s30 }
 0x934   :  { %1342 = vrot.lane.b32.xlu0 %v1222_v39, %s3256_s28  ;;  %1146 = vrot.lane.b32.xlu1 %v1141_v27, %s3248_s1 }
 0x938   :  { %1189 = vrot.lane.b32.xlu0 %v1126_v28, %s3257_s29  ;;  %1277 = vrot.lane.b32.xlu1 %v1141_v27, %s3260_s4 }
 0x93c   :  { %1208 = vrot.lane.b32.xlu0 %v1141_v27, %s3250_s22  ;;  %1161 = vrot.lane.b32.xlu1 %v1156_v33, %s3254_s26 }
 0x940   :  { %1227 = vrot.lane.b32.xlu0 %v1156_v33, %s3255_s27  ;;  %1295 = vrot.lane.b32.xlu1 %v1156_v33, %s3261_s5 }
 0x942   :  { %v3538_v46 = vpop.permute.xlu0 %1172  ;;  %v1119_v47 = vpop.permute.xlu1 %1118 }
 0x944   :  { %1261 = vrot.lane.b32.xlu0 %v1184_v38, %s3258_s30  ;;  %1191 = vrot.lane.b32.xlu1 %v1184_v38, %s3257_s29 }
 0x946   :  { %v1243_v48 = vpop.permute.xlu1 %1242  ;;  %v1171_v49 = vpop.permute.xlu0 %1170 }
 0x948   :  { %1210 = vrot.lane.b32.xlu0 %v1203_v34, %s3250_s22  ;;  %1279 = vrot.lane.b32.xlu1 %v1203_v34, %s3260_s4 }
 0x94a   :  { %v1117_v50 = vpop.permute.xlu1 %1116  ;;  %v1128_v51 = vpop.permute.xlu0 %1127 }
 0x94b   :  { %1137 = vst.msk [vmem:[#allocation2 + $0x10] sm:$0xc0] %vm1136_vm1, %v1128_v51  ;;  %vm1216_vm1 = vcmask 720516  }
 0x94c   :  { %1297 = vrot.lane.b32.xlu0 %v1222_v39, %s3261_s5  ;;  %1229 = vrot.lane.b32.xlu1 %v1222_v39, %s3255_s27 }
 0x94e   :  { %v1241_v52 = vpop.permute.xlu1 %1240  ;;  %v1143_v53 = vpop.permute.xlu0 %1142 }
 0x94f   :  { %1152 = vst.msk [vmem:[#allocation2 + $0x10] sm:$0xf0] %vm1151_vm10, %v1143_v53  ;;  %vm4341_vm10 = vcmask 654912  }
 0x950   :  { %1299 = vrot.lane.b32.xlu0 %v3483_v9, %s3261_s5  ;;  %1281 = vrot.lane.b32.xlu1 %v3478_v4, %s3260_s4 }
 0x952   :  { %v1158_v54 = vpop.permute.xlu0 %1157  ;;  %v1082_v55 = vpop.permute.xlu1 %1081 }
 0x953   :  { %1167 = vst.msk [vmem:[#allocation2 + $0x10] sm:$0xfc] %vm1166_vm15, %v1158_v54  ;;  %vm1113_vm15 = vcmask 261314  }
 0x954   :  { %1088 = vst.msk [vmem:[#allocation2 + $0x20] sm:$0xc0] %vm1087_vm0, %v1082_v55  ;;  %vm1102_vm0 = vcmask 195712  }
 0x955   :  { %1179 = vst.msk [vmem:[#allocation2 + $0x10] sm:$0xff] %vm779_vm14, %v1171_v49 }
 0x956   :  { %v1186_v56 = vpop.permute.xlu1 %1185  ;;  %v3551_v57 = vpop.permute.xlu0 %1355 }
 0x957   :  { %1198 = vst.msk [vmem:[#allocation2] sm:$0xc0] %vm1197_vm2, %v1186_v56  ;;  %vm4342_vm2 = vcmask 326912   ;;  %v1586_v56 = vld [vmem:[#allocation5 + $0x2f0] sm:$0xff] }
 0x95a   :  { %v1095_v58 = vpop.permute.xlu1 %1094  ;;  %v1084_v59 = vpop.permute.xlu0 %1083 }
 0x95b   :  { %1101 = vst.msk [vmem:[#allocation2 + $0x20] sm:$0xf0] %vm1100_vm11, %v1095_v58  ;;  %vm4343_vm11 = vcmask 261312  }
 0x95c   :  { %1090 = vst.msk [vmem:[#allocation2 + $0x30] sm:$0xff] %vm1089_vm8, %v1084_v59 }
 0x95e   :  { %v1205_v60 = vpop.permute.xlu1 %1204  ;;  %v1188_v61 = vpop.permute.xlu0 %1187 }
 0x95f   :  { %1217 = vst.msk [vmem:[#allocation2] sm:$0xf0] %vm1216_vm1, %v1205_v60  ;;  %vm4344_vm1 = vmmov %vm4342_vm2 }
 0x960   :  { %1199 = vst.msk [vmem:[#allocation2 + $0x10] sm:$0xff] %vm4341_vm10, %v1188_v61  ;;  %vm1287_vm10 = vcmask 982912  }
 0x962   :  { %v1108_v62 = vpop.permute.xlu1 %1107  ;;  %v1097_v63 = vpop.permute.xlu0 %1096 }
 0x963   :  { %1114 = vst.msk [vmem:[#allocation2 + $0x20] sm:$0xfc] %vm1113_vm15, %v1108_v62  ;;  %vm1305_vm15 = vcmask 1048512  }
 0x964   :  { %1103 = vst.msk [vmem:[#allocation2 + $0x30] sm:$0xff] %vm1102_vm0, %v1097_v63 }
 0x965   :  { %1122 = vst.msk [vmem:[#allocation2 + $0x20] sm:$0xff] %vm4342_vm2, %v1117_v50  ;;  %vm1325_vm2 = vcmask 128064  }
 0x966   :  { %v1224_v1 = vpop.permute.xlu1 %1223  ;;  %v1207_v2 = vpop.permute.xlu0 %1206 }
 0x967   :  { %1236 = vst.msk [vmem:[#allocation2] sm:$0xfc] %vm1235_vm3, %v1224_v1  ;;  %vm1269_vm3 = vcmask 917312   ;;  %v2776_v1 = vld [vmem:[#allocation5 + $0x2e8] ss:$0 sm:$0xff] }
 0x968   :  { %1218 = vst.msk [vmem:[#allocation2 + $0x10] sm:$0xff] %vm799_vm6, %v1207_v2 }
 0x969   :  { %1253 = vst.msk [vmem:[#allocation2] sm:$0xff] %vm1252_vm9, %v1241_v52 }
 0x96a   :  { %v1110_v3 = vpop.permute.xlu0 %1109  ;;  %v1389_v4 = vpop.permute.xlu1 %1388 }
 0x96b   :  { %1115 = vst.msk [vmem:[#allocation2 + $0x30] sm:$0xff] %vm4343_vm11, %v1110_v3  ;;  %vm1338_vm11 = vcmask 191616  }
 0x96c   :  { %1123 = vst.msk [vmem:[#allocation2 + $0x30] sm:$0xff] %vm4344_vm1, %v1119_v47  ;;  %vm1351_vm1 = vcmask 255168  }
 0x96e   :  { %v1226_v5 = vpop.permute.xlu0 %1225  ;;  %v3561_v6 = vpop.permute.xlu1 %1246 }
 0x96f   :  { %1237 = vst.msk [vmem:[#allocation2 + $0x10] sm:$0xff] %vm806_vm7, %v1226_v5 }
 0x970   :  { %1254 = vst.msk [vmem:[#allocation2 + $0x10] sm:$0xff] %vm1252_vm9, %v1243_v48 }
 0x972   :  { %v1130_v7 = vpop.permute.xlu1 %1129  ;;  %v1354_v8 = vpop.permute.xlu0 %1353 }
 0x973   :  { %1138 = vst.msk [vmem:[#allocation2 + $0x20] sm:$0xff] %vm750_vm4, %v1130_v7 }
 0x976   :  { %v1258_v9 = vpop.permute.xlu1 %1257  ;;  %v3566_v10 = vpop.permute.xlu0 %1363 }
 0x977   :  { %1270 = vst.msk [vmem:[#allocation2] sm:$0xff] %vm1269_vm3, %v1258_v9 }
 0x97a   :  { %v1145_v11 = vpop.permute.xlu1 %1144  ;;  %v1373_v12 = vpop.permute.xlu0 %1372 }
 0x97b   :  { %1153 = vst.msk [vmem:[#allocation2 + $0x20] sm:$0xff] %vm762_vm13, %v1145_v11 }
 0x97e   :  { %v1276_v13 = vpop.permute.xlu1 %1275  ;;  %v1382_v14 = vpop.permute.xlu0 %1381 }
 0x97f   :  { %1288 = vst.msk [vmem:[#allocation2] sm:$0xff] %vm1287_vm10, %v1276_v13 }
 0x982   :  { %v1160_v15 = vpop.permute.xlu1 %1159  ;;  %v3571_v16 = vpop.permute.xlu0 %1174 }
 0x983   :  { %1168 = vst.msk [vmem:[#allocation2 + $0x20] sm:$0xff] %vm770_vm12, %v1160_v15 }
 0x984   :  { %1180 = vst.msk [vmem:[#allocation2 + $0x20] sm:$0xff] %vm779_vm14, %v3538_v46 }
 0x986   :  { %v1294_v17 = vpop.permute.xlu1 %1293  ;;  %v1319_v18 = vpop.permute.xlu0 %1318 }
 0x987   :  { %1306 = vst.msk [vmem:[#allocation2] sm:$0xff] %vm1305_vm15, %v1294_v17 }
 0x988   :  { %1326 = vst.msk [vmem:[#allocation2 + $0x28] sm:$0x3f] %vm1325_vm2, %v1319_v18  ;;  %vm4345_vm2 = vcmask 261312  }
 0x98a   :  { %v1245_v19 = vpop.permute.xlu1 %1244  ;;  %v1345_v20 = vpop.permute.xlu0 %1344 }
 0x98e   :  { %v1332_v21 = vpop.permute.xlu1 %1331  ;;  %v3577_v22 = vpop.permute.xlu0 %1263  ;;  %v1424_v0 = vld [vmem:[#allocation2] sm:$0xff] }
 0x98f   :  { %1339 = vst.msk [vmem:[#allocation2 + $0x28] sm:$0xf] %vm1338_vm11, %v1332_v21  ;;  %1724 = vst [vmem:[#allocation2] sm:$0xff] %v3579_v23  ;;  %vm1377_vm11 = vcmask 454016  }
 0x990   :  { %1352 = vst.msk [vmem:[#allocation2 + $0x28] sm:$0x3] %vm1351_vm1, %v1345_v20  ;;  %vm4347_vm1 = vmmov %vm4345_vm2 }
 0x992   :  { %v1328_v24 = vpop.permute.xlu0 %1327  ;;  %v1315_v25 = vpop.permute.xlu1 %1314 }
 0x993   :  { %1323 = vst.msk [vmem:[#allocation2 + $0x8] sm:$0xff] %vm1089_vm8, %v1315_v25 }
 0x994   :  { %1336 = vst.msk [vmem:[#allocation2 + $0x8] sm:$0xff] %vm1102_vm0, %v1328_v24 }
 0x996   :  { %v1341_v26 = vpop.permute.xlu0 %1340  ;;  %v1371_v27 = vpop.permute.xlu1 %1370 }
 0x997   :  { %1349 = vst.msk [vmem:[#allocation2 + $0x8] sm:$0xff] %vm4345_vm2, %v1341_v26  ;;  %v1429_v49 = vld [vmem:[#allocation2 + $0x28] sm:$0xff] }
 0x998   :  { %1359 = vst.msk [vmem:[#allocation2 + $0x8] sm:$0xff] %vm4346_vm5, %v1354_v8  ;;  %vm1368_vm5 = vcmask 390464  }
 0x99a   :  { %v1362_v28 = vpop.permute.xlu0 %1361  ;;  %v1380_v29 = vpop.permute.xlu1 %1379 }
 0x99b   :  { %1367 = vst.msk [vmem:[#allocation2 + $0x8] sm:$0xff] %vm750_vm4, %v1362_v28 }
 0x99c   :  { %1376 = vst.msk [vmem:[#allocation2 + $0x8] sm:$0xff] %vm762_vm13, %v1371_v27 }
 0x99d   :  { %1385 = vst.msk [vmem:[#allocation2 + $0x8] sm:$0xff] %vm770_vm12, %v1380_v29 }
 0x99e   :  { %1391 = vst.msk [vmem:[#allocation2 + $0x8] sm:$0xff] %vm779_vm14, %v1389_v4  ;;  %v1317_v30 = vpop.permute.xlu0 %1316  ;;  %v1132_v31 = vpop.permute.xlu1 %1131 }
 0x99f   :  { %1324 = vst.msk [vmem:[#allocation2 + $0x18] sm:$0xff] %vm1089_vm8, %v1317_v30  ;;  %vm1386_vm8 = vcmask 517568  }
 0x9a0   :  { %1139 = vst.msk [vmem:[#allocation2 + $0x30] sm:$0xff] %vm750_vm4, %v1132_v31  ;;  %vm4348_vm4 = vcmask 326912  }
 0x9a2   :  { %v1330_v32 = vpop.permute.xlu0 %1329  ;;  %v1260_v33 = vpop.permute.xlu1 %1259 }
 0x9a3   :  { %1337 = vst.msk [vmem:[#allocation2 + $0x18] sm:$0xff] %vm1102_vm0, %v1330_v32  ;;  %vm4349_vm0 = vcmask 654912  }
 0x9a4   :  { %1271 = vst.msk [vmem:[#allocation2 + $0x10] sm:$0xff] %vm1269_vm3, %v1260_v33 }
 0x9a5   :  { %v1425_v34 = vld [vmem:[#allocation2 + $0x8] sm:$0xff] }
 0x9a6   :  { %v1343_v35 = vpop.permute.xlu0 %1342  ;;  %1501 = vmatprep.mubr.f32.mxu1 %v1425_v34  ;;  %v1147_v36 = vpop.permute.xlu1 %1146 }
 0x9a7   :  { %1350 = vst.msk [vmem:[#allocation2 + $0x18] sm:$0xff] %vm4347_vm1, %v1343_v35  ;;  %1502 = vmatmul.mubr.f32.vlgmr.msra.gmra.mxu1 %v1424_v0 }
 0x9a8   :  { %1154 = vst.msk [vmem:[#allocation2 + $0x30] sm:$0xff] %vm762_vm13, %v1147_v36  ;;  %vm4350_vm13 = vmmov %vm4349_vm0 }
 0x9a9   :  { %1360 = vst.msk [vmem:[#allocation2 + $0x18] sm:$0xff] %vm4348_vm4, %v3551_v57 }
 0x9aa   :  { %1369 = vst.msk [vmem:[#allocation2 + $0x18] sm:$0x3f] %vm1368_vm5, %v3566_v10  ;;  %v1190_v37 = vpop.permute.xlu0 %1189  ;;  %v1278_v38 = vpop.permute.xlu1 %1277 }
 0x9ab   :  { %1378 = vst.msk [vmem:[#allocation2 + $0x18] sm:$0xf] %vm1377_vm11, %v1373_v12 }
 0x9ac   :  { %1387 = vst.msk [vmem:[#allocation2 + $0x18] sm:$0x3] %vm1386_vm8, %v1382_v14 }
 0x9ad   :  { %1200 = vst.msk [vmem:[#allocation2 + $0x20] sm:$0xff] %vm4349_vm0, %v1190_v37 }
 0x9ae   :  { %1289 = vst.msk [vmem:[#allocation2 + $0x10] sm:$0xff] %vm1287_vm10, %v1278_v38  ;;  %v1209_v39 = vpop.permute.xlu0 %1208  ;;  %v1162_v40 = vpop.permute.xlu1 %1161 }
 0x9af   :  { %1219 = vst.msk [vmem:[#allocation2 + $0x20] sm:$0xff] %vm799_vm6, %v1209_v39 }
 0x9b0   :  { %1169 = vst.msk [vmem:[#allocation2 + $0x30] sm:$0xff] %vm770_vm12, %v1162_v40  ;;  %vm1273_vm12 = vcmask 915264  }
 0x9b1   :  { %1181 = vst.msk [vmem:[#allocation2 + $0x30] sm:$0xff] %vm779_vm14, %v3571_v16  ;;  %vm1291_vm14 = vcmask 978816  }
 0x9b2   :  { %v1228_v41 = vpop.permute.xlu0 %1227  ;;  %v1296_v42 = vpop.permute.xlu1 %1295 }
 0x9b3   :  { %v1427_v43 = vld [vmem:[#allocation2 + $0x18] sm:$0xff]  ;;  %1238 = vst.msk [vmem:[#allocation2 + $0x20] sm:$0xff] %vm806_vm7, %v1228_v41 }
 0x9b4   :  { %1307 = vst.msk [vmem:[#allocation2 + $0x10] sm:$0xff] %vm1305_vm15, %v1296_v42  ;;  %1506 = vmatprep.mubr.f32.mxu1 %v1427_v43 }
 0x9b5   :  { %1255 = vst.msk [vmem:[#allocation2 + $0x20] sm:$0xff] %vm1252_vm9, %v1245_v19 }
 0x9b6   :  { %v1262_v44 = vpop.permute.xlu0 %1261  ;;  %v1192_v45 = vpop.permute.xlu1 %1191 }
 0x9b7   :  { %1272 = vst.msk [vmem:[#allocation2 + $0x20] sm:$0xff] %vm1269_vm3, %v1262_v44 }
 0x9b8   :  { %1201 = vst.msk [vmem:[#allocation2 + $0x30] sm:$0xff] %vm4350_vm13, %v1192_v45 }
 0x9ba   :  { %v1211_v46 = vpop.permute.xlu0 %1210  ;;  %v1280_v47 = vpop.permute.xlu1 %1279 }
 0x9bb   :  { %v1426_v48 = vld [vmem:[#allocation2 + $0x10] sm:$0xff]  ;;  %1220 = vst.msk [vmem:[#allocation2 + $0x30] sm:$0xff] %vm799_vm6, %v1211_v46  ;;  %vm1309_vm6 = vcmask 1042368  }
 0x9bc   :  { %1290 = vst.msk [vmem:[#allocation2 + $0x20] sm:$0xff] %vm1287_vm10, %v1280_v47  ;;  %1507 = vmatmul.mubr.f32.gmra.mxu1 %v1426_v48  ;;  %1725 = vst [vmem:[#allocation2 + $0x10] sm:$0xff] %v3579_v23  ;;  %v2777_v48 = vld [vmem:[#allocation5 + $0x2e9] ss:$0 sm:$0xff] }
 0x9bd   :  { %1511 = vmatprep.mubr.f32.mxu1 %v1429_v49 }
 0x9be   :  { %v1298_v50 = vpop.permute.xlu0 %1297  ;;  %v1230_v51 = vpop.permute.xlu1 %1229 }
 0x9bf   :  { %1308 = vst.msk [vmem:[#allocation2 + $0x20] sm:$0xff] %vm1305_vm15, %v1298_v50 }
 0x9c0   :  { %1239 = vst.msk [vmem:[#allocation2 + $0x30] sm:$0xff] %vm806_vm7, %v1230_v51  ;;  %vm4351_vm7 = vcmask 31744  }
 0x9c1   :  { %1256 = vst.msk [vmem:[#allocation2 + $0x30] sm:$0xff] %vm1252_vm9, %v3561_v6  ;;  %vm1594_vm9 = vcmask 261120   ;;  %vm4352_vm3 = vmmov %vm4351_vm7 }
 0x9c2   :  { %1274 = vst.msk [vmem:[#allocation2 + $0x30] sm:$0x3f] %vm1273_vm12, %v3577_v22  ;;  %v1300_v52 = vpop.permute.xlu0 %1299  ;;  %v1282_v53 = vpop.permute.xlu1 %1281  ;;  %3080 = vmatprep.mubr.msk.f32.mxu0 %vm1594_vm9, %v1586_v56  ;;  %vm4353_vm10 = vmmov %vm4352_vm3 }
 0x9c3   :  { %1292 = vst.msk [vmem:[#allocation2 + $0x30] sm:$0xf] %vm1291_vm14, %v1282_v53  ;;  %vm4354_vm15 = vmmov %vm4352_vm3  ;;  %v2778_v53 = vld [vmem:[#allocation5 + $0x2ea] ss:$0 sm:$0xff]  ;;  %vm4364_vm14 = vcmask 1045504  }
 0x9c4   :  { %1310 = vst.msk [vmem:[#allocation2 + $0x30] sm:$0x3] %vm1309_vm6, %v1300_v52  ;;  %vm4355_vm2 = vmmov %vm4352_vm3  ;;  %vm4365_vm6 = vcmask 1043456  }
 0x9c5   :  { %vm4356_vm5 = vmmov %vm4355_vm2 }
 0x9c6   :  { %v1428_v54 = vld [vmem:[#allocation2 + $0x20] sm:$0xff]  ;;  %vm4357_vm11 = vmmov %vm4355_vm2 }
 0x9c7   :  { %1512 = vmatmul.mubr.f32.gmra.mxu1 %v1428_v54  ;;  %1726 = vst [vmem:[#allocation2 + $0x20] sm:$0xff] %v3579_v23  ;;  %vm4358_vm1 = vmmov %vm4355_vm2 }
 0x9c8   :  { %1516 = vmatprep.mubr.f32.mxu1 %v3579_v23  ;;  %vm4359_vm8 = vmmov %vm4358_vm1 }
 0x9c9   :  { %vm4360_vm4 = vmmov %vm4358_vm1 }
 0x9ca   :  { %vm4361_vm0 = vmmov %vm4358_vm1 }
 0x9cb   :  { %v1430_v55 = vld [vmem:[#allocation2 + $0x30] sm:$0xff]  ;;  %vm4362_vm13 = vmmov %vm4361_vm0 }
 0x9cc   :  { %1517 = vmatmul.mubr.f32.gmra.mxu1 %v1430_v55  ;;  %1727 = vst [vmem:[#allocation2 + $0x30] sm:$0xff] %v3579_v23  ;;  %vm4363_vm12 = vmmov %vm4361_vm0 }
 0xa67   :  { %v2889_v57 = vpop.f32.mrf.mxu1 }
 0xa69   :  { %v2890_v58 = vpop.f32.mrf.mxu1 }
 0xa6a   :  { %v2891_v62 = vadd.f32 %v2890_v58, %v2889_v57 }
 0xa6c   :  { %v1504_v5 = vadd.f32 %v2891_v62, %v2776_v1 }
 0xa6e   :  { %v1524_v10 = vsel %vm4352_vm3, %v1504_v5, 0.0  ;;  %vm4368_vm3 = vmmov %vm4365_vm6 }
 0xa7c   :  { %v2892_v59 = vpop.f32.mrf.mxu1 }
 0xa7e   :  { %v2893_v60 = vpop.f32.mrf.mxu1 }
 0xa7f   :  { %v2894_v61 = vadd.f32 %v2893_v60, %v2892_v59 }
 0xa81   :  { %v1509_v2 = vadd.f32 %v2894_v61, %v2776_v1 }
 0xa83   :  { %v1525_v8 = vsel %vm4351_vm7, %v1509_v2, 0.0  ;;  %vm4367_vm7 = vmmov %vm4364_vm14 }
 0xa84   :  { %v1526_v13 = vadd.f32 %v1525_v8, %v1524_v10  ;;  %v1592_v8 = vld [vmem:[#allocation5 + $0x320] sm:$0xff] }
 0xa87   :  { %v2895_v63 = vpop.f32.mrf.mxu1 }
 0xa89   :  { %v2896_v3 = vpop.f32.mrf.mxu1 }
 0xa8a   :  { %v2897_v4 = vadd.f32 %v2896_v3, %v2895_v63  ;;  %v1587_v3 = vld [vmem:[#allocation5 + $0x2f8] sm:$0xff] }
 0xa8c   :  { %v1514_v6 = vadd.f32 %v2897_v4, %v2776_v1  ;;  %v2898_v7 = vpop.f32.mrf.mxu1  ;;  %v1588_v4 = vld [vmem:[#allocation5 + $0x300] sm:$0xff] }
 0xa8e   :  { %v2899_v9 = vpop.f32.mrf.mxu1  ;;  %v1527_v11 = vsel %vm4353_vm10, %v1514_v6, 0.0  ;;  %vm4369_vm10 = vmmov %vm4367_vm7 }
 0xa8f   :  { %v2900_v12 = vadd.f32 %v2899_v9, %v2898_v7  ;;  %v1528_v15 = vadd.f32 %v1527_v11, %v1526_v13  ;;  %v1591_v7 = vld [vmem:[#allocation5 + $0x318] sm:$0xff]  ;;  %v1593_v9 = vld [vmem:[#allocation5 + $0x328] sm:$0xff] }
 0xa91   :  { %v1519_v14 = vadd.f32 %v2900_v12, %v2776_v1 }
 0xa93   :  { %v1529_v16 = vsel %vm4354_vm15, %v1519_v14, 0.0 }
 0xa94   :  { %v1530_v17 = vadd.f32 %v1529_v16, %v1528_v15 }
 0xa96   :  { %v1531_v18 = vrot.slane %v1530_v17, 4 }
 0xa98   :  { %v1532_v19 = vadd.f32 %v1531_v18, %v1530_v17 }
 0xa9a   :  { %v1533_v20 = vrot.slane %v1532_v19, 2 }
 0xa9c   :  { %v1534_v21 = vadd.f32 %v1533_v20, %v1532_v19 }
 0xa9e   :  { %v1535_v22 = vrot.slane %v1534_v21, 1 }
 0xaa0   :  { %v1536_v0 = vadd.f32 %v1535_v22, %v1534_v21 }
 0xaa2   :  { %v1537_v23 = vmul.f32 0.03125, %v1536_v0 }
 0xaa4   :  { %v1538_v24 = vsub.f32 %v1504_v5, %v1537_v23  ;;  %v1539_v25 = vsub.f32 %v1509_v2, %v1537_v23  ;;  %v1540_v26 = vsub.f32 %v1514_v6, %v1537_v23  ;;  %v1541_v27 = vsub.f32 %v1519_v14, %v1537_v23  ;;  %v1589_v5 = vld [vmem:[#allocation5 + $0x308] sm:$0xff]  ;;  %v1590_v6 = vld [vmem:[#allocation5 + $0x310] sm:$0xff] }
 0xaa6   :  { %v1542_v28 = vmul.f32 %v1538_v24, %v1538_v24  ;;  %v1543_v29 = vmul.f32 %v1539_v25, %v1539_v25  ;;  %v1544_v30 = vmul.f32 %v1540_v26, %v1540_v26  ;;  %v1545_v31 = vmul.f32 %v1541_v27, %v1541_v27 }
 0xaa8   :  { %v1546_v32 = vsel %vm4355_vm2, %v1542_v28, 0.0  ;;  %v1547_v33 = vsel %vm4356_vm5, %v1543_v29, 0.0  ;;  %v1549_v35 = vsel %vm4357_vm11, %v1544_v30, 0.0  ;;  %v1551_v37 = vsel %vm4358_vm1, %v1545_v31, 0.0  ;;  %vm4371_vm2 = vmmov %vm4368_vm3 }
 0xaa9   :  { %v1548_v34 = vadd.f32 %v1547_v33, %v1546_v32  ;;  %vm1772_vm11 = vcmask 64550   ;;  %vm1809_vm1 = vcmask 97348  }
 0xaab   :  { %v1550_v36 = vadd.f32 %v1549_v35, %v1548_v34 }
 0xaad   :  { %v1552_v38 = vadd.f32 %v1551_v37, %v1550_v36 }
 0xaaf   :  { %v1553_v39 = vrot.slane %v1552_v38, 4 }
 0xab1   :  { %v1554_v40 = vadd.f32 %v1553_v39, %v1552_v38 }
 0xab3   :  { %v1555_v41 = vrot.slane %v1554_v40, 2 }
 0xab5   :  { %v1556_v42 = vadd.f32 %v1555_v41, %v1554_v40 }
 0xab7   :  { %v1557_v43 = vrot.slane %v1556_v42, 1 }
 0xab9   :  { %v1558_v44 = vadd.f32 %v1557_v43, %v1556_v42 }
 0xabb   :  { %v1559_v45 = vmul.f32 0.03125, %v1558_v44 }
 0xabd   :  { %v1560_v46 = vadd.f32 1e-05, %v1559_v45 }
 0xabf   :  { %3176 = vrsqrt.f32 %v1560_v46 }
 0xacc   :  { %v3177_v47 = vpop.eup %3176 }
 0xacd   :  { %v1565_v49 = vmul.f32 %v3177_v47, %v1541_v27  ;;  %v1564_v50 = vmul.f32 %v3177_v47, %v1540_v26  ;;  %v1563_v51 = vmul.f32 %v3177_v47, %v1539_v25  ;;  %v1562_v52 = vmul.f32 %v3177_v47, %v1538_v24 }
 0xacf   :  { %v1573_v54 = vmul.f32 %v2777_v48, %v1565_v49  ;;  %v1572_v55 = vmul.f32 %v2777_v48, %v1564_v50  ;;  %v1571_v56 = vmul.f32 %v2777_v48, %v1563_v51  ;;  %v1570_v59 = vmul.f32 %v2777_v48, %v1562_v52 }
 0xad1   :  { %v1581_v57 = vadd.f32 %v2778_v53, %v1573_v54  ;;  %v1580_v58 = vadd.f32 %v2778_v53, %v1572_v55  ;;  %v1579_v61 = vadd.f32 %v2778_v53, %v1571_v56  ;;  %v1578_v63 = vadd.f32 %v2778_v53, %v1570_v59 }
 0xad3   :  { %v1585_v60 = vmax.f32 %v1581_v57, 0.0  ;;  %v1584_v62 = vmax.f32 %v1580_v58, 0.0  ;;  %v1583_v1 = vmax.f32 %v1579_v61, 0.0  ;;  %v1582_v2 = vmax.f32 %v1578_v63, 0.0 }
 0xad5   :  { %3072 = vmatprep.subr.mxu0 %v1585_v60 }
 0xad6   :  { %3073 = vmatpush3.msra.mxu0 %v1585_v60 }
 0xad7   :  { %3074 = vmatprep.subr.mxu0 %v1584_v62 }
 0xad8   :  { %3075 = vmatpush3.msra.mxu0 %v1584_v62 }
 0xad9   :  { %3076 = vmatprep.subr.mxu0 %v1583_v1 }
 0xada   :  { %3077 = vmatpush3.msra.mxu0 %v1583_v1 }
 0xadb   :  { %3078 = vmatprep.subr.mxu0 %v1582_v2 }
 0xadc   :  { %3079 = vmatpush3.msra.mxu0 %v1582_v2 }
 0xadd   :  { %3081 = vmatmul.mubr.msk.f32.vlgmr.msra.gmra.mxu0 %vm1594_vm9, %v1587_v3 }
 0xade   :  { %3083 = vmatprep.mubr.msk.f32.mxu0 %vm1594_vm9, %v1588_v4 }
 0xae1   :  { %3084 = vmatmul.mubr.msk.f32.gmra.mxu0 %vm1594_vm9, %v1589_v5 }
 0xae2   :  { %3086 = vmatprep.mubr.msk.f32.mxu0 %vm1594_vm9, %v1590_v6 }
 0xae5   :  { %3087 = vmatmul.mubr.msk.f32.gmra.mxu0 %vm1594_vm9, %v1591_v7 }
 0xae6   :  { %3089 = vmatprep.mubr.msk.f32.mxu0 %vm1594_vm9, %v1592_v8 }
 0xae9   :  { %3090 = vmatmul.mubr.msk.f32.gmra.mxu0 %vm1594_vm9, %v1593_v9  ;;  %vm4366_vm9 = vcmask 1041408  }
 0xaea   :  { %vm4370_vm15 = vmmov %vm4366_vm9 }
 0xaeb   :  { %vm4372_vm5 = vmmov %vm4366_vm9 }
 0xb9d   :  { %v3637_v10 = vpop.f32.mrf.mxu0 }
 0xb9e   :  { %1733 = vst.msk [vmem:[#allocation2 + $0x40] sm:$0xff] %vm4359_vm8, %v3637_v10  ;;  %2116 = vrot.lane.b32.xlu1 %v3637_v10, %s3248_s1  ;;  %1856 = vrot.lane.b32.xlu0 %v3637_v10, %s3249_s21  ;;  %v1744_v19 = vrot.slane %v3637_v10, 2  ;;  %v1781_v20 = vrot.slane %v3637_v10, 4  ;;  %v1818_v0 = vrot.slane %v3637_v10, 6  ;;  %vm1903_vm8 = vcmask 195750  }
 0xb9f   :  { %v1685_v11 = vpop.f32.mrf.mxu0 }
 0xba0   :  { %1732 = vst.msk [vmem:[#allocation2 + $0x30] sm:$0xff] %vm4360_vm4, %v1685_v11  ;;  %v1743_v14 = vrot.slane %v1685_v11, 2  ;;  %v1780_v17 = vrot.slane %v1685_v11, 4  ;;  %v1817_v18 = vrot.slane %v1685_v11, 6  ;;  %vm2032_vm4 = vcmask 326950  }
 0xba1   :  { %v3646_v12 = vpop.f32.mrf.mxu0 }
 0xba2   :  { %1735 = vst.msk [vmem:[#allocation2 + $0x60] sm:$0xff] %vm4361_vm0, %v3646_v12  ;;  %1978 = vrot.lane.b32.xlu0 %v3637_v10, %s3251_s23  ;;  %1854 = vrot.lane.b32.xlu1 %v1685_v11, %s3249_s21  ;;  %v1745_v21 = vsel %vm4364_vm14, %v1743_v14, %v1744_v19  ;;  %v1782_v22 = vsel %vm4365_vm6, %v1780_v17, %v1781_v20  ;;  %v1748_v28 = vrot.slane %v3646_v12, 2  ;;  %v1785_v32 = vrot.slane %v3646_v12, 4 }
 0xba3   :  { %v3653_v13 = vpop.f32.mrf.mxu0  ;;  %v1819_v23 = vsel %vm4366_vm9, %v1817_v18, %v1818_v0  ;;  %v1822_v34 = vrot.slane %v3646_v12, 6  ;;  %vm1935_vm0 = vcmask 228548   ;;  %vm1967_vm14 = vcmask 261346  }
 0xba4   :  { %1734 = vst.msk [vmem:[#allocation2 + $0x50] sm:$0xff] %vm4362_vm13, %v3653_v13  ;;  %v1746_v24 = vrot.slane %v3653_v13, 2  ;;  %v1783_v26 = vrot.slane %v3653_v13, 4  ;;  %v1820_v29 = vrot.slane %v3653_v13, 6  ;;  %vm1846_vm13 = vcmask 130146  }
 0xba5   :  { %v3657_v15 = vpop.f32.mrf.mxu0  ;;  %vm1997_vm6 = vcmask 294144   ;;  %vm2068_vm9 = vcmask 359748  }
 0xba6   :  { %2249 = vrot.lane.b32.xlu0 %v3637_v10, %s3252_s24  ;;  %1754 = vrot.lane.b32.xlu1 %v1743_v14, %s3247_s0  ;;  %v1747_v25 = vsel %vm4367_vm7, %v1744_v19, %v1746_v24  ;;  %v3733_v27 = vsel %vm4368_vm3, %v1781_v20, %v1783_v26  ;;  %v3743_v30 = vsel %vm4369_vm10, %v1746_v24, %v1748_v28  ;;  %vm2104_vm7 = vcmask 392546  }
 0xba7   :  { %v3662_v16 = vpop.f32.mrf.mxu0  ;;  %v1821_v31 = vsel %vm4370_vm15, %v1818_v0, %v1820_v29  ;;  %v3757_v33 = vsel %vm4371_vm2, %v1783_v26, %v1785_v32  ;;  %v3769_v35 = vsel %vm4372_vm5, %v1820_v29, %v1822_v34  ;;  %vm4329_vm3 = vcmask 425344   ;;  %v2506_v26 = vld [vmem:[#allocation5 + $0x3a0] sm:$0xff]  ;;  %v2505_v29 = vld [vmem:[#allocation5 + $0x398] sm:$0xff] }
 0xba8   :  { %1736 = vst.msk [vmem:[#allocation2 + $0x70] sm:$0xff] %vm4363_vm12, %v3662_v16  ;;  %vm4331_vm12 = vcmask 162944   ;;  %vm1774_vm10 = vcmask 64544   ;;  %vm1811_vm15 = vcmask 97344   ;;  %vm4332_vm2 = vcmask 130144  }
 0xba9   :  { %vm1905_vm5 = vcmask 195744   ;;  %v3843_v62 = vpop.f32.mrf.mxu0  ;;  %v1750_v63 = vrot.slane %v3662_v16, 2  ;;  %v1787_v6 = vrot.slane %v3662_v16, 4  ;;  %v1824_v10 = vrot.slane %v3662_v16, 6 }
 0xbaa   :  { %1976 = vrot.lane.b32.xlu0 %v1685_v11, %s3251_s23  ;;  %1791 = vrot.lane.b32.xlu1 %v1780_v17, %s3244_s18 }
 0xbae   :  { %2114 = vrot.lane.b32.xlu0 %v1685_v11, %s3248_s1  ;;  %1914 = vrot.lane.b32.xlu1 %v1780_v17, %s3256_s28 }
 0xbb2   :  { %1882 = vrot.lane.b32.xlu0 %v1743_v14, %s3262_s6  ;;  %2008 = vrot.lane.b32.xlu1 %v1743_v14, %s3263_s7 }
 0xbb6   :  { %1828 = vrot.lane.b32.xlu0 %v1817_v18, %s3264_s8  ;;  %1860 = vrot.lane.b32.xlu1 %v3646_v12, %s3249_s21 }
 0xbba   :  { %1946 = vrot.lane.b32.xlu0 %v1817_v18, %s3265_s9  ;;  %2120 = vrot.lane.b32.xlu1 %v3646_v12, %s3248_s1 }
 0xbbe   :  { %2044 = vrot.lane.b32.xlu0 %v1780_v17, %s3259_s3  ;;  %2253 = vrot.lane.b32.xlu1 %v3646_v12, %s3252_s24  ;;  %v1789_v17 = vrot.slane %v3657_v15, 4 }
 0xbc2   :  { %2080 = vrot.lane.b32.xlu0 %v1817_v18, %s3266_s10  ;;  %2370 = vrot.lane.b32.xlu1 %v3646_v12, %s3250_s22 }
 0xbc6   :  { %1982 = vrot.lane.b32.xlu0 %v3646_v12, %s3251_s23  ;;  %2471 = vrot.lane.b32.xlu1 %v3646_v12, %s3253_s25 }
 0xbca   :  { %1756 = vrot.lane.b32.xlu0 %v1745_v21, %s3247_s0  ;;  %1793 = vrot.lane.b32.xlu1 %v1782_v22, %s3244_s18 }
 0xbce   :  { %1830 = vrot.lane.b32.xlu0 %v1819_v23, %s3264_s8  ;;  %1884 = vrot.lane.b32.xlu1 %v1745_v21, %s3262_s6 }
 0xbd2   :  { %1916 = vrot.lane.b32.xlu0 %v1782_v22, %s3256_s28  ;;  %2010 = vrot.lane.b32.xlu1 %v1745_v21, %s3263_s7 }
 0xbd6   :  { %1948 = vrot.lane.b32.xlu0 %v1819_v23, %s3265_s9  ;;  %2046 = vrot.lane.b32.xlu1 %v1782_v22, %s3259_s3 }
 0xbda   :  { %2147 = vrot.lane.b32.xlu0 %v1745_v21, %s3267_s11  ;;  %2082 = vrot.lane.b32.xlu1 %v1819_v23, %s3266_s10 }
 0xbde   :  { %2181 = vrot.lane.b32.xlu0 %v1782_v22, %s3254_s26  ;;  %1980 = vrot.lane.b32.xlu1 %v3653_v13, %s3251_s23  ;;  %v1752_v22 = vrot.slane %v3657_v15, 2 }
 0xbe2   :  { %2215 = vrot.lane.b32.xlu0 %v1819_v23, %s3268_s12  ;;  %2251 = vrot.lane.b32.xlu1 %v3653_v13, %s3252_s24 }
 0xbe6   :  { %2368 = vrot.lane.b32.xlu1 %v3653_v13, %s3250_s22  ;;  %1858 = vrot.lane.b32.xlu0 %v3653_v13, %s3249_s21 }
 0xbea   :  { %2118 = vrot.lane.b32.xlu0 %v3653_v13, %s3248_s1  ;;  %2257 = vrot.lane.b32.xlu1 %v3657_v15, %s3252_s24 }
 0xbee   :  { %1986 = vrot.lane.b32.xlu1 %v3657_v15, %s3251_s23  ;;  %2124 = vrot.lane.b32.xlu0 %v3657_v15, %s3248_s1 }
 0xbf2   :  { %1864 = vrot.lane.b32.xlu1 %v3657_v15, %s3249_s21  ;;  %2374 = vrot.lane.b32.xlu0 %v3657_v15, %s3250_s22 }
 0xbf6   :  { %1758 = vrot.lane.b32.xlu1 %v1747_v25, %s3247_s0  ;;  %2475 = vrot.lane.b32.xlu0 %v3657_v15, %s3253_s25 }
 0xbfa   :  { %1886 = vrot.lane.b32.xlu1 %v1747_v25, %s3262_s6  ;;  %1795 = vrot.lane.b32.xlu0 %v3733_v27, %s3244_s18 }
 0xbfe   :  { %1760 = vrot.lane.b32.xlu1 %v3743_v30, %s3247_s0  ;;  %1832 = vrot.lane.b32.xlu0 %v1821_v31, %s3264_s8 }
 0xc02   :  { %1918 = vrot.lane.b32.xlu1 %v3733_v27, %s3256_s28  ;;  %1888 = vrot.lane.b32.xlu0 %v3743_v30, %s3262_s6 }
 0xc06   :  { %1797 = vrot.lane.b32.xlu1 %v3757_v33, %s3244_s18  ;;  %2012 = vrot.lane.b32.xlu0 %v1747_v25, %s3263_s7 }
 0xc0a   :  { %1950 = vrot.lane.b32.xlu1 %v1821_v31, %s3265_s9  ;;  %1920 = vrot.lane.b32.xlu0 %v3757_v33, %s3256_s28 }
 0xc0e   :  { %1834 = vrot.lane.b32.xlu1 %v3769_v35, %s3264_s8  ;;  %2048 = vrot.lane.b32.xlu0 %v3733_v27, %s3259_s3 }
 0xc10   :  { %v3775_v36 = vpop.permute.xlu1 %2116  ;;  %v3777_v37 = vpop.permute.xlu0 %1856 }
 0xc12   :  { %2014 = vrot.lane.b32.xlu1 %v3743_v30, %s3263_s7  ;;  %1952 = vrot.lane.b32.xlu0 %v3769_v35, %s3265_s9 }
 0xc14   :  { %v3783_v38 = vpop.permute.xlu0 %1978  ;;  %v1855_v39 = vpop.permute.xlu1 %1854 }
 0xc16   :  { %2149 = vrot.lane.b32.xlu1 %v1747_v25, %s3267_s11  ;;  %2084 = vrot.lane.b32.xlu0 %v1821_v31, %s3266_s10 }
 0xc18   :  { %v3787_v40 = vpop.permute.xlu0 %2249  ;;  %v1755_v41 = vpop.permute.xlu1 %1754 }
 0xc19   :  { %1773 = vst.msk [vmem:[#allocation2 + $0x20] sm:$0xc0] %vm1772_vm11, %v1755_v41  ;;  %vm1937_vm11 = vcmask 228544  }
 0xc1a   :  { %2050 = vrot.lane.b32.xlu1 %v3757_v33, %s3259_s3  ;;  %2151 = vrot.lane.b32.xlu0 %v3743_v30, %s3267_s11 }
 0xc1c   :  { %v1977_v42 = vpop.permute.xlu0 %1976  ;;  %v1792_v43 = vpop.permute.xlu1 %1791 }
 0xc1d   :  { %1810 = vst.msk [vmem:[#allocation2 + $0x20] sm:$0xf0] %vm1809_vm1, %v1792_v43  ;;  %vm4339_vm1 = vcmask 326944   ;;  %v1826_v43 = vrot.slane %v3657_v15, 6 }
 0xc1e   :  { %2183 = vrot.lane.b32.xlu1 %v3733_v27, %s3254_s26  ;;  %2278 = vrot.lane.b32.xlu0 %v1747_v25, %s3269_s13  ;;  %v2507_v25 = vld [vmem:[#allocation5 + $0x3a8] sm:$0xff] }
 0xc1f   :  { %3092 = vmatprep.subr.mxu1 %v2507_v25 }
 0xc20   :  { %v2115_v44 = vpop.permute.xlu0 %2114  ;;  %v1915_v45 = vpop.permute.xlu1 %1914  ;;  %3093 = vmatpush3.msra.mxu1 %v2507_v25 }
 0xc21   :  { %3094 = vmatprep.subr.mxu1 %v2506_v26 }
 0xc22   :  { %2086 = vrot.lane.b32.xlu1 %v3769_v35, %s3266_s10  ;;  %2280 = vrot.lane.b32.xlu0 %v3743_v30, %s3269_s13 }
 0xc23   :  { %3095 = vmatpush3.msra.mxu1 %v2506_v26 }
 0xc24   :  { %v1883_v46 = vpop.permute.xlu0 %1882  ;;  %v2009_v47 = vpop.permute.xlu1 %2008  ;;  %3096 = vmatprep.subr.mxu1 %v2505_v29 }
 0xc25   :  { %1904 = vst.msk [vmem:[#allocation2 + $0x10] sm:$0xc0] %vm1903_vm8, %v1883_v46  ;;  %vm4373_vm8 = vcmask 1045504   ;;  %3097 = vmatpush3.msra.mxu1 %v2505_v29  ;;  %v4074_v29 = vrot.slane %v3843_v62, 6 }
 0xc26   :  { %2033 = vst.msk [vmem:[#allocation2] sm:$0xc0] %vm2032_vm4, %v2009_v47  ;;  %2217 = vrot.lane.b32.xlu1 %v1821_v31, %s3268_s12  ;;  %2219 = vrot.lane.b32.xlu0 %v3769_v35, %s3268_s12  ;;  %v3859_v3 = vsel %vm4373_vm8, %v1748_v28, %v1750_v63  ;;  %vm1969_vm4 = vcmask 261344   ;;  %vm4375_vm8 = vcmask 1041408   ;;  %v2498_v47 = vld [vmem:[#allocation5 + $0x360] sm:$0xff] }
 0xc27   :  { %1936 = vst.msk [vmem:[#allocation2 + $0x10] sm:$0xf0] %vm1935_vm0, %v1915_v45  ;;  %vm4340_vm0 = vcmask 359744   ;;  %v3896_v14 = vsel %vm4375_vm8, %v1822_v34, %v1824_v10 }
 0xc28   :  { %v1829_v48 = vpop.permute.xlu0 %1828  ;;  %v3803_v49 = vpop.permute.xlu1 %1860 }
 0xc29   :  { %1847 = vst.msk [vmem:[#allocation2 + $0x20] sm:$0xfc] %vm1846_vm13, %v1829_v48  ;;  %vm2171_vm13 = vcmask 458144   ;;  %v3981_v48 = vsel %vm4375_vm8, %v1824_v10, %v1826_v43  ;;  %vm2299_vm8 = vcmask 589344   ;;  %v4031_v10 = vpop.f32.mrf.mxu0 }
 0xc2a   :  { %2185 = vrot.lane.b32.xlu1 %v3757_v33, %s3254_s26  ;;  %2338 = vrot.lane.b32.xlu0 %v1821_v31, %s3270_s14  ;;  %1873 = vst.msk [vmem:[#allocation2 + $0x20] sm:$0xff] %vm4331_vm12, %v1855_v39  ;;  %v2501_v39 = vld [vmem:[#allocation5 + $0x378] sm:$0xff]  ;;  %v1880_v25 = vrot.slane %v4031_v10, 2 }
 0xc2c   :  { %v1947_v50 = vpop.permute.xlu0 %1946  ;;  %v3809_v51 = vpop.permute.xlu1 %2120 }
 0xc2d   :  { %1968 = vst.msk [vmem:[#allocation2 + $0x10] sm:$0xfc] %vm1967_vm14, %v1947_v50  ;;  %vm4333_vm14 = vcmask 392544   ;;  %v2497_v50 = vld [vmem:[#allocation5 + $0x358] sm:$0xff] }
 0xc2e   :  { %2308 = vrot.lane.b32.xlu1 %v3733_v27, %s3257_s29  ;;  %2340 = vrot.lane.b32.xlu0 %v3769_v35, %s3270_s14  ;;  %1998 = vst.msk [vmem:[#allocation2 + $0x10] sm:$0xff] %vm1997_vm6, %v1977_v42 }
 0xc30   :  { %v2045_v52 = vpop.permute.xlu0 %2044  ;;  %v3816_v53 = vpop.permute.xlu1 %2253 }
 0xc31   :  { %2069 = vst.msk [vmem:[#allocation2] sm:$0xf0] %vm2068_vm9, %v2045_v52  ;;  %vm4374_vm9 = vcmask 1043456  }
 0xc32   :  { %2310 = vrot.lane.b32.xlu1 %v3757_v33, %s3257_s29  ;;  %2393 = vrot.lane.b32.xlu0 %v3743_v30, %s3271_s15  ;;  %v3879_v9 = vsel %vm4374_vm9, %v1785_v32, %v1787_v6  ;;  %vm4335_vm9 = vcmask 523744   ;;  %v2504_v32 = vld [vmem:[#allocation5 + $0x390] sm:$0xff] }
 0xc33   :  { %3098 = vmatprep.subr.mxu1 %v2504_v32 }
 0xc34   :  { %v2081_v54 = vpop.permute.xlu0 %2080  ;;  %v3822_v55 = vpop.permute.xlu1 %2370  ;;  %3099 = vmatpush3.msra.mxu1 %v2504_v32 }
 0xc35   :  { %2105 = vst.msk [vmem:[#allocation2] sm:$0xfc] %vm2104_vm7, %v2081_v54  ;;  %vm4330_vm7 = vcmask 490944  }
 0xc36   :  { %2419 = vrot.lane.b32.xlu1 %v3757_v33, %s3255_s27  ;;  %1984 = vrot.lane.b32.xlu0 %v3662_v16, %s3251_s23  ;;  %2139 = vst.msk [vmem:[#allocation2] sm:$0xff] %vm4329_vm3, %v2115_v44  ;;  %v2503_v33 = vld [vmem:[#allocation5 + $0x388] sm:$0xff] }
 0xc37   :  { %3100 = vmatprep.subr.mxu1 %v2503_v33  ;;  %v2499_v44 = vld [vmem:[#allocation5 + $0x368] sm:$0xff] }
 0xc38   :  { %v3829_v56 = vpop.permute.xlu0 %1982  ;;  %v3831_v57 = vpop.permute.xlu1 %2471  ;;  %3101 = vmatpush3.msra.mxu1 %v2503_v33 }
 0xc3a   :  { %2445 = vrot.lane.b32.xlu1 %v3769_v35, %s3272_s16  ;;  %1862 = vrot.lane.b32.xlu0 %v3662_v16, %s3249_s21 }
 0xc3c   :  { %v1757_v58 = vpop.permute.xlu0 %1756  ;;  %v1794_v59 = vpop.permute.xlu1 %1793 }
 0xc3d   :  { %1775 = vst.msk [vmem:[#allocation2 + $0x30] sm:$0xff] %vm1774_vm10, %v1757_v58 }
 0xc3e   :  { %1812 = vst.msk [vmem:[#allocation2 + $0x30] sm:$0xff] %vm1811_vm15, %v1794_v59  ;;  %2122 = vrot.lane.b32.xlu1 %v3662_v16, %s3248_s1  ;;  %2473 = vrot.lane.b32.xlu0 %v3662_v16, %s3253_s25 }
 0xc40   :  { %v1831_v60 = vpop.permute.xlu0 %1830  ;;  %v1885_v61 = vpop.permute.xlu1 %1884 }
 0xc41   :  { %1849 = vst.msk [vmem:[#allocation2 + $0x30] sm:$0xff] %vm4332_vm2, %v1831_v60  ;;  %v2495_v60 = vld [vmem:[#allocation5 + $0x348] sm:$0xff] }
 0xc42   :  { %1906 = vst.msk [vmem:[#allocation2 + $0x20] sm:$0xff] %vm1905_vm5, %v1885_v61  ;;  %2255 = vrot.lane.b32.xlu1 %v3662_v16, %s3252_s24  ;;  %2378 = vrot.lane.b32.xlu0 %v3843_v62, %s3250_s22  ;;  %v2494_v61 = vld [vmem:[#allocation5 + $0x340] sm:$0xff] }
 0xc43   :  { %1874 = vst.msk [vmem:[#allocation2 + $0x30] sm:$0xff] %vm4331_vm12, %v3777_v37 }
 0xc44   :  { %v1917_v1 = vpop.permute.xlu0 %1916  ;;  %v2011_v2 = vpop.permute.xlu1 %2010 }
 0xc45   :  { %1938 = vst.msk [vmem:[#allocation2 + $0x20] sm:$0xff] %vm1937_vm11, %v1917_v1 }
 0xc46   :  { %2035 = vst.msk [vmem:[#allocation2 + $0x10] sm:$0xff] %vm4339_vm1, %v2011_v2  ;;  %2372 = vrot.lane.b32.xlu1 %v3662_v16, %s3250_s22  ;;  %2016 = vrot.lane.b32.xlu0 %v3859_v3, %s3263_s7  ;;  %v2496_v16 = vld [vmem:[#allocation5 + $0x350] sm:$0xff]  ;;  %v2493_v2 = vld [vmem:[#allocation5 + $0x338] sm:$0xff] }
 0xc48   :  { %v1949_v4 = vpop.permute.xlu0 %1948  ;;  %v2047_v5 = vpop.permute.xlu1 %2046 }
 0xc49   :  { %1970 = vst.msk [vmem:[#allocation2 + $0x20] sm:$0xff] %vm1969_vm4, %v1949_v4 }
 0xc4a   :  { %2071 = vst.msk [vmem:[#allocation2 + $0x10] sm:$0xff] %vm4340_vm0, %v2047_v5  ;;  %2479 = vrot.lane.b32.xlu1 %v3843_v62, %s3253_s25  ;;  %2153 = vrot.lane.b32.xlu0 %v3859_v3, %s3267_s11  ;;  %v2492_v5 = vld [vmem:[#allocation5 + $0x330] sm:$0xff] }
 0xc4b   :  { %1999 = vst.msk [vmem:[#allocation2 + $0x20] sm:$0xff] %vm1997_vm6, %v3783_v38 }
 0xc4c   :  { %v2148_v7 = vpop.permute.xlu0 %2147  ;;  %v2083_v8 = vpop.permute.xlu1 %2082 }
 0xc4d   :  { %2172 = vst.msk [vmem:[#allocation2] sm:$0xff] %vm2171_vm13, %v2148_v7 }
 0xc4e   :  { %2107 = vst.msk [vmem:[#allocation2 + $0x10] sm:$0xff] %vm4333_vm14, %v2083_v8  ;;  %2261 = vrot.lane.b32.xlu1 %v3843_v62, %s3252_s24  ;;  %1799 = vrot.lane.b32.xlu0 %v3879_v9, %s3244_s18 }
 0xc4f   :  { %2140 = vst.msk [vmem:[#allocation2 + $0x10] sm:$0xff] %vm4329_vm3, %v3775_v36  ;;  %vm4334_vm3 = vcmask 556544   ;;  %v2502_v36 = vld [vmem:[#allocation5 + $0x380] sm:$0xff] }
 0xc50   :  { %v2182_v11 = vpop.permute.xlu0 %2181  ;;  %v3888_v13 = vpop.permute.xlu1 %1980  ;;  %3102 = vmatprep.subr.mxu1 %v2502_v36 }
 0xc51   :  { %2206 = vst.msk [vmem:[#allocation2] sm:$0xff] %vm4330_vm7, %v2182_v11  ;;  %vm4376_vm7 = vcmask 1043456   ;;  %3103 = vmatpush3.msra.mxu1 %v2502_v36 }
 0xc52   :  { %2128 = vrot.lane.b32.xlu1 %v3843_v62, %s3248_s1  ;;  %2088 = vrot.lane.b32.xlu0 %v3896_v14, %s3266_s10  ;;  %v3909_v12 = vsel %vm4376_vm7, %v1787_v6, %v1789_v17  ;;  %vm4377_vm7 = vcmask 1045504  }
 0xc53   :  { %v3931_v24 = vsel %vm4377_vm7, %v1750_v63, %v1752_v22  ;;  %3104 = vmatprep.subr.mxu1 %v2501_v39  ;;  %vm4378_vm7 = vcmask 425344  }
 0xc54   :  { %v2216_v18 = vpop.permute.xlu0 %2215  ;;  %v3903_v19 = vpop.permute.xlu1 %2251  ;;  %3105 = vmatpush3.msra.mxu1 %v2501_v39 }
 0xc55   :  { %2240 = vst.msk [vmem:[#allocation2] sm:$0xff] %vm4335_vm9, %v2216_v18 }
 0xc56   :  { %1890 = vrot.lane.b32.xlu1 %v3859_v3, %s3262_s6  ;;  %2054 = vrot.lane.b32.xlu0 %v3909_v12, %s3259_s3  ;;  %2271 = vst.msk [vmem:[#allocation2] sm:$0xff] %vm4334_vm3, %v3787_v40  ;;  %v2500_v40 = vld [vmem:[#allocation5 + $0x370] sm:$0xff] }
 0xc57   :  { %3106 = vmatprep.subr.mxu1 %v2500_v40 }
 0xc58   :  { %v3917_v20 = vpop.permute.xlu1 %2368  ;;  %v1859_v21 = vpop.permute.xlu0 %1858  ;;  %3107 = vmatpush3.msra.mxu1 %v2500_v40 }
 0xc59   :  { %3108 = vmatprep.subr.mxu1 %v2499_v44 }
 0xc5a   :  { %1922 = vrot.lane.b32.xlu1 %v3879_v9, %s3256_s28  ;;  %2221 = vrot.lane.b32.xlu0 %v3896_v14, %s3268_s12 }
 0xc5b   :  { %3109 = vmatpush3.msra.mxu1 %v2499_v44 }
 0xc5c   :  { %v3924_v0 = vpop.permute.xlu0 %2118  ;;  %v3926_v23 = vpop.permute.xlu1 %2257  ;;  %3110 = vmatprep.subr.mxu1 %v2498_v47 }
 0xc5d   :  { %3111 = vmatpush3.msra.mxu1 %v2498_v47 }
 0xc5e   :  { %1954 = vrot.lane.b32.xlu1 %v3896_v14, %s3265_s9  ;;  %2155 = vrot.lane.b32.xlu0 %v3931_v24, %s3267_s11 }
 0xc5f   :  { %3112 = vmatprep.subr.mxu1 %v2497_v50 }
 0xc60   :  { %v3937_v27 = vpop.permute.xlu1 %1986  ;;  %v3939_v28 = vpop.permute.xlu0 %2124  ;;  %3113 = vmatpush3.msra.mxu1 %v2497_v50 }
 0xc61   :  { %3114 = vmatprep.subr.mxu1 %v2496_v16 }
 0xc62   :  { %1762 = vrot.lane.b32.xlu1 %v3859_v3, %s3247_s0  ;;  %2282 = vrot.lane.b32.xlu0 %v3859_v3, %s3269_s13 }
 0xc63   :  { %3115 = vmatpush3.msra.mxu1 %v2496_v16 }
 0xc64   :  { %v3945_v30 = vpop.permute.xlu1 %1864  ;;  %v3947_v31 = vpop.permute.xlu0 %2374  ;;  %3116 = vmatprep.subr.mxu1 %v2495_v60 }
 0xc65   :  { %3117 = vmatpush3.msra.mxu1 %v2495_v60 }
 0xc66   :  { %2052 = vrot.lane.b32.xlu1 %v3879_v9, %s3259_s3  ;;  %2284 = vrot.lane.b32.xlu0 %v3931_v24, %s3269_s13 }
 0xc67   :  { %3118 = vmatprep.subr.mxu1 %v2494_v61 }
 0xc68   :  { %v1759_v34 = vpop.permute.xlu1 %1758  ;;  %v3953_v35 = vpop.permute.xlu0 %2475  ;;  %3119 = vmatpush3.msra.mxu1 %v2494_v61 }
 0xc69   :  { %1776 = vst.msk [vmem:[#allocation2 + $0x40] sm:$0xff] %vm1774_vm10, %v1759_v34  ;;  %3120 = vmatprep.subr.mxu1 %v2493_v2 }
 0xc6a   :  { %2018 = vrot.lane.b32.xlu1 %v3931_v24, %s3263_s7  ;;  %2395 = vrot.lane.b32.xlu0 %v3859_v3, %s3271_s15 }
 0xc6b   :  { %3121 = vmatpush3.msra.mxu1 %v2493_v2 }
 0xc6c   :  { %v1887_v37 = vpop.permute.xlu1 %1886  ;;  %v1796_v38 = vpop.permute.xlu0 %1795  ;;  %3122 = vmatprep.subr.mxu1 %v2492_v5 }
 0xc6d   :  { %1907 = vst.msk [vmem:[#allocation2 + $0x30] sm:$0xff] %vm1905_vm5, %v1887_v37  ;;  %3123 = vmatpush3.msra.mxu1 %v2492_v5  ;;  %v1912_v37 = vrot.slane %v4031_v10, 4 }
 0xc6e   :  { %1813 = vst.msk [vmem:[#allocation2 + $0x40] sm:$0xff] %vm1811_vm15, %v1796_v38  ;;  %2187 = vrot.lane.b32.xlu1 %v3879_v9, %s3254_s26  ;;  %1764 = vrot.lane.b32.xlu0 %v3931_v24, %s3247_s0 }
 0xc70   :  { %v1761_v41 = vpop.permute.xlu1 %1760  ;;  %v1833_v42 = vpop.permute.xlu0 %1832 }
 0xc71   :  { %1777 = vst.msk [vmem:[#allocation2 + $0x50] sm:$0xff] %vm1774_vm10, %v1761_v41  ;;  %v1944_v41 = vrot.slane %v4031_v10, 6 }
 0xc72   :  { %1850 = vst.msk [vmem:[#allocation2 + $0x40] sm:$0xff] %vm4332_vm2, %v1833_v42  ;;  %1836 = vrot.lane.b32.xlu1 %v3896_v14, %s3264_s8  ;;  %2314 = vrot.lane.b32.xlu0 %v3909_v12, %s3257_s29 }
 0xc73   :  { %1875 = vst.msk [vmem:[#allocation2 + $0x40] sm:$0xff] %vm4331_vm12, %v1859_v21  ;;  %v2006_v21 = vrot.slane %v3843_v62, 2 }
 0xc74   :  { %v1919_v45 = vpop.permute.xlu1 %1918  ;;  %v1889_v46 = vpop.permute.xlu0 %1888 }
 0xc75   :  { %1939 = vst.msk [vmem:[#allocation2 + $0x30] sm:$0xff] %vm1937_vm11, %v1919_v45 }
 0xc76   :  { %1908 = vst.msk [vmem:[#allocation2 + $0x40] sm:$0xff] %vm1905_vm5, %v1889_v46  ;;  %2090 = vrot.lane.b32.xlu1 %v3981_v48, %s3266_s10  ;;  %2421 = vrot.lane.b32.xlu0 %v3879_v9, %s3255_s27 }
 0xc78   :  { %v1798_v52 = vpop.permute.xlu1 %1797  ;;  %v2013_v54 = vpop.permute.xlu0 %2012 }
 0xc79   :  { %1814 = vst.msk [vmem:[#allocation2 + $0x50] sm:$0xff] %vm1811_vm15, %v1798_v52 }
 0xc7a   :  { %2036 = vst.msk [vmem:[#allocation2 + $0x20] sm:$0xff] %vm4339_vm1, %v2013_v54  ;;  %1892 = vrot.lane.b32.xlu1 %v3931_v24, %s3262_s6  ;;  %1801 = vrot.lane.b32.xlu0 %v3909_v12, %s3244_s18 }
 0xc7c   :  { %v1951_v58 = vpop.permute.xlu1 %1950  ;;  %v1921_v59 = vpop.permute.xlu0 %1920 }
 0xc7d   :  { %1971 = vst.msk [vmem:[#allocation2 + $0x30] sm:$0xff] %vm1969_vm4, %v1951_v58 }
 0xc7e   :  { %1940 = vst.msk [vmem:[#allocation2 + $0x40] sm:$0xff] %vm1937_vm11, %v1921_v59  ;;  %2189 = vrot.lane.b32.xlu1 %v3909_v12, %s3254_s26  ;;  %2344 = vrot.lane.b32.xlu0 %v3981_v48, %s3270_s14 }
 0xc7f   :  { %2000 = vst.msk [vmem:[#allocation2 + $0x30] sm:$0xff] %vm1997_vm6, %v3888_v13 }
 0xc80   :  { %v1835_v63 = vpop.permute.xlu1 %1834  ;;  %v2049_v1 = vpop.permute.xlu0 %2048 }
 0xc81   :  { %1851 = vst.msk [vmem:[#allocation2 + $0x50] sm:$0xff] %vm4332_vm2, %v1835_v63  ;;  %vm2359_vm2 = vcmask 654944  }
 0xc82   :  { %2072 = vst.msk [vmem:[#allocation2 + $0x20] sm:$0xff] %vm4340_vm0, %v2049_v1  ;;  %2312 = vrot.lane.b32.xlu1 %v3879_v9, %s3257_s29  ;;  %2447 = vrot.lane.b32.xlu0 %v3896_v14, %s3272_s16 }
 0xc83   :  { %1876 = vst.msk [vmem:[#allocation2 + $0x50] sm:$0xff] %vm4331_vm12, %v3803_v49  ;;  %vm4380_vm12 = vcmask 425344  }
 0xc84   :  { %v2015_v3 = vpop.permute.xlu1 %2014  ;;  %v1953_v4 = vpop.permute.xlu0 %1952 }
 0xc85   :  { %2037 = vst.msk [vmem:[#allocation2 + $0x30] sm:$0xff] %vm4339_vm1, %v2015_v3 }
 0xc86   :  { %1972 = vst.msk [vmem:[#allocation2 + $0x40] sm:$0xff] %vm1969_vm4, %v1953_v4  ;;  %1924 = vrot.lane.b32.xlu1 %v3909_v12, %s3256_s28  ;;  %1838 = vrot.lane.b32.xlu0 %v3981_v48, %s3264_s8 }
 0xc87   :  { %2001 = vst.msk [vmem:[#allocation2 + $0x40] sm:$0xff] %vm1997_vm6, %v3829_v56 }
 0xc88   :  { %v2150_v49 = vpop.permute.xlu1 %2149  ;;  %v2085_v6 = vpop.permute.xlu0 %2084 }
 0xc89   :  { %2173 = vst.msk [vmem:[#allocation2 + $0x10] sm:$0xff] %vm2171_vm13, %v2150_v49 }
 0xc8a   :  { %2108 = vst.msk [vmem:[#allocation2 + $0x20] sm:$0xff] %vm4333_vm14, %v2085_v6  ;;  %2223 = vrot.lane.b32.xlu1 %v3981_v48, %s3268_s12  ;;  %2423 = vrot.lane.b32.xlu0 %v3909_v12, %s3255_s27 }
 0xc8b   :  { %2141 = vst.msk [vmem:[#allocation2 + $0x20] sm:$0xff] %vm4378_vm7, %v3924_v0  ;;  %vm4379_vm7 = vcmask 490944  }
 0xc8c   :  { %v2051_v56 = vpop.permute.xlu1 %2050  ;;  %v2152_v7 = vpop.permute.xlu0 %2151 }
 0xc8d   :  { %2073 = vst.msk [vmem:[#allocation2 + $0x30] sm:$0xff] %vm4340_vm0, %v2051_v56 }
 0xc8e   :  { %2174 = vst.msk [vmem:[#allocation2 + $0x20] sm:$0xff] %vm2171_vm13, %v2152_v7  ;;  %2342 = vrot.lane.b32.xlu1 %v3896_v14, %s3270_s14  ;;  %2449 = vrot.lane.b32.xlu0 %v3981_v48, %s3272_s16 }
 0xc90   :  { %v2184_v8 = vpop.permute.xlu1 %2183  ;;  %v2279_v9 = vpop.permute.xlu0 %2278 }
 0xc91   :  { %2207 = vst.msk [vmem:[#allocation2 + $0x10] sm:$0xff] %vm4379_vm7, %v2184_v8 }
 0xc92   :  { %2300 = vst.msk [vmem:[#allocation2] sm:$0xff] %vm2299_vm8, %v2279_v9  ;;  %1956 = vrot.lane.b32.xlu1 %v3981_v48, %s3265_s9  ;;  %2376 = vrot.lane.b32.xlu0 %v4031_v10, %s3250_s22 }
 0xc94   :  { %v2087_v11 = vpop.permute.xlu1 %2086  ;;  %v2281_v13 = vpop.permute.xlu0 %2280 }
 0xc95   :  { %2109 = vst.msk [vmem:[#allocation2 + $0x30] sm:$0xff] %vm4333_vm14, %v2087_v11  ;;  %vm4337_vm14 = vcmask 687744  }
 0xc96   :  { %2142 = vst.msk [vmem:[#allocation2 + $0x30] sm:$0xff] %vm4380_vm12, %v3809_v51  ;;  %2397 = vrot.lane.b32.xlu1 %v3931_v24, %s3271_s15  ;;  %2126 = vrot.lane.b32.xlu0 %v4031_v10, %s3248_s1  ;;  %vm4381_vm12 = vmmov %vm4379_vm7  ;;  %vm4336_vm7 = vcmask 622144   ;;  %v4063_v24 = vrot.slane %v3843_v62, 4 }
 0xc98   :  { %v2218_v14 = vpop.permute.xlu1 %2217  ;;  %v2220_v18 = vpop.permute.xlu0 %2219 }
 0xc99   :  { %2241 = vst.msk [vmem:[#allocation2 + $0x10] sm:$0xff] %vm4335_vm9, %v2218_v14 }
 0xc9a   :  { %2272 = vst.msk [vmem:[#allocation2 + $0x10] sm:$0xff] %vm4334_vm3, %v3903_v19  ;;  %1988 = vrot.lane.b32.xlu0 %v4031_v10, %s3251_s23  ;;  %2259 = vrot.lane.b32.xlu1 %v4031_v10, %s3252_s24 }
 0xc9b   :  { %2301 = vst.msk [vmem:[#allocation2 + $0x10] sm:$0xff] %vm2299_vm8, %v2281_v13 }
 0xc9c   :  { %v2186_v51 = vpop.permute.xlu1 %2185  ;;  %v2339_v12 = vpop.permute.xlu0 %2338 }
 0xc9d   :  { %2208 = vst.msk [vmem:[#allocation2 + $0x20] sm:$0xff] %vm4381_vm12, %v2186_v51  ;;  %vm2411_vm12 = vcmask 720544  }
 0xc9e   :  { %2242 = vst.msk [vmem:[#allocation2 + $0x20] sm:$0xff] %vm4335_vm9, %v2220_v18  ;;  %2403 = vrot.lane.b32.xlu0 %v2006_v21, %s3271_s15  ;;  %2477 = vrot.lane.b32.xlu1 %v4031_v10, %s3253_s25  ;;  %vm2437_vm9 = vcmask 753344  }
 0xc9f   :  { %2273 = vst.msk [vmem:[#allocation2 + $0x20] sm:$0xff] %vm4334_vm3, %v3816_v53  ;;  %vm4382_vm3 = vcmask 1045504  }
 0xca0   :  { %v2309_v19 = vpop.permute.xlu1 %2308  ;;  %v2341_v0 = vpop.permute.xlu0 %2340  ;;  %v1881_v32 = vsel %vm4382_vm3, %v1752_v22, %v1880_v25  ;;  %vm2463_vm3 = vcmask 786144  }
 0xca1   :  { %2330 = vst.msk [vmem:[#allocation2] sm:$0xff] %vm4336_vm7, %v2309_v19 }
 0xca2   :  { %2360 = vst.msk [vmem:[#allocation2] sm:$0xff] %vm2359_vm2, %v2339_v12  ;;  %2429 = vrot.lane.b32.xlu0 %v4063_v24, %s3255_s27  ;;  %2161 = vrot.lane.b32.xlu1 %v2006_v21, %s3267_s11 }
 0xca3   :  { %2387 = vst.msk [vmem:[#allocation2] sm:$0xff] %vm4337_vm14, %v3917_v20 }
 0xca4   :  { %v2311_v53 = vpop.permute.xlu1 %2310  ;;  %v2394_v26 = vpop.permute.xlu0 %2393 }
 0xca5   :  { %2331 = vst.msk [vmem:[#allocation2 + $0x10] sm:$0xff] %vm4336_vm7, %v2311_v53  ;;  %vm4338_vm7 = vcmask 818944  }
 0xca6   :  { %2412 = vst.msk [vmem:[#allocation2] sm:$0xff] %vm2411_vm12, %v2394_v26  ;;  %2455 = vrot.lane.b32.xlu0 %v4074_v29, %s3272_s16  ;;  %2286 = vrot.lane.b32.xlu1 %v1881_v32, %s3269_s13 }
 0xca7   :  { %2361 = vst.msk [vmem:[#allocation2 + $0x10] sm:$0xff] %vm2359_vm2, %v2341_v0 }
 0xca8   :  { %2388 = vst.msk [vmem:[#allocation2 + $0x10] sm:$0xff] %vm4337_vm14, %v3822_v55  ;;  %v2420_v62 = vpop.permute.xlu1 %2419  ;;  %v1985_v20 = vpop.permute.xlu0 %1984  ;;  %vm4383_vm14 = vcmask 1045504  }
 0xca9   :  { %2438 = vst.msk [vmem:[#allocation2] sm:$0xff] %vm2437_vm9, %v2420_v62  ;;  %v2007_v36 = vsel %vm4383_vm14, %v1880_v25, %v2006_v21  ;;  %vm4385_vm14 = vcmask 1041408  }
 0xcaa   :  { %2290 = vrot.lane.b32.xlu0 %v2006_v21, %s3269_s13  ;;  %2399 = vrot.lane.b32.xlu1 %v1881_v32, %s3271_s15  ;;  %v1945_v45 = vsel %vm4385_vm14, %v1826_v43, %v1944_v41  ;;  %v2079_v16 = vsel %vm4385_vm14, %v1944_v41, %v4074_v29  ;;  %vm4387_vm14 = vcmask 425344  }
 0xcac   :  { %v2446_v22 = vpop.permute.xlu1 %2445  ;;  %v4090_v33 = vpop.permute.xlu0 %1862 }
 0xcad   :  { %2464 = vst.msk [vmem:[#allocation2] sm:$0xff] %vm2463_vm3, %v2446_v22 }
 0xcae   :  { %2487 = vst.msk [vmem:[#allocation2] sm:$0xff] %vm4338_vm7, %v3831_v57  ;;  %2320 = vrot.lane.b32.xlu0 %v4063_v24, %s3257_s29  ;;  %1894 = vrot.lane.b32.xlu1 %v1881_v32, %s3262_s6  ;;  %vm4384_vm7 = vcmask 1043456  }
 0xcaf   :  { %v1913_v40 = vsel %vm4384_vm7, %v1789_v17, %v1912_v37  ;;  %v2043_v47 = vsel %vm4384_vm7, %v1912_v37, %v4063_v24  ;;  %vm4386_vm7 = vcmask 392544  }
 0xcb0   :  { %v4098_v55 = vpop.permute.xlu1 %2122  ;;  %v4100_v34 = vpop.permute.xlu0 %2473 }
 0xcb2   :  { %2288 = vrot.lane.b32.xlu1 %v2007_v36, %s3269_s13  ;;  %2157 = vrot.lane.b32.xlu0 %v1881_v32, %s3267_s11 }
 0xcb4   :  { %v4106_v38 = vpop.permute.xlu1 %2255  ;;  %v4108_v57 = vpop.permute.xlu0 %2378 }
 0xcb5   :  { %v2508_v39 = vld [vmem:[#allocation2] sm:$0xff] }
 0xcb6   :  { %3124 = vmatprep.mubr.f32.mxu1 %v2508_v39  ;;  %2425 = vrot.lane.b32.xlu1 %v1913_v40, %s3255_s27 }
 0xcb7   :  { %2191 = vrot.lane.b32.xlu0 %v1913_v40, %s3254_s26 }
 0xcb8   :  { %v4116_v42 = vpop.permute.xlu1 %2372  ;;  %v2017_v44 = vpop.permute.xlu0 %2016 }
 0xcb9   :  { %2038 = vst.msk [vmem:[#allocation2 + $0x40] sm:$0xff] %vm4339_vm1, %v2017_v44 }
 0xcba   :  { %1926 = vrot.lane.b32.xlu1 %v1913_v40, %s3256_s28 }
 0xcbb   :  { %2225 = vrot.lane.b32.xlu0 %v1945_v45, %s3268_s12 }
 0xcbc   :  { %v4124_v17 = vpop.permute.xlu1 %2479  ;;  %v2154_v46 = vpop.permute.xlu0 %2153 }
 0xcbd   :  { %2175 = vst.msk [vmem:[#allocation2 + $0x30] sm:$0xff] %vm2171_vm13, %v2154_v46 }
 0xcbe   :  { %2318 = vrot.lane.b32.xlu1 %v2043_v47, %s3257_s29 }
 0xcbf   :  { %2020 = vrot.lane.b32.xlu0 %v1881_v32, %s3263_s7 }
 0xcc0   :  { %v4131_v48 = vpop.permute.xlu1 %2261  ;;  %v1800_v50 = vpop.permute.xlu0 %1799 }
 0xcc2   :  { %2451 = vrot.lane.b32.xlu1 %v1945_v45, %s3272_s16 }
 0xcc3   :  { %2316 = vrot.lane.b32.xlu0 %v1913_v40, %s3257_s29 }
 0xcc4   :  { %v4135_v15 = vpop.permute.xlu1 %2128  ;;  %v2089_v43 = vpop.permute.xlu0 %2088 }
 0xcc6   :  { %1958 = vrot.lane.b32.xlu1 %v1945_v45, %s3265_s9 }
 0xcc7   :  { %2056 = vrot.lane.b32.xlu0 %v1913_v40, %s3259_s3 }
 0xcc8   :  { %v1891_v52 = vpop.permute.xlu1 %1890  ;;  %v2055_v54 = vpop.permute.xlu0 %2054 }
 0xcc9   :  { %1909 = vst.msk [vmem:[#allocation2 + $0x50] sm:$0xff] %vm1905_vm5, %v1891_v52 }
 0xcca   :  { %2348 = vrot.lane.b32.xlu1 %v2079_v16, %s3270_s14 }
 0xccb   :  { %2346 = vrot.lane.b32.xlu0 %v1945_v45, %s3270_s14 }
 0xccc   :  { %v1923_v58 = vpop.permute.xlu1 %1922  ;;  %v2222_v59 = vpop.permute.xlu0 %2221 }
 0xccd   :  { %1941 = vst.msk [vmem:[#allocation2 + $0x50] sm:$0xff] %vm1937_vm11, %v1923_v58 }
 0xcce   :  { %2159 = vrot.lane.b32.xlu1 %v2007_v36, %s3267_s11 }
 0xccf   :  { %2092 = vrot.lane.b32.xlu0 %v1945_v45, %s3266_s10 }
 0xcd0   :  { %v1955_v60 = vpop.permute.xlu1 %1954  ;;  %v2156_v61 = vpop.permute.xlu0 %2155 }
 0xcd1   :  { %1973 = vst.msk [vmem:[#allocation2 + $0x50] sm:$0xff] %vm1969_vm4, %v1955_v60 }
 0xcd2   :  { %2002 = vst.msk [vmem:[#allocation2 + $0x50] sm:$0xff] %vm1997_vm6, %v1985_v20  ;;  %2427 = vrot.lane.b32.xlu1 %v2043_v47, %s3255_s27 }
 0xcd3   :  { %2401 = vrot.lane.b32.xlu0 %v2007_v36, %s3271_s15 }
 0xcd4   :  { %v1763_v63 = vpop.permute.xlu1 %1762  ;;  %v2283_v1 = vpop.permute.xlu0 %2282 }
 0xcd5   :  { %1778 = vst.msk [vmem:[#allocation2 + $0x60] sm:$0xff] %vm1774_vm10, %v1763_v63 }
 0xcd6   :  { %2302 = vst.msk [vmem:[#allocation2 + $0x20] sm:$0xff] %vm2299_vm8, %v2283_v1  ;;  %2193 = vrot.lane.b32.xlu1 %v2043_v47, %s3254_s26 }
 0xcd7   :  { %1815 = vst.msk [vmem:[#allocation2 + $0x60] sm:$0xff] %vm1811_vm15, %v1800_v50  ;;  %2022 = vrot.lane.b32.xlu0 %v2007_v36, %s3263_s7 }
 0xcd8   :  { %v2053_v2 = vpop.permute.xlu1 %2052  ;;  %v2285_v3 = vpop.permute.xlu0 %2284 }
 0xcd9   :  { %2074 = vst.msk [vmem:[#allocation2 + $0x40] sm:$0xff] %vm4340_vm0, %v2053_v2 }
 0xcda   :  { %2110 = vst.msk [vmem:[#allocation2 + $0x40] sm:$0xff] %vm4386_vm7, %v2089_v43  ;;  %2453 = vrot.lane.b32.xlu1 %v2079_v16, %s3272_s16  ;;  %vm4388_vm7 = vcmask 490944  }
 0xcdb   :  { %2143 = vst.msk [vmem:[#allocation2 + $0x40] sm:$0xff] %vm4387_vm14, %v4098_v55  ;;  %2058 = vrot.lane.b32.xlu0 %v2043_v47, %s3259_s3  ;;  %vm4389_vm14 = vcmask 523744  }
 0xcdc   :  { %2176 = vst.msk [vmem:[#allocation2 + $0x40] sm:$0xff] %vm2171_vm13, %v2156_v61  ;;  %v2019_v4 = vpop.permute.xlu1 %2018  ;;  %v2396_v5 = vpop.permute.xlu0 %2395 }
 0xcdd   :  { %2039 = vst.msk [vmem:[#allocation2 + $0x50] sm:$0xff] %vm4339_vm1, %v2019_v4  ;;  %vm4390_vm1 = vcmask 556544  }
 0xcde   :  { %2413 = vst.msk [vmem:[#allocation2 + $0x10] sm:$0xff] %vm2411_vm12, %v2396_v5  ;;  %2227 = vrot.lane.b32.xlu1 %v2079_v16, %s3268_s12 }
 0xcdf   :  { %2075 = vst.msk [vmem:[#allocation2 + $0x50] sm:$0xff] %vm4340_vm0, %v2055_v54  ;;  %2094 = vrot.lane.b32.xlu0 %v2079_v16, %s3266_s10  ;;  %vm4391_vm0 = vcmask 130144  }
 0xce0   :  { %v2188_v49 = vpop.permute.xlu1 %2187  ;;  %v1765_v6 = vpop.permute.xlu0 %1764 }
 0xce1   :  { %2209 = vst.msk [vmem:[#allocation2 + $0x30] sm:$0xff] %vm4388_vm7, %v2188_v49  ;;  %vm4392_vm7 = vcmask 622144  }
 0xce2   :  { %1779 = vst.msk [vmem:[#allocation2 + $0x70] sm:$0xff] %vm1774_vm10, %v1765_v6  ;;  %2195 = vrot.lane.b32.xlu1 %v4063_v24, %s3254_s26  ;;  %vm4393_vm10 = vcmask 162944  }
 0xce3   :  { %2243 = vst.msk [vmem:[#allocation2 + $0x30] sm:$0xff] %vm4389_vm14, %v2222_v59  ;;  %2350 = vrot.lane.b32.xlu0 %v4074_v29, %s3270_s14  ;;  %vm4395_vm14 = vcmask 425344  }
 0xce4   :  { %2274 = vst.msk [vmem:[#allocation2 + $0x30] sm:$0xff] %vm4390_vm1, %v4106_v38  ;;  %v1837_v56 = vpop.permute.xlu1 %1836  ;;  %v2315_v7 = vpop.permute.xlu0 %2314  ;;  %vm4394_vm1 = vcmask 392544  }
 0xce5   :  { %2303 = vst.msk [vmem:[#allocation2 + $0x30] sm:$0xff] %vm2299_vm8, %v2285_v3 }
 0xce6   :  { %1852 = vst.msk [vmem:[#allocation2 + $0x60] sm:$0xff] %vm4391_vm0, %v1837_v56  ;;  %2229 = vrot.lane.b32.xlu1 %v4074_v29, %s3268_s12  ;;  %vm4396_vm0 = vcmask 490944  }
 0xce7   :  { %2333 = vst.msk [vmem:[#allocation2 + $0x30] sm:$0xff] %vm4392_vm7, %v2315_v7  ;;  %vm4397_vm7 = vcmask 687744  }
 0xce8   :  { %1877 = vst.msk [vmem:[#allocation2 + $0x60] sm:$0xff] %vm4393_vm10, %v4090_v33  ;;  %v2091_v8 = vpop.permute.xlu1 %2090  ;;  %v2422_v9 = vpop.permute.xlu0 %2421  ;;  %vm4398_vm10 = vcmask 622144  }
 0xce9   :  { %2111 = vst.msk [vmem:[#allocation2 + $0x50] sm:$0xff] %vm4394_vm1, %v2091_v8  ;;  %vm4399_vm1 = vcmask 818944  }
 0xcea   :  { %2439 = vst.msk [vmem:[#allocation2 + $0x10] sm:$0xff] %vm2437_vm9, %v2422_v9 }
 0xceb   :  { %2144 = vst.msk [vmem:[#allocation2 + $0x50] sm:$0xff] %vm4395_vm14, %v3939_v28  ;;  %vm4401_vm14 = vcmask 162944  }
 0xcec   :  { %v1893_v10 = vpop.permute.xlu1 %1892  ;;  %v1802_v11 = vpop.permute.xlu0 %1801 }
 0xced   :  { %1910 = vst.msk [vmem:[#allocation2 + $0x60] sm:$0xff] %vm1905_vm5, %v1893_v10 }
 0xcee   :  { %1816 = vst.msk [vmem:[#allocation2 + $0x70] sm:$0xff] %vm1811_vm15, %v1802_v11  ;;  %vm4400_vm15 = vcmask 130144   ;;  %v2787_v11 = vld [vmem:[#allocation5 + $0x3b0] ss:$0 sm:$0xff] }
 0xcf0   :  { %v2190_v13 = vpop.permute.xlu1 %2189  ;;  %v2345_v14 = vpop.permute.xlu0 %2344 }
 0xcf1   :  { %2210 = vst.msk [vmem:[#allocation2 + $0x40] sm:$0xff] %vm4396_vm0, %v2190_v13  ;;  %vm4402_vm0 = vcmask 523744  }
 0xcf2   :  { %2363 = vst.msk [vmem:[#allocation2 + $0x30] sm:$0xff] %vm2359_vm2, %v2345_v14 }
 0xcf3   :  { %2390 = vst.msk [vmem:[#allocation2 + $0x30] sm:$0xff] %vm4397_vm7, %v3947_v31  ;;  %vm4403_vm7 = vcmask 556544  }
 0xcf4   :  { %v2313_v18 = vpop.permute.xlu1 %2312  ;;  %v2448_v51 = vpop.permute.xlu0 %2447 }
 0xcf5   :  { %2332 = vst.msk [vmem:[#allocation2 + $0x20] sm:$0xff] %vm4398_vm10, %v2313_v18  ;;  %vm4404_vm10 = vcmask 687744  }
 0xcf6   :  { %2465 = vst.msk [vmem:[#allocation2 + $0x10] sm:$0xff] %vm2463_vm3, %v2448_v51 }
 0xcf7   :  { %2488 = vst.msk [vmem:[#allocation2 + $0x10] sm:$0xff] %vm4399_vm1, %v4100_v34 }
 0xcf8   :  { %v1925_v28 = vpop.permute.xlu1 %1924  ;;  %v1839_v12 = vpop.permute.xlu0 %1838 }
 0xcf9   :  { %1942 = vst.msk [vmem:[#allocation2 + $0x60] sm:$0xff] %vm1937_vm11, %v1925_v28 }
 0xcfa   :  { %1853 = vst.msk [vmem:[#allocation2 + $0x70] sm:$0xff] %vm4400_vm15, %v1839_v12  ;;  %vm4405_vm15 = vcmask 490944  }
 0xcfb   :  { %1878 = vst.msk [vmem:[#allocation2 + $0x70] sm:$0xff] %vm4401_vm14, %v3945_v30  ;;  %vm4406_vm14 = vmmov %vm4402_vm0 }
 0xcfc   :  { %v2224_v21 = vpop.permute.xlu1 %2223  ;;  %v2424_v31 = vpop.permute.xlu0 %2423 }
 0xcfd   :  { %2244 = vst.msk [vmem:[#allocation2 + $0x40] sm:$0xff] %vm4402_vm0, %v2224_v21  ;;  %vm4407_vm0 = vmmov %vm4403_vm7 }
 0xcfe   :  { %v2509_v19 = vld [vmem:[#allocation2 + $0x10] sm:$0xff]  ;;  %2275 = vst.msk [vmem:[#allocation2 + $0x40] sm:$0xff] %vm4403_vm7, %v3926_v23  ;;  %vm4409_vm7 = vcmask 326944  }
 0xcff   :  { %3125 = vmatmul.mubr.f32.vlgmr.msra.gmra.mxu1 %v2509_v19 }
 0xd00   :  { %v2343_v0 = vpop.permute.xlu1 %2342  ;;  %v2450_v24 = vpop.permute.xlu0 %2449 }
 0xd01   :  { %2362 = vst.msk [vmem:[#allocation2 + $0x20] sm:$0xff] %vm2359_vm2, %v2343_v0 }
 0xd02   :  { %2389 = vst.msk [vmem:[#allocation2 + $0x20] sm:$0xff] %vm4404_vm10, %v4116_v42  ;;  %vm4410_vm10 = vmmov %vm4399_vm1 }
 0xd04   :  { %v1957_v25 = vpop.permute.xlu1 %1956  ;;  %v4208_v53 = vpop.permute.xlu0 %2376 }
 0xd05   :  { %1974 = vst.msk [vmem:[#allocation2 + $0x60] sm:$0xff] %vm1969_vm4, %v1957_v25 }
 0xd06   :  { %2003 = vst.msk [vmem:[#allocation2 + $0x60] sm:$0xff] %vm1997_vm6, %v3937_v27 }
 0xd08   :  { %v2398_v30 = vpop.permute.xlu1 %2397  ;;  %v4213_v26 = vpop.permute.xlu0 %2126 }
 0xd09   :  { %2414 = vst.msk [vmem:[#allocation2 + $0x20] sm:$0xff] %vm2411_vm12, %v2398_v30 }
 0xd0a   :  { %2440 = vst.msk [vmem:[#allocation2 + $0x20] sm:$0xff] %vm2437_vm9, %v2424_v31 }
 0xd0b   :  { %2466 = vst.msk [vmem:[#allocation2 + $0x20] sm:$0xff] %vm2463_vm3, %v2450_v24 }
 0xd0c   :  { %2489 = vst.msk [vmem:[#allocation2 + $0x20] sm:$0xff] %vm4399_vm1, %v3953_v35  ;;  %v1989_v23 = vpop.permute.xlu0 %1988  ;;  %v2260_v29 = vpop.permute.xlu1 %2259  ;;  %vm2417_vm1 = vcmask 718496  }
 0xd10   :  { %v2404_v32 = vpop.permute.xlu0 %2403  ;;  %v2478_v62 = vpop.permute.xlu1 %2477 }
 0xd13   :  { %v2510_v20 = vld [vmem:[#allocation2 + $0x20] sm:$0xff] }
 0xd14   :  { %3127 = vmatprep.mubr.f32.mxu1 %v2510_v20  ;;  %v2430_v22 = vpop.permute.xlu0 %2429  ;;  %v4220_v27 = vpop.permute.xlu1 %2161 }
 0xd18   :  { %v2456_v33 = vpop.permute.xlu0 %2455  ;;  %v2287_v55 = vpop.permute.xlu1 %2286 }
 0xd19   :  { %2304 = vst.msk [vmem:[#allocation2 + $0x40] sm:$0xff] %vm2299_vm8, %v2287_v55 }
 0xd1c   :  { %v4223_v34 = vpop.permute.xlu0 %2290  ;;  %v2400_v36 = vpop.permute.xlu1 %2399 }
 0xd1d   :  { %2415 = vst.msk [vmem:[#allocation2 + $0x30] sm:$0xff] %vm2411_vm12, %v2400_v36 }
 0xd20   :  { %v4226_v37 = vpop.permute.xlu0 %2320  ;;  %v1895_v35 = vpop.permute.xlu1 %1894 }
 0xd21   :  { %1911 = vst.msk [vmem:[#allocation2 + $0x70] sm:$0xff] %vm1905_vm5, %v1895_v35  ;;  %vm4408_vm5 = vcmask 622144  }
 0xd24   :  { %v2289_v38 = vpop.permute.xlu1 %2288  ;;  %v2158_v39 = vpop.permute.xlu0 %2157 }
 0xd25   :  { %2177 = vst.msk [vmem:[#allocation2 + $0x50] sm:$0xff] %vm2171_vm13, %v2158_v39 }
 0xd28   :  { %v2426_v40 = vpop.permute.xlu1 %2425 }
 0xd29   :  { %2441 = vst.msk [vmem:[#allocation2 + $0x30] sm:$0xff] %vm2437_vm9, %v2426_v40  ;;  %v2192_v41 = vpop.permute.xlu0 %2191 }
 0xd2a   :  { %2211 = vst.msk [vmem:[#allocation2 + $0x50] sm:$0xff] %vm4405_vm15, %v2192_v41  ;;  %vm2443_vm15 = vcmask 749248  }
 0xd2c   :  { %v1927_v42 = vpop.permute.xlu1 %1926 }
 0xd2d   :  { %1943 = vst.msk [vmem:[#allocation2 + $0x70] sm:$0xff] %vm1937_vm11, %v1927_v42  ;;  %v2226_v44 = vpop.permute.xlu0 %2225  ;;  %vm4411_vm11 = vmmov %vm4408_vm5 }
 0xd2e   :  { %2245 = vst.msk [vmem:[#allocation2 + $0x50] sm:$0xff] %vm4406_vm14, %v2226_v44  ;;  %vm2469_vm14 = vcmask 780000  }
 0xd2f   :  { %2276 = vst.msk [vmem:[#allocation2 + $0x50] sm:$0xff] %vm4407_vm0, %v2260_v29  ;;  %vm4413_vm0 = vcmask 687744  }
 0xd30   :  { %2305 = vst.msk [vmem:[#allocation2 + $0x50] sm:$0xff] %vm2299_vm8, %v2289_v38  ;;  %v2319_v45 = vpop.permute.xlu1 %2318  ;;  %vm4412_vm8 = vcmask 359744  }
 0xd31   :  { %2335 = vst.msk [vmem:[#allocation2 + $0x50] sm:$0xff] %vm4408_vm5, %v2319_v45  ;;  %v2021_v46 = vpop.permute.xlu0 %2020  ;;  %vm4416_vm5 = vcmask 425344  }
 0xd32   :  { %2040 = vst.msk [vmem:[#allocation2 + $0x60] sm:$0xff] %vm4409_vm7, %v2021_v46 }
 0xd34   :  { %v2452_v47 = vpop.permute.xlu1 %2451 }
 0xd35   :  { %2467 = vst.msk [vmem:[#allocation2 + $0x30] sm:$0xff] %vm2463_vm3, %v2452_v47  ;;  %v2317_v50 = vpop.permute.xlu0 %2316 }
 0xd36   :  { %2490 = vst.msk [vmem:[#allocation2 + $0x30] sm:$0xff] %vm4410_vm10, %v2478_v62 }
 0xd37   :  { %2334 = vst.msk [vmem:[#allocation2 + $0x40] sm:$0xff] %vm4411_vm11, %v2317_v50  ;;  %vm2306_vm11 = vcmask 587296  }
 0xd38   :  { %v1959_v43 = vpop.permute.xlu1 %1958 }
 0xd39   :  { %1975 = vst.msk [vmem:[#allocation2 + $0x70] sm:$0xff] %vm1969_vm4, %v1959_v43  ;;  %v2057_v52 = vpop.permute.xlu0 %2056  ;;  %vm4414_vm4 = vmmov %vm4413_vm0 }
 0xd3a   :  { %2004 = vst.msk [vmem:[#allocation2 + $0x70] sm:$0xff] %vm1997_vm6, %v1989_v23  ;;  %vm4415_vm6 = vcmask 392544  }
 0xd3b   :  { %2076 = vst.msk [vmem:[#allocation2 + $0x60] sm:$0xff] %vm4412_vm8, %v2057_v52 }
 0xd3c   :  { %v2349_v54 = vpop.permute.xlu1 %2348 }
 0xd3d   :  { %2365 = vst.msk [vmem:[#allocation2 + $0x50] sm:$0xff] %vm2359_vm2, %v2349_v54  ;;  %v2347_v16 = vpop.permute.xlu0 %2346  ;;  %v2511_v58 = vld [vmem:[#allocation2 + $0x30] sm:$0xff] }
 0xd3e   :  { %2392 = vst.msk [vmem:[#allocation2 + $0x50] sm:$0xff] %vm4413_vm0, %v4108_v57  ;;  %3128 = vmatmul.mubr.f32.gmra.mxu1 %v2511_v58  ;;  %vm2366_vm0 = vcmask 648800  }
 0xd3f   :  { %2364 = vst.msk [vmem:[#allocation2 + $0x40] sm:$0xff] %vm2359_vm2, %v2347_v16  ;;  %vm4417_vm2 = vcmask 490944  }
 0xd40   :  { %2418 = vst.msk [vmem:[#allocation2 + $0x50] sm:$0x3f] %vm2417_vm1, %v2404_v32  ;;  %v2160_v59 = vpop.permute.xlu1 %2159  ;;  %vm4420_vm1 = vcmask 556544  }
 0xd41   :  { %2391 = vst.msk [vmem:[#allocation2 + $0x40] sm:$0xff] %vm4414_vm4, %v4208_v53  ;;  %v2093_v60 = vpop.permute.xlu0 %2092  ;;  %vm2247_vm4 = vcmask 517600  }
 0xd42   :  { %2444 = vst.msk [vmem:[#allocation2 + $0x50] sm:$0xf] %vm2443_vm15, %v2430_v22  ;;  %vm4421_vm15 = vmmov %vm4415_vm6 }
 0xd43   :  { %2470 = vst.msk [vmem:[#allocation2 + $0x50] sm:$0x3] %vm2469_vm14, %v2456_v33  ;;  %vm2213_vm14 = vcmask 486848  }
 0xd44   :  { %2112 = vst.msk [vmem:[#allocation2 + $0x60] sm:$0xff] %vm4415_vm6, %v2093_v60  ;;  %v2428_v61 = vpop.permute.xlu1 %2427  ;;  %vm2628_vm6 = vcmask 7168  }
 0xd45   :  { %2145 = vst.msk [vmem:[#allocation2 + $0x60] sm:$0xff] %vm4416_vm5, %v4213_v26  ;;  %v2402_v57 = vpop.permute.xlu0 %2401 }
 0xd46   :  { %2178 = vst.msk [vmem:[#allocation2 + $0x60] sm:$0xff] %vm2171_vm13, %v2160_v59  ;;  %vm4418_vm13 = vmmov %vm4412_vm8  ;;  %vm2336_vm8 = vcmask 618048  }
 0xd47   :  { %2416 = vst.msk [vmem:[#allocation2 + $0x40] sm:$0xff] %vm2411_vm12, %v2402_v57  ;;  %vm4419_vm12 = vcmask 523744  }
 0xd48   :  { %2442 = vst.msk [vmem:[#allocation2 + $0x40] sm:$0xff] %vm2437_vm9, %v2428_v61  ;;  %v2194_v63 = vpop.permute.xlu1 %2193  ;;  %vm2179_vm9 = vcmask 456096  }
 0xd49   :  { %2212 = vst.msk [vmem:[#allocation2 + $0x60] sm:$0xff] %vm4417_vm2, %v2194_v63  ;;  %v2023_v1 = vpop.permute.xlu0 %2022 }
 0xd4a   :  { %2041 = vst.msk [vmem:[#allocation2 + $0x70] sm:$0xff] %vm4409_vm7, %v2023_v1 }
 0xd4c   :  { %v2454_v2 = vpop.permute.xlu1 %2453 }
 0xd4d   :  { %2468 = vst.msk [vmem:[#allocation2 + $0x40] sm:$0xff] %vm2463_vm3, %v2454_v2  ;;  %v2059_v3 = vpop.permute.xlu0 %2058  ;;  %vm4422_vm3 = vmmov %vm4416_vm5 }
 0xd4e   :  { %2491 = vst.msk [vmem:[#allocation2 + $0x40] sm:$0xff] %vm4410_vm10, %v4124_v17 }
 0xd4f   :  { %2077 = vst.msk [vmem:[#allocation2 + $0x70] sm:$0xff] %vm4418_vm13, %v2059_v3 }
 0xd50   :  { %v2228_v4 = vpop.permute.xlu1 %2227 }
 0xd51   :  { %2246 = vst.msk [vmem:[#allocation2 + $0x60] sm:$0xff] %vm4419_vm12, %v2228_v4  ;;  %v2095_v5 = vpop.permute.xlu0 %2094 }
 0xd52   :  { %2277 = vst.msk [vmem:[#allocation2 + $0x60] sm:$0xff] %vm4420_vm1, %v4131_v48  ;;  %v2513_v48 = vld [vmem:[#allocation2 + $0x50] sm:$0xff] }
 0xd53   :  { %2113 = vst.msk [vmem:[#allocation2 + $0x70] sm:$0xff] %vm4421_vm15, %v2095_v5 }
 0xd54   :  { %2146 = vst.msk [vmem:[#allocation2 + $0x70] sm:$0xff] %vm4422_vm3, %v4135_v15  ;;  %v2196_v17 = vpop.permute.xlu1 %2195 }
 0xd55   :  { %2307 = vst.msk [vmem:[#allocation2 + $0x60] sm:$0x3f] %vm2306_vm11, %v4223_v34  ;;  %v2351_v49 = vpop.permute.xlu0 %2350  ;;  %v2512_v6 = vld [vmem:[#allocation2 + $0x40] sm:$0xff] }
 0xd56   :  { %2180 = vst.msk [vmem:[#allocation2 + $0x70] sm:$0x3f] %vm2179_vm9, %v4220_v27  ;;  %3130 = vmatprep.mubr.f32.mxu1 %v2512_v6 }
 0xd57   :  { %2337 = vst.msk [vmem:[#allocation2 + $0x60] sm:$0xf] %vm2336_vm8, %v4226_v37  ;;  %3131 = vmatmul.mubr.f32.gmra.mxu1 %v2513_v48 }
 0xd58   :  { %2214 = vst.msk [vmem:[#allocation2 + $0x70] sm:$0xf] %vm2213_vm14, %v2196_v17  ;;  %v2230_v56 = vpop.permute.xlu1 %2229 }
 0xd59   :  { %2367 = vst.msk [vmem:[#allocation2 + $0x60] sm:$0x3] %vm2366_vm0, %v2351_v49 }
 0xd5a   :  { %2248 = vst.msk [vmem:[#allocation2 + $0x70] sm:$0x3] %vm2247_vm4, %v2230_v56 }
 0xd60   :  { %v2514_v7 = vld [vmem:[#allocation2 + $0x60] sm:$0xff] }
 0xd61   :  { %3133 = vmatprep.mubr.f32.mxu1 %v2514_v7  ;;  %v2515_v15 = vld [vmem:[#allocation2 + $0x70] sm:$0xff] }
 0xd62   :  { %3134 = vmatmul.mubr.f32.gmra.mxu1 %v2515_v15 }
 0xdbf   :  { %v3126_v8 = vpop.f32.mrf.mxu1 }
 0xdc0   :  { %v2593_v18 = vadd.f32 %v3126_v8, %v2787_v11 }
 0xdc1   :  { %v2587_v9 = vpop.f32.mrf.mxu1 }
 0xdc2   :  { %v2588_v14 = vadd.f32 %v2787_v11, %v2587_v9  ;;  %v2630_v21 = vsel %vm2628_vm6, %v2593_v18, 0.0 }
 0xdc4   :  { %v2629_v28 = vsel %vm2628_vm6, %v2588_v14, 0.0 }
 0xdc5   :  { %v2631_v19 = vadd.f32 %v2630_v21, %v2629_v28 }
 0xdfe   :  { %v3129_v10 = vpop.f32.mrf.mxu1 }
 0xdff   :  { %v2603_v24 = vadd.f32 %v3129_v10, %v2787_v11 }
 0xe00   :  { %v2597_v13 = vpop.f32.mrf.mxu1 }
 0xe01   :  { %v2598_v51 = vadd.f32 %v2787_v11, %v2597_v13  ;;  %v2634_v30 = vsel %vm2628_vm6, %v2603_v24, 0.0 }
 0xe03   :  { %v2632_v31 = vsel %vm2628_vm6, %v2598_v51, 0.0 }
 0xe04   :  { %v2633_v53 = vadd.f32 %v2632_v31, %v2631_v19 }
 0xe06   :  { %v2635_v23 = vadd.f32 %v2634_v30, %v2633_v53 }
 0xe17   :  { %v3132_v12 = vpop.f32.mrf.mxu1 }
 0xe18   :  { %v2613_v29 = vadd.f32 %v3132_v12, %v2787_v11 }
 0xe19   :  { %v2607_v0 = vpop.f32.mrf.mxu1 }
 0xe1a   :  { %v2608_v25 = vadd.f32 %v2787_v11, %v2607_v0  ;;  %v2638_v22 = vsel %vm2628_vm6, %v2613_v29, 0.0 }
 0xe1c   :  { %v2636_v26 = vsel %vm2628_vm6, %v2608_v25, 0.0 }
 0xe1d   :  { %v2637_v32 = vadd.f32 %v2636_v26, %v2635_v23 }
 0xe1f   :  { %v2639_v55 = vadd.f32 %v2638_v22, %v2637_v32 }
 0xe22   :  { %v3135_v62 = vpop.f32.mrf.mxu1 }
 0xe23   :  { %v2623_v27 = vadd.f32 %v3135_v62, %v2787_v11 }
 0xe24   :  { %v2617_v20 = vpop.f32.mrf.mxu1 }
 0xe25   :  { %v2618_v33 = vadd.f32 %v2787_v11, %v2617_v20  ;;  %v2642_v37 = vsel %vm2628_vm6, %v2623_v27, 0.0 }
 0xe27   :  { %v2640_v34 = vsel %vm2628_vm6, %v2618_v33, 0.0 }
 0xe28   :  { %v2641_v36 = vadd.f32 %v2640_v34, %v2639_v55 }
 0xe2a   :  { %v2643_v35 = vadd.f32 %v2642_v37, %v2641_v36 }
 0xe2c   :  { %v2644_v38 = vrot.slane %v2643_v35, 4 }
 0xe2e   :  { %v2645_v39 = vadd.f32 %v2644_v38, %v2643_v35 }
 0xe30   :  { %v2646_v40 = vrot.slane %v2645_v39, 2 }
 0xe32   :  { %v2647_v41 = vadd.f32 %v2646_v40, %v2645_v39 }
 0xe34   :  { %v2648_v42 = vrot.slane %v2647_v41, 1 }
 0xe36   :  { %v2649_v44 = vadd.f32 %v2648_v42, %v2647_v41 }
 0xe38   :  { %v2650_v45 = vmul.f32 0.015625, %v2649_v44 }
 0xe3a   :  { %v2651_v46 = vsub.f32 %v2588_v14, %v2650_v45  ;;  %v2652_v47 = vsub.f32 %v2593_v18, %v2650_v45  ;;  %v2653_v50 = vsub.f32 %v2598_v51, %v2650_v45  ;;  %v2654_v43 = vsub.f32 %v2603_v24, %v2650_v45 }
 0xe3b   :  { %v2655_v52 = vsub.f32 %v2608_v25, %v2650_v45  ;;  %v2656_v59 = vsub.f32 %v2613_v29, %v2650_v45  ;;  %v2657_v1 = vsub.f32 %v2618_v33, %v2650_v45  ;;  %v2658_v5 = vsub.f32 %v2623_v27, %v2650_v45  ;;  %v2788_v25 = vld [vmem:[#allocation5 + $0x3b1] ss:$0 sm:$0xff]  ;;  %v2789_v29 = vld [vmem:[#allocation5 + $0x3b2] ss:$0 sm:$0xff] }
 0xe3c   :  { %v2659_v54 = vmul.f32 %v2651_v46, %v2651_v46  ;;  %v2660_v16 = vmul.f32 %v2652_v47, %v2652_v47  ;;  %v2661_v58 = vmul.f32 %v2653_v50, %v2653_v50  ;;  %v2662_v60 = vmul.f32 %v2654_v43, %v2654_v43 }
 0xe3d   :  { %v2663_v2 = vmul.f32 %v2655_v52, %v2655_v52  ;;  %v2664_v17 = vmul.f32 %v2656_v59, %v2656_v59  ;;  %v2665_v48 = vmul.f32 %v2657_v1, %v2657_v1  ;;  %v2666_v15 = vmul.f32 %v2658_v5, %v2658_v5 }
 0xe3e   :  { %v2667_v61 = vsel %vm2628_vm6, %v2659_v54, 0.0  ;;  %v2668_v57 = vsel %vm2628_vm6, %v2660_v16, 0.0  ;;  %v2670_v3 = vsel %vm2628_vm6, %v2661_v58, 0.0  ;;  %v2672_v49 = vsel %vm2628_vm6, %v2662_v60, 0.0 }
 0xe3f   :  { %v2669_v63 = vadd.f32 %v2668_v57, %v2667_v61  ;;  %v2674_v56 = vsel %vm2628_vm6, %v2663_v2, 0.0  ;;  %v2676_v8 = vsel %vm2628_vm6, %v2664_v17, 0.0  ;;  %v2678_v10 = vsel %vm2628_vm6, %v2665_v48, 0.0 }
 0xe40   :  { %v2680_v13 = vsel %vm2628_vm6, %v2666_v15, 0.0 }
 0xe41   :  { %v2671_v4 = vadd.f32 %v2670_v3, %v2669_v63 }
 0xe43   :  { %v2673_v6 = vadd.f32 %v2672_v49, %v2671_v4 }
 0xe45   :  { %v2675_v7 = vadd.f32 %v2674_v56, %v2673_v6 }
 0xe47   :  { %v2677_v9 = vadd.f32 %v2676_v8, %v2675_v7 }
 0xe49   :  { %v2679_v11 = vadd.f32 %v2678_v10, %v2677_v9 }
 0xe4b   :  { %v2681_v14 = vadd.f32 %v2680_v13, %v2679_v11 }
 0xe4d   :  { %v2682_v18 = vrot.slane %v2681_v14, 4 }
 0xe4f   :  { %v2683_v51 = vadd.f32 %v2682_v18, %v2681_v14 }
 0xe51   :  { %v2684_v28 = vrot.slane %v2683_v51, 2 }
 0xe53   :  { %v2685_v12 = vadd.f32 %v2684_v28, %v2683_v51 }
 0xe55   :  { %v2686_v21 = vrot.slane %v2685_v12, 1 }
 0xe57   :  { %v2687_v31 = vadd.f32 %v2686_v21, %v2685_v12 }
 0xe59   :  { %v2688_v19 = vmul.f32 0.015625, %v2687_v31 }
 0xe5b   :  { %v2689_v0 = vadd.f32 1e-05, %v2688_v19 }
 0xe5d   :  { %3178 = vrsqrt.f32 %v2689_v0 }
 0xe6a   :  { %v3179_v24 = vpop.eup %3178 }
 0xe6b   :  { %v2691_v53 = vmul.f32 %v3179_v24, %v2651_v46  ;;  %v2692_v30 = vmul.f32 %v3179_v24, %v2652_v47  ;;  %v2693_v26 = vmul.f32 %v3179_v24, %v2653_v50  ;;  %v2694_v23 = vmul.f32 %v3179_v24, %v2654_v43 }
 0xe6c   :  { %v2695_v32 = vmul.f32 %v3179_v24, %v2655_v52  ;;  %v2696_v62 = vmul.f32 %v3179_v24, %v2656_v59  ;;  %v2697_v20 = vmul.f32 %v3179_v24, %v2657_v1  ;;  %v2698_v22 = vmul.f32 %v3179_v24, %v2658_v5 }
 0xe6d   :  { %v2703_v27 = vmul.f32 %v2788_v25, %v2691_v53  ;;  %v2704_v33 = vmul.f32 %v2788_v25, %v2692_v30  ;;  %v2705_v55 = vmul.f32 %v2788_v25, %v2693_v26  ;;  %v2706_v34 = vmul.f32 %v2788_v25, %v2694_v23 }
 0xe6e   :  { %v2707_v36 = vmul.f32 %v2788_v25, %v2695_v32  ;;  %v2708_v37 = vmul.f32 %v2788_v25, %v2696_v62  ;;  %v2709_v35 = vmul.f32 %v2788_v25, %v2697_v20  ;;  %v2710_v38 = vmul.f32 %v2788_v25, %v2698_v22 }
 0xe6f   :  { %v2715_v39 = vadd.f32 %v2789_v29, %v2703_v27  ;;  %v2716_v40 = vadd.f32 %v2789_v29, %v2704_v33  ;;  %v2717_v41 = vadd.f32 %v2789_v29, %v2705_v55  ;;  %v2718_v42 = vadd.f32 %v2789_v29, %v2706_v34 }
 0xe70   :  { %v2719_v44 = vadd.f32 %v2789_v29, %v2707_v36  ;;  %v2720_v45 = vadd.f32 %v2789_v29, %v2708_v37  ;;  %v2721_v46 = vadd.f32 %v2789_v29, %v2709_v35  ;;  %v2722_v52 = vadd.f32 %v2789_v29, %v2710_v38 }
 0xe71   :  { %v2723_v47 = vmax.f32 %v2715_v39, 0.0  ;;  %v2724_v50 = vmax.f32 %v2716_v40, 0.0  ;;  %v2725_v43 = vmax.f32 %v2717_v41, 0.0  ;;  %v2726_v54 = vmax.f32 %v2718_v42, 0.0 }
 0xe72   :  { %v2727_v16 = vmax.f32 %v2719_v44, 0.0  ;;  %v2728_v58 = vmax.f32 %v2720_v45, 0.0  ;;  %v2729_v59 = vmax.f32 %v2721_v46, 0.0  ;;  %v2730_v60 = vmax.f32 %v2722_v52, 0.0 }
 0xe73   :  { %3180 = vtanh.f32 %v2723_v47 }
 0xe74   :  { %3182 = vtanh.f32 %v2724_v50 }
 0xe75   :  { %3184 = vtanh.f32 %v2725_v43 }
 0xe76   :  { %3186 = vtanh.f32 %v2726_v54 }
 0xe77   :  { %3188 = vtanh.f32 %v2727_v16 }
 0xe78   :  { %3190 = vtanh.f32 %v2728_v58 }
 0xe79   :  { %3192 = vtanh.f32 %v2729_v59 }
 0xe7a   :  { %3194 = vtanh.f32 %v2730_v60 }
 0xe80   :  { %v3181_v61 = vpop.eup %3180 }
 0xe81   :  { %v3183_v57 = vpop.eup %3182  ;;  %2739 = vst.msk [vmem:[%s4321_s2] sm:$0xff] %vm2628_vm6, %v3181_v61 }
 0xe82   :  { %v3185_v63 = vpop.eup %3184  ;;  %2740 = vst.msk [vmem:[%s4321_s2 + $0x8] sm:$0xff] %vm2628_vm6, %v3183_v57 }
 0xe83   :  { %v3187_v1 = vpop.eup %3186  ;;  %2741 = vst.msk [vmem:[%s4321_s2 + $0x10] sm:$0xff] %vm2628_vm6, %v3185_v63 }
 0xe84   :  { %v3189_v2 = vpop.eup %3188  ;;  %2742 = vst.msk [vmem:[%s4321_s2 + $0x18] sm:$0xff] %vm2628_vm6, %v3187_v1 }
 0xe85   :  { %v3191_v3 = vpop.eup %3190  ;;  %2743 = vst.msk [vmem:[%s4321_s2 + $0x20] sm:$0xff] %vm2628_vm6, %v3189_v2 }
 0xe86   :  { %v3193_v4 = vpop.eup %3192  ;;  %2744 = vst.msk [vmem:[%s4321_s2 + $0x28] sm:$0xff] %vm2628_vm6, %v3191_v3 }
 0xe87   :  { %v3195_v5 = vpop.eup %3194  ;;  %2745 = vst.msk [vmem:[%s4321_s2 + $0x30] sm:$0xff] %vm2628_vm6, %v3193_v4 }
 0xe88   :  { %2746 = vst.msk [vmem:[%s4321_s2 + $0x38] sm:$0xff] %vm2628_vm6, %v3195_v5 }
 0xe89   :  { %2751 = vsyncpa [#allocation4], 1 }
 0xe8a   :  { %2752 = vsyncpa [#allocation6], 1 }

</bundles_post_ra>
